<compile_context>
chip_gen: v6e
topology: v6e:2x2x1
jax: 0.10.0
libtpu: 0.0.40
codegen_flags: <defaults>
</compile_context>

<pallas_src>
from functools import partial

import jax
import jax.numpy as jnp
from jax.experimental import pallas as pl
from jax.experimental.pallas import tpu as pltpu


# --------------------------------------------------------------------------- fused kernel

def _lenet_kernel(xp_ref, t1_ref, b1_ref, t2_ref, b2_ref,
                  wf1_ref, bf1_ref, wf2_ref, bf2_ref, wf3_ref, bf3_ref,
                  out_ref, *, tb):
    f32 = jnp.float32
    b1 = b1_ref[...]          # (1, 256), hoisted out of the unrolled loops
    b2 = b2_ref[...]          # (1, 256)

    # ---------------- conv1 (5x5, 1->6) + ReLU -----------------------------------
    # xp rows (within phase f) are (m, tb)-major: xp[0, f, m*TB + tb, :] = x[b, 4*m+f, :].
    # T1[kh] is (32, 256): columns dj*128 + c*14 + q (only first 84 lanes/half non-zero).
    h1 = []
    for r in range(4):                         # conv1 output rows i = 4*m + r
        acc = None
        for kh in range(5):
            s = r + kh                         # needed input row = 4*m + s
            f = s % 4
            k0 = s // 4
            lhs = xp_ref[0, f, k0 * tb:(k0 + 7) * tb, :]          # (7*TB, 32)
            d = jnp.dot(lhs, t1_ref[kh], preferred_element_type=f32)
            acc = d if acc is None else acc + d
        h1.append(jnp.maximum(acc + b1, 0.0))                     # (7*TB, 256)

    # ---------------- 2x2 max-pool #1 (lane-aligned halves) ----------------------
    a1 = [jnp.maximum(jnp.maximum(h1[0][:, :128], h1[0][:, 128:]),
                      jnp.maximum(h1[1][:, :128], h1[1][:, 128:])),   # pooled rows 2m
          jnp.maximum(jnp.maximum(h1[2][:, :128], h1[2][:, 128:]),
                      jnp.maximum(h1[3][:, :128], h1[3][:, 128:]))]   # pooled rows 2m+1
    # a1[par][m*TB + tb, c*14 + q] == pooled1[b, c, 2m+par, q]   (lanes >= 84 are 0)

    # ---------------- conv2 (5x5, 6->16, channels folded) + ReLU -----------------
    # T2[kh] is (128, 256): rows c*14 + q_in, columns dj*128 + o*5 + q2.
    h2 = []
    for di in range(2):                        # conv2 output rows i2 = 2*p2 + di
        acc = None
        for kh in range(5):
            s = di + kh                        # needed pooled1 row = 2*p2 + s
            par = s % 2
            k0 = s // 2
            lhs = a1[par][k0 * tb:(k0 + 5) * tb, :]               # (5*TB, 128)
            d = jnp.dot(lhs, t2_ref[kh], preferred_element_type=f32)
            acc = d if acc is None else acc + d
        h2.append(jnp.maximum(acc + b2, 0.0))                     # (5*TB, 256)

    # ---------------- 2x2 max-pool #2 --------------------------------------------
    a2 = jnp.maximum(jnp.maximum(h2[0][:, :128], h2[0][:, 128:]),
                     jnp.maximum(h2[1][:, :128], h2[1][:, 128:]))     # (5*TB, 128)
    # a2[p2*TB + tb, o*5 + q2] == pooled2[b, o, p2, q2]   (lanes >= 80 are 0)

    # ---------------- fc1 + ReLU (PyTorch flatten order folded into wf1) ---------
    acc = None
    for p in range(5):
        d = jnp.dot(a2[p * tb:(p + 1) * tb, :], wf1_ref[p],
                    preferred_element_type=f32)
        acc = d if acc is None else acc + d
    z = jnp.maximum(acc + bf1_ref[...], 0.0)                      # (TB, 128)

    # ---------------- fc2 + ReLU, fc3 (all padded to 128 lanes) ------------------
    z = jnp.maximum(jnp.dot(z, wf2_ref[...], preferred_element_type=f32)
                    + bf2_ref[...], 0.0)                          # (TB, 128)
    out_ref[...] = (jnp.dot(z, wf3_ref[...], preferred_element_type=f32)
                    + bf3_ref[...]).astype(out_ref.dtype)         # (TB, 128)


# --------------------------------------------------------------- weight pre-arrangement

def _conv1_band(w1):
    """w1 (6,1,5,5) -> T1 (5, 32, 256); T1[kh, j_in, dj*128 + c*14 + q] = w1[c,0,kh, j_in-(2q+dj)]."""
    j_in = jnp.arange(32)
    dj = jnp.arange(2)
    q = jnp.arange(14)
    joff = 2 * q[None, :] + dj[:, None]                     # (2, 14)
    kw = j_in[:, None, None] - joff[None, :, :]             # (32, 2, 14)
    valid = (kw >= 0) & (kw <= 4)
    kwc = jnp.clip(kw, 0, 4)
    wk = jnp.transpose(w1[:, 0, :, :], (1, 0, 2))           # (5, 6, 5)  [kh, c, kw]
    vals = wk[:, :, kwc]                                    # (5, 6, 32, 2, 14)
    vals = jnp.where(valid[None, None], vals, 0.0)
    band = jnp.transpose(vals, (0, 2, 3, 1, 4)).reshape(5, 32, 2, 84)   # [kh, j_in, dj, c*14+q]
    band = jnp.pad(band, ((0, 0), (0, 0), (0, 0), (0, 128 - 84)))
    return band.reshape(5, 32, 256)


def _conv2_band(w2):
    """w2 (16,6,5,5) -> T2 (5, 128, 256); T2[kh, c*14+q_in, dj*128 + o*5 + q2] = w2[o,c,kh, q_in-(2q2+dj)]."""
    q_in = jnp.arange(14)
    dj = jnp.arange(2)
    q2 = jnp.arange(5)
    joff = 2 * q2[None, :] + dj[:, None]                    # (2, 5)
    kw = q_in[:, None, None] - joff[None, :, :]             # (14, 2, 5)
    valid = (kw >= 0) & (kw <= 4)
    kwc = jnp.clip(kw, 0, 4)
    wt = jnp.transpose(w2, (1, 2, 0, 3))                    # (6, 5, 16, 5)  [c, kh, o, kw]
    vals = wt[:, :, :, kwc]                                 # (6, 5, 16, 14, 2, 5)
    vals = jnp.where(valid[None, None, None], vals, 0.0)
    # -> [kh, c, q_in, dj, o, q2]
    band = jnp.transpose(vals, (1, 0, 3, 4, 2, 5)).reshape(5, 84, 2, 80)
    band = jnp.pad(band, ((0, 0), (0, 128 - 84), (0, 0), (0, 128 - 80)))
    return band.reshape(5, 128, 256)


def prepare_params(params):
    """One-time conversion of PyTorch-layout weights into kernel-ready, lane-padded tensors."""
    def pad_last(a, n):
        return jnp.pad(a, [(0, 0)] * (a.ndim - 1) + [(0, n - a.shape[-1])])

    b1h = pad_last(jnp.repeat(params["conv1_b"], 14), 128)            # (128,)
    b2h = pad_last(jnp.repeat(params["conv2_b"], 5), 128)             # (128,)

    # fc1 weight permuted so rows index (p2, o, q2): contraction happens per pooled row.
    wf1 = (params["fc1_w"].reshape(120, 16, 5, 5)
           .transpose(2, 1, 3, 0).reshape(5, 80, 120))
    wf1 = jnp.pad(wf1, ((0, 0), (0, 128 - 80), (0, 128 - 120)))       # (5, 128, 128)
    wf2 = jnp.pad(params["fc2_w"].T, ((0, 128 - 120), (0, 128 - 84))) # (128, 128)
    wf3 = jnp.pad(params["fc3_w"].T, ((0, 128 - 84), (0, 128 - 10)))  # (128, 128)

    return {
        "t1":  _conv1_band(params["conv1_w"]),                        # (5, 32, 256)
        "b1":  jnp.tile(b1h, 2).reshape(1, 256),
        "t2":  _conv2_band(params["conv2_w"]),                        # (5, 128, 256)
        "b2":  jnp.tile(b2h, 2).reshape(1, 256),
        "wf1": wf1,
        "bf1": pad_last(params["fc1_b"], 128).reshape(1, 128),
        "wf2": wf2,
        "bf2": pad_last(params["fc2_b"], 128).reshape(1, 128),
        "wf3": wf3,
        "bf3": pad_last(params["fc3_b"], 128).reshape(1, 128),
    }


# ------------------------------------------------------------------------------ forward

def _round_up(n, m):
    return ((n + m - 1) // m) * m


@jax.jit
def lenet_forward(prepped, x):
    B = x.shape[0]
    TB = min(128, _round_up(B, 8))        # batch tile (multiple of 8, VMEM-safe on v7x too)
    B_pad = _round_up(B, TB)
    G = B_pad // TB

    x = x.reshape(B, 32, 32).astype(jnp.float32)   # single input channel
    if B_pad != B:
        x = jnp.pad(x, ((0, B_pad - B), (0, 0), (0, 0)))

    # xp[g, f, m*TB + tb, :] = x[g*TB + tb, 4*m + f, :]  (rows pre-sorted by row mod 4,
    # batch folded into the sublane axis so each conv tap LHS is one contiguous slice)
    xp = (x.reshape(G, TB, 8, 4, 32)
            .transpose(0, 3, 2, 1, 4)
            .reshape(G, 4, 8 * TB, 32))

    out = pl.pallas_call(
        partial(_lenet_kernel, tb=TB),
        out_shape=jax.ShapeDtypeStruct((B_pad, 128), jnp.float32),
        grid=(G,),
        in_specs=[
            pl.BlockSpec((1, 4, 8 * TB, 32), lambda g: (g, 0, 0, 0)),   # batch-tile input
            pl.BlockSpec((5, 32, 256), lambda g: (0, 0, 0)),            # conv1 band weights
            pl.BlockSpec((1, 256), lambda g: (0, 0)),
            pl.BlockSpec((5, 128, 256), lambda g: (0, 0, 0)),           # conv2 band weights
            pl.BlockSpec((1, 256), lambda g: (0, 0)),
            pl.BlockSpec((5, 128, 128), lambda g: (0, 0, 0)),           # fc1
            pl.BlockSpec((1, 128), lambda g: (0, 0)),
            pl.BlockSpec((128, 128), lambda g: (0, 0)),                 # fc2
            pl.BlockSpec((1, 128), lambda g: (0, 0)),
            pl.BlockSpec((128, 128), lambda g: (0, 0)),                 # fc3 (padded to 128)
            pl.BlockSpec((1, 128), lambda g: (0, 0)),
        ],
        out_specs=pl.BlockSpec((TB, 128), lambda g: (g, 0)),
        compiler_params=pltpu.CompilerParams(
            dimension_semantics=("parallel",)),
    )(xp, prepped["t1"], prepped["b1"], prepped["t2"], prepped["b2"],
      prepped["wf1"], prepped["bf1"], prepped["wf2"], prepped["bf2"],
      prepped["wf3"], prepped["bf3"])
    return out[:B, :10]


# ----------------------------------------------------------------------- params & reference

def init_params(key):
    ks = jax.random.split(key, 10)
    def w(k, shape, fan_in):
        return (jax.random.normal(k, shape, jnp.float32) / jnp.sqrt(fan_in)).astype(jnp.float32)
    return {
        "conv1_w": w(ks[0], (6, 1, 5, 5), 25),
        "conv1_b": w(ks[1], (6,), 25),
        "conv2_w": w(ks[2], (16, 6, 5, 5), 150),
        "conv2_b": w(ks[3], (16,), 150),
        "fc1_w":   w(ks[4], (120, 400), 400),
        "fc1_b":   w(ks[5], (120,), 400),
        "fc2_w":   w(ks[6], (84, 120), 120),
        "fc2_b":   w(ks[7], (84,), 120),
        "fc3_w":   w(ks[8], (10, 84), 84),
        "fc3_b":   w(ks[9], (10,), 84),
    }


def net_forward_ref(params, x):
    """Pure-jnp reference of the same math (PyTorch semantics), for a sanity check."""
    def conv(x, w, b):
        y = jax.lax.conv_general_dilated(
            x, w, window_strides=(1, 1), padding="VALID",
            dimension_numbers=("NCHW", "OIHW", "NCHW"))
        return jnp.maximum(y + b[None, :, None, None], 0.0)
    def pool(x):
        B, C, H, W = x.shape
        return x.reshape(B, C, H // 2, 2, W // 2, 2).max(axis=(3, 5))
    x = pool(conv(x, params["conv1_w"], params["conv1_b"]))
    x = pool(conv(x, params["conv2_w"], params["conv2_b"]))
    x = x.reshape(x.shape[0], -1)
    x = jnp.maximum(x @ params["fc1_w"].T + params["fc1_b"], 0.0)
    x = jnp.maximum(x @ params["fc2_w"].T + params["fc2_b"], 0.0)
    return x @ params["fc3_w"].T + params["fc3_b"]


if __name__ == "__main__":
    key = jax.random.PRNGKey(0)
    pkey, xkey = jax.random.split(key)
    params = init_params(pkey)
    prepped = prepare_params(params)

    # LeNet geometry requires a 32x32 single-channel input so the flatten is 16*5*5.
    # B=2 also exercises the batch-padding path (B_pad=8, one grid step).
    x = jax.random.normal(xkey, (2, 1, 32, 32), jnp.float32)

    out = jax.block_until_ready(lenet_forward(prepped, x))
    ref = jax.block_until_ready(net_forward_ref(params, x))

    assert out.shape == (2, 10)
    assert jnp.allclose(out, ref, rtol=1e-3, atol=1e-3), float(jnp.max(jnp.abs(out - ref)))
    print("KERNEL_OK")
</pallas_src>

<mosaic_0001>
module attributes {stable_mosaic.version = 11 : i64} {
  func.func @_lenet_kernel(%arg0: i32, %arg1: memref<1x4x64x32xf32, #tpu.memory_space<vmem>>, %arg2: memref<5x32x256xf32, #tpu.memory_space<vmem>>, %arg3: memref<1x256xf32, #tpu.memory_space<vmem>>, %arg4: memref<5x128x256xf32, #tpu.memory_space<vmem>>, %arg5: memref<1x256xf32, #tpu.memory_space<vmem>>, %arg6: memref<5x128x128xf32, #tpu.memory_space<vmem>>, %arg7: memref<1x128xf32, #tpu.memory_space<vmem>>, %arg8: memref<128x128xf32, #tpu.memory_space<vmem>>, %arg9: memref<1x128xf32, #tpu.memory_space<vmem>>, %arg10: memref<128x128xf32, #tpu.memory_space<vmem>>, %arg11: memref<1x128xf32, #tpu.memory_space<vmem>>, %arg12: memref<8x128xf32, #tpu.memory_space<vmem>>) attributes {dimension_semantics = [#tpu.dimension_semantics<parallel>], iteration_bounds = array<i64: 1>, scalar_prefetch = 0 : i64, scratch_operands = 0 : i64, tpu.core_type = #tpu.core_type<tc>, window_params = [{transform_indices = @transform_0, window_bounds = array<i64: 1, 4, 64, 32>}, {pipeline_mode = #tpu.pipeline_mode<synchronous>, transform_indices = @transform_1, window_bounds = array<i64: 5, 32, 256>}, {pipeline_mode = #tpu.pipeline_mode<synchronous>, transform_indices = @transform_2, window_bounds = array<i64: 1, 256>}, {pipeline_mode = #tpu.pipeline_mode<synchronous>, transform_indices = @transform_3, window_bounds = array<i64: 5, 128, 256>}, {pipeline_mode = #tpu.pipeline_mode<synchronous>, transform_indices = @transform_4, window_bounds = array<i64: 1, 256>}, {pipeline_mode = #tpu.pipeline_mode<synchronous>, transform_indices = @transform_5, window_bounds = array<i64: 5, 128, 128>}, {pipeline_mode = #tpu.pipeline_mode<synchronous>, transform_indices = @transform_6, window_bounds = array<i64: 1, 128>}, {pipeline_mode = #tpu.pipeline_mode<synchronous>, transform_indices = @transform_7, window_bounds = array<i64: 128, 128>}, {pipeline_mode = #tpu.pipeline_mode<synchronous>, transform_indices = @transform_8, window_bounds = array<i64: 1, 128>}, {pipeline_mode = #tpu.pipeline_mode<synchronous>, transform_indices = @transform_9, window_bounds = array<i64: 128, 128>}, {pipeline_mode = #tpu.pipeline_mode<synchronous>, transform_indices = @transform_10, window_bounds = array<i64: 1, 128>}, {transform_indices = @transform_11, window_bounds = array<i64: 8, 128>}]} {
    %c0 = arith.constant 0 : index
    %c0_0 = arith.constant 0 : index
    %0 = vector.load %arg3[%c0, %c0_0] : memref<1x256xf32, #tpu.memory_space<vmem>>, vector<1x256xf32>
    %c0_1 = arith.constant 0 : index
    %c0_2 = arith.constant 0 : index
    %1 = vector.load %arg5[%c0_1, %c0_2] : memref<1x256xf32, #tpu.memory_space<vmem>>, vector<1x256xf32>
    %c0_3 = arith.constant 0 : index
    %c0_4 = arith.constant 0 : index
    %c0_5 = arith.constant 0 : index
    %c0_6 = arith.constant 0 : index
    %2 = vector.load %arg1[%c0_3, %c0_4, %c0_5, %c0_6] : memref<1x4x64x32xf32, #tpu.memory_space<vmem>>, vector<1x1x56x32xf32>
    %3 = vector.shape_cast %2 : vector<1x1x56x32xf32> to vector<56x32xf32>
    %c0_7 = arith.constant 0 : index
    %c0_8 = arith.constant 0 : index
    %c0_9 = arith.constant 0 : index
    %4 = vector.load %arg2[%c0_7, %c0_8, %c0_9] : memref<5x32x256xf32, #tpu.memory_space<vmem>>, vector<1x32x256xf32>
    %5 = vector.shape_cast %4 : vector<1x32x256xf32> to vector<32x256xf32>
    %cst = arith.constant dense<0.000000e+00> : vector<56x256xf32>
    %6 = tpu.matmul %3, %5, %cst {dimension_numbers = #tpu.dot_dimension_numbers<[1], [0], [0], [1], [0, 0, 1, 1], [], []>} : vector<56x32xf32>, vector<32x256xf32>, vector<56x256xf32> -> vector<56x256xf32>
    %c0_10 = arith.constant 0 : index
    %c1 = arith.constant 1 : index
    %c0_11 = arith.constant 0 : index
    %c0_12 = arith.constant 0 : index
    %7 = vector.load %arg1[%c0_10, %c1, %c0_11, %c0_12] : memref<1x4x64x32xf32, #tpu.memory_space<vmem>>, vector<1x1x56x32xf32>
    %8 = vector.shape_cast %7 : vector<1x1x56x32xf32> to vector<56x32xf32>
    %c1_13 = arith.constant 1 : index
    %c0_14 = arith.constant 0 : index
    %c0_15 = arith.constant 0 : index
    %9 = vector.load %arg2[%c1_13, %c0_14, %c0_15] : memref<5x32x256xf32, #tpu.memory_space<vmem>>, vector<1x32x256xf32>
    %10 = vector.shape_cast %9 : vector<1x32x256xf32> to vector<32x256xf32>
    %cst_16 = arith.constant dense<0.000000e+00> : vector<56x256xf32>
    %11 = tpu.matmul %8, %10, %cst_16 {dimension_numbers = #tpu.dot_dimension_numbers<[1], [0], [0], [1], [0, 0, 1, 1], [], []>} : vector<56x32xf32>, vector<32x256xf32>, vector<56x256xf32> -> vector<56x256xf32>
    %12 = arith.addf %6, %11 : vector<56x256xf32>
    %c0_17 = arith.constant 0 : index
    %c2 = arith.constant 2 : index
    %c0_18 = arith.constant 0 : index
    %c0_19 = arith.constant 0 : index
    %13 = vector.load %arg1[%c0_17, %c2, %c0_18, %c0_19] : memref<1x4x64x32xf32, #tpu.memory_space<vmem>>, vector<1x1x56x32xf32>
    %14 = vector.shape_cast %13 : vector<1x1x56x32xf32> to vector<56x32xf32>
    %c2_20 = arith.constant 2 : index
    %c0_21 = arith.constant 0 : index
    %c0_22 = arith.constant 0 : index
    %15 = vector.load %arg2[%c2_20, %c0_21, %c0_22] : memref<5x32x256xf32, #tpu.memory_space<vmem>>, vector<1x32x256xf32>
    %16 = vector.shape_cast %15 : vector<1x32x256xf32> to vector<32x256xf32>
    %cst_23 = arith.constant dense<0.000000e+00> : vector<56x256xf32>
    %17 = tpu.matmul %14, %16, %cst_23 {dimension_numbers = #tpu.dot_dimension_numbers<[1], [0], [0], [1], [0, 0, 1, 1], [], []>} : vector<56x32xf32>, vector<32x256xf32>, vector<56x256xf32> -> vector<56x256xf32>
    %18 = arith.addf %12, %17 : vector<56x256xf32>
    %c0_24 = arith.constant 0 : index
    %c3 = arith.constant 3 : index
    %c0_25 = arith.constant 0 : index
    %c0_26 = arith.constant 0 : index
    %19 = vector.load %arg1[%c0_24, %c3, %c0_25, %c0_26] : memref<1x4x64x32xf32, #tpu.memory_space<vmem>>, vector<1x1x56x32xf32>
    %20 = vector.shape_cast %19 : vector<1x1x56x32xf32> to vector<56x32xf32>
    %c3_27 = arith.constant 3 : index
    %c0_28 = arith.constant 0 : index
    %c0_29 = arith.constant 0 : index
    %21 = vector.load %arg2[%c3_27, %c0_28, %c0_29] : memref<5x32x256xf32, #tpu.memory_space<vmem>>, vector<1x32x256xf32>
    %22 = vector.shape_cast %21 : vector<1x32x256xf32> to vector<32x256xf32>
    %cst_30 = arith.constant dense<0.000000e+00> : vector<56x256xf32>
    %23 = tpu.matmul %20, %22, %cst_30 {dimension_numbers = #tpu.dot_dimension_numbers<[1], [0], [0], [1], [0, 0, 1, 1], [], []>} : vector<56x32xf32>, vector<32x256xf32>, vector<56x256xf32> -> vector<56x256xf32>
    %24 = arith.addf %18, %23 : vector<56x256xf32>
    %c0_31 = arith.constant 0 : index
    %c0_32 = arith.constant 0 : index
    %c8 = arith.constant 8 : index
    %c0_33 = arith.constant 0 : index
    %25 = vector.load %arg1[%c0_31, %c0_32, %c8, %c0_33] : memref<1x4x64x32xf32, #tpu.memory_space<vmem>>, vector<1x1x56x32xf32>
    %26 = vector.shape_cast %25 : vector<1x1x56x32xf32> to vector<56x32xf32>
    %c4 = arith.constant 4 : index
    %c0_34 = arith.constant 0 : index
    %c0_35 = arith.constant 0 : index
    %27 = vector.load %arg2[%c4, %c0_34, %c0_35] : memref<5x32x256xf32, #tpu.memory_space<vmem>>, vector<1x32x256xf32>
    %28 = vector.shape_cast %27 : vector<1x32x256xf32> to vector<32x256xf32>
    %cst_36 = arith.constant dense<0.000000e+00> : vector<56x256xf32>
    %29 = tpu.matmul %26, %28, %cst_36 {dimension_numbers = #tpu.dot_dimension_numbers<[1], [0], [0], [1], [0, 0, 1, 1], [], []>} : vector<56x32xf32>, vector<32x256xf32>, vector<56x256xf32> -> vector<56x256xf32>
    %30 = arith.addf %24, %29 : vector<56x256xf32>
    %31 = vector.broadcast %0 : vector<1x256xf32> to vector<56x256xf32>
    %32 = arith.addf %30, %31 : vector<56x256xf32>
    %cst_37 = arith.constant 0.000000e+00 : f32
    %33 = vector.broadcast %cst_37 : f32 to vector<56x256xf32>
    %34 = arith.maximumf %32, %33 : vector<56x256xf32>
    %c0_38 = arith.constant 0 : index
    %c1_39 = arith.constant 1 : index
    %c0_40 = arith.constant 0 : index
    %c0_41 = arith.constant 0 : index
    %35 = vector.load %arg1[%c0_38, %c1_39, %c0_40, %c0_41] : memref<1x4x64x32xf32, #tpu.memory_space<vmem>>, vector<1x1x56x32xf32>
    %36 = vector.shape_cast %35 : vector<1x1x56x32xf32> to vector<56x32xf32>
    %c0_42 = arith.constant 0 : index
    %c0_43 = arith.constant 0 : index
    %c0_44 = arith.constant 0 : index
    %37 = vector.load %arg2[%c0_42, %c0_43, %c0_44] : memref<5x32x256xf32, #tpu.memory_space<vmem>>, vector<1x32x256xf32>
    %38 = vector.shape_cast %37 : vector<1x32x256xf32> to vector<32x256xf32>
    %cst_45 = arith.constant dense<0.000000e+00> : vector<56x256xf32>
    %39 = tpu.matmul %36, %38, %cst_45 {dimension_numbers = #tpu.dot_dimension_numbers<[1], [0], [0], [1], [0, 0, 1, 1], [], []>} : vector<56x32xf32>, vector<32x256xf32>, vector<56x256xf32> -> vector<56x256xf32>
    %c0_46 = arith.constant 0 : index
    %c2_47 = arith.constant 2 : index
    %c0_48 = arith.constant 0 : index
    %c0_49 = arith.constant 0 : index
    %40 = vector.load %arg1[%c0_46, %c2_47, %c0_48, %c0_49] : memref<1x4x64x32xf32, #tpu.memory_space<vmem>>, vector<1x1x56x32xf32>
    %41 = vector.shape_cast %40 : vector<1x1x56x32xf32> to vector<56x32xf32>
    %c1_50 = arith.constant 1 : index
    %c0_51 = arith.constant 0 : index
    %c0_52 = arith.constant 0 : index
    %42 = vector.load %arg2[%c1_50, %c0_51, %c0_52] : memref<5x32x256xf32, #tpu.memory_space<vmem>>, vector<1x32x256xf32>
    %43 = vector.shape_cast %42 : vector<1x32x256xf32> to vector<32x256xf32>
    %cst_53 = arith.constant dense<0.000000e+00> : vector<56x256xf32>
    %44 = tpu.matmul %41, %43, %cst_53 {dimension_numbers = #tpu.dot_dimension_numbers<[1], [0], [0], [1], [0, 0, 1, 1], [], []>} : vector<56x32xf32>, vector<32x256xf32>, vector<56x256xf32> -> vector<56x256xf32>
    %45 = arith.addf %39, %44 : vector<56x256xf32>
    %c0_54 = arith.constant 0 : index
    %c3_55 = arith.constant 3 : index
    %c0_56 = arith.constant 0 : index
    %c0_57 = arith.constant 0 : index
    %46 = vector.load %arg1[%c0_54, %c3_55, %c0_56, %c0_57] : memref<1x4x64x32xf32, #tpu.memory_space<vmem>>, vector<1x1x56x32xf32>
    %47 = vector.shape_cast %46 : vector<1x1x56x32xf32> to vector<56x32xf32>
    %c2_58 = arith.constant 2 : index
    %c0_59 = arith.constant 0 : index
    %c0_60 = arith.constant 0 : index
    %48 = vector.load %arg2[%c2_58, %c0_59, %c0_60] : memref<5x32x256xf32, #tpu.memory_space<vmem>>, vector<1x32x256xf32>
    %49 = vector.shape_cast %48 : vector<1x32x256xf32> to vector<32x256xf32>
    %cst_61 = arith.constant dense<0.000000e+00> : vector<56x256xf32>
    %50 = tpu.matmul %47, %49, %cst_61 {dimension_numbers = #tpu.dot_dimension_numbers<[1], [0], [0], [1], [0, 0, 1, 1], [], []>} : vector<56x32xf32>, vector<32x256xf32>, vector<56x256xf32> -> vector<56x256xf32>
    %51 = arith.addf %45, %50 : vector<56x256xf32>
    %c0_62 = arith.constant 0 : index
    %c0_63 = arith.constant 0 : index
    %c8_64 = arith.constant 8 : index
    %c0_65 = arith.constant 0 : index
    %52 = vector.load %arg1[%c0_62, %c0_63, %c8_64, %c0_65] : memref<1x4x64x32xf32, #tpu.memory_space<vmem>>, vector<1x1x56x32xf32>
    %53 = vector.shape_cast %52 : vector<1x1x56x32xf32> to vector<56x32xf32>
    %c3_66 = arith.constant 3 : index
    %c0_67 = arith.constant 0 : index
    %c0_68 = arith.constant 0 : index
    %54 = vector.load %arg2[%c3_66, %c0_67, %c0_68] : memref<5x32x256xf32, #tpu.memory_space<vmem>>, vector<1x32x256xf32>
    %55 = vector.shape_cast %54 : vector<1x32x256xf32> to vector<32x256xf32>
    %cst_69 = arith.constant dense<0.000000e+00> : vector<56x256xf32>
    %56 = tpu.matmul %53, %55, %cst_69 {dimension_numbers = #tpu.dot_dimension_numbers<[1], [0], [0], [1], [0, 0, 1, 1], [], []>} : vector<56x32xf32>, vector<32x256xf32>, vector<56x256xf32> -> vector<56x256xf32>
    %57 = arith.addf %51, %56 : vector<56x256xf32>
    %c0_70 = arith.constant 0 : index
    %c1_71 = arith.constant 1 : index
    %c8_72 = arith.constant 8 : index
    %c0_73 = arith.constant 0 : index
    %58 = vector.load %arg1[%c0_70, %c1_71, %c8_72, %c0_73] : memref<1x4x64x32xf32, #tpu.memory_space<vmem>>, vector<1x1x56x32xf32>
    %59 = vector.shape_cast %58 : vector<1x1x56x32xf32> to vector<56x32xf32>
    %c4_74 = arith.constant 4 : index
    %c0_75 = arith.constant 0 : index
    %c0_76 = arith.constant 0 : index
    %60 = vector.load %arg2[%c4_74, %c0_75, %c0_76] : memref<5x32x256xf32, #tpu.memory_space<vmem>>, vector<1x32x256xf32>
    %61 = vector.shape_cast %60 : vector<1x32x256xf32> to vector<32x256xf32>
    %cst_77 = arith.constant dense<0.000000e+00> : vector<56x256xf32>
    %62 = tpu.matmul %59, %61, %cst_77 {dimension_numbers = #tpu.dot_dimension_numbers<[1], [0], [0], [1], [0, 0, 1, 1], [], []>} : vector<56x32xf32>, vector<32x256xf32>, vector<56x256xf32> -> vector<56x256xf32>
    %63 = arith.addf %57, %62 : vector<56x256xf32>
    %64 = vector.broadcast %0 : vector<1x256xf32> to vector<56x256xf32>
    %65 = arith.addf %63, %64 : vector<56x256xf32>
    %cst_78 = arith.constant 0.000000e+00 : f32
    %66 = vector.broadcast %cst_78 : f32 to vector<56x256xf32>
    %67 = arith.maximumf %65, %66 : vector<56x256xf32>
    %c0_79 = arith.constant 0 : index
    %c2_80 = arith.constant 2 : index
    %c0_81 = arith.constant 0 : index
    %c0_82 = arith.constant 0 : index
    %68 = vector.load %arg1[%c0_79, %c2_80, %c0_81, %c0_82] : memref<1x4x64x32xf32, #tpu.memory_space<vmem>>, vector<1x1x56x32xf32>
    %69 = vector.shape_cast %68 : vector<1x1x56x32xf32> to vector<56x32xf32>
    %c0_83 = arith.constant 0 : index
    %c0_84 = arith.constant 0 : index
    %c0_85 = arith.constant 0 : index
    %70 = vector.load %arg2[%c0_83, %c0_84, %c0_85] : memref<5x32x256xf32, #tpu.memory_space<vmem>>, vector<1x32x256xf32>
    %71 = vector.shape_cast %70 : vector<1x32x256xf32> to vector<32x256xf32>
    %cst_86 = arith.constant dense<0.000000e+00> : vector<56x256xf32>
    %72 = tpu.matmul %69, %71, %cst_86 {dimension_numbers = #tpu.dot_dimension_numbers<[1], [0], [0], [1], [0, 0, 1, 1], [], []>} : vector<56x32xf32>, vector<32x256xf32>, vector<56x256xf32> -> vector<56x256xf32>
    %c0_87 = arith.constant 0 : index
    %c3_88 = arith.constant 3 : index
    %c0_89 = arith.constant 0 : index
    %c0_90 = arith.constant 0 : index
    %73 = vector.load %arg1[%c0_87, %c3_88, %c0_89, %c0_90] : memref<1x4x64x32xf32, #tpu.memory_space<vmem>>, vector<1x1x56x32xf32>
    %74 = vector.shape_cast %73 : vector<1x1x56x32xf32> to vector<56x32xf32>
    %c1_91 = arith.constant 1 : index
    %c0_92 = arith.constant 0 : index
    %c0_93 = arith.constant 0 : index
    %75 = vector.load %arg2[%c1_91, %c0_92, %c0_93] : memref<5x32x256xf32, #tpu.memory_space<vmem>>, vector<1x32x256xf32>
    %76 = vector.shape_cast %75 : vector<1x32x256xf32> to vector<32x256xf32>
    %cst_94 = arith.constant dense<0.000000e+00> : vector<56x256xf32>
    %77 = tpu.matmul %74, %76, %cst_94 {dimension_numbers = #tpu.dot_dimension_numbers<[1], [0], [0], [1], [0, 0, 1, 1], [], []>} : vector<56x32xf32>, vector<32x256xf32>, vector<56x256xf32> -> vector<56x256xf32>
    %78 = arith.addf %72, %77 : vector<56x256xf32>
    %c0_95 = arith.constant 0 : index
    %c0_96 = arith.constant 0 : index
    %c8_97 = arith.constant 8 : index
    %c0_98 = arith.constant 0 : index
    %79 = vector.load %arg1[%c0_95, %c0_96, %c8_97, %c0_98] : memref<1x4x64x32xf32, #tpu.memory_space<vmem>>, vector<1x1x56x32xf32>
    %80 = vector.shape_cast %79 : vector<1x1x56x32xf32> to vector<56x32xf32>
    %c2_99 = arith.constant 2 : index
    %c0_100 = arith.constant 0 : index
    %c0_101 = arith.constant 0 : index
    %81 = vector.load %arg2[%c2_99, %c0_100, %c0_101] : memref<5x32x256xf32, #tpu.memory_space<vmem>>, vector<1x32x256xf32>
    %82 = vector.shape_cast %81 : vector<1x32x256xf32> to vector<32x256xf32>
    %cst_102 = arith.constant dense<0.000000e+00> : vector<56x256xf32>
    %83 = tpu.matmul %80, %82, %cst_102 {dimension_numbers = #tpu.dot_dimension_numbers<[1], [0], [0], [1], [0, 0, 1, 1], [], []>} : vector<56x32xf32>, vector<32x256xf32>, vector<56x256xf32> -> vector<56x256xf32>
    %84 = arith.addf %78, %83 : vector<56x256xf32>
    %c0_103 = arith.constant 0 : index
    %c1_104 = arith.constant 1 : index
    %c8_105 = arith.constant 8 : index
    %c0_106 = arith.constant 0 : index
    %85 = vector.load %arg1[%c0_103, %c1_104, %c8_105, %c0_106] : memref<1x4x64x32xf32, #tpu.memory_space<vmem>>, vector<1x1x56x32xf32>
    %86 = vector.shape_cast %85 : vector<1x1x56x32xf32> to vector<56x32xf32>
    %c3_107 = arith.constant 3 : index
    %c0_108 = arith.constant 0 : index
    %c0_109 = arith.constant 0 : index
    %87 = vector.load %arg2[%c3_107, %c0_108, %c0_109] : memref<5x32x256xf32, #tpu.memory_space<vmem>>, vector<1x32x256xf32>
    %88 = vector.shape_cast %87 : vector<1x32x256xf32> to vector<32x256xf32>
    %cst_110 = arith.constant dense<0.000000e+00> : vector<56x256xf32>
    %89 = tpu.matmul %86, %88, %cst_110 {dimension_numbers = #tpu.dot_dimension_numbers<[1], [0], [0], [1], [0, 0, 1, 1], [], []>} : vector<56x32xf32>, vector<32x256xf32>, vector<56x256xf32> -> vector<56x256xf32>
    %90 = arith.addf %84, %89 : vector<56x256xf32>
    %c0_111 = arith.constant 0 : index
    %c2_112 = arith.constant 2 : index
    %c8_113 = arith.constant 8 : index
    %c0_114 = arith.constant 0 : index
    %91 = vector.load %arg1[%c0_111, %c2_112, %c8_113, %c0_114] : memref<1x4x64x32xf32, #tpu.memory_space<vmem>>, vector<1x1x56x32xf32>
    %92 = vector.shape_cast %91 : vector<1x1x56x32xf32> to vector<56x32xf32>
    %c4_115 = arith.constant 4 : index
    %c0_116 = arith.constant 0 : index
    %c0_117 = arith.constant 0 : index
    %93 = vector.load %arg2[%c4_115, %c0_116, %c0_117] : memref<5x32x256xf32, #tpu.memory_space<vmem>>, vector<1x32x256xf32>
    %94 = vector.shape_cast %93 : vector<1x32x256xf32> to vector<32x256xf32>
    %cst_118 = arith.constant dense<0.000000e+00> : vector<56x256xf32>
    %95 = tpu.matmul %92, %94, %cst_118 {dimension_numbers = #tpu.dot_dimension_numbers<[1], [0], [0], [1], [0, 0, 1, 1], [], []>} : vector<56x32xf32>, vector<32x256xf32>, vector<56x256xf32> -> vector<56x256xf32>
    %96 = arith.addf %90, %95 : vector<56x256xf32>
    %97 = vector.broadcast %0 : vector<1x256xf32> to vector<56x256xf32>
    %98 = arith.addf %96, %97 : vector<56x256xf32>
    %cst_119 = arith.constant 0.000000e+00 : f32
    %99 = vector.broadcast %cst_119 : f32 to vector<56x256xf32>
    %100 = arith.maximumf %98, %99 : vector<56x256xf32>
    %c0_120 = arith.constant 0 : index
    %c3_121 = arith.constant 3 : index
    %c0_122 = arith.constant 0 : index
    %c0_123 = arith.constant 0 : index
    %101 = vector.load %arg1[%c0_120, %c3_121, %c0_122, %c0_123] : memref<1x4x64x32xf32, #tpu.memory_space<vmem>>, vector<1x1x56x32xf32>
    %102 = vector.shape_cast %101 : vector<1x1x56x32xf32> to vector<56x32xf32>
    %c0_124 = arith.constant 0 : index
    %c0_125 = arith.constant 0 : index
    %c0_126 = arith.constant 0 : index
    %103 = vector.load %arg2[%c0_124, %c0_125, %c0_126] : memref<5x32x256xf32, #tpu.memory_space<vmem>>, vector<1x32x256xf32>
    %104 = vector.shape_cast %103 : vector<1x32x256xf32> to vector<32x256xf32>
    %cst_127 = arith.constant dense<0.000000e+00> : vector<56x256xf32>
    %105 = tpu.matmul %102, %104, %cst_127 {dimension_numbers = #tpu.dot_dimension_numbers<[1], [0], [0], [1], [0, 0, 1, 1], [], []>} : vector<56x32xf32>, vector<32x256xf32>, vector<56x256xf32> -> vector<56x256xf32>
    %c0_128 = arith.constant 0 : index
    %c0_129 = arith.constant 0 : index
    %c8_130 = arith.constant 8 : index
    %c0_131 = arith.constant 0 : index
    %106 = vector.load %arg1[%c0_128, %c0_129, %c8_130, %c0_131] : memref<1x4x64x32xf32, #tpu.memory_space<vmem>>, vector<1x1x56x32xf32>
    %107 = vector.shape_cast %106 : vector<1x1x56x32xf32> to vector<56x32xf32>
    %c1_132 = arith.constant 1 : index
    %c0_133 = arith.constant 0 : index
    %c0_134 = arith.constant 0 : index
    %108 = vector.load %arg2[%c1_132, %c0_133, %c0_134] : memref<5x32x256xf32, #tpu.memory_space<vmem>>, vector<1x32x256xf32>
    %109 = vector.shape_cast %108 : vector<1x32x256xf32> to vector<32x256xf32>
    %cst_135 = arith.constant dense<0.000000e+00> : vector<56x256xf32>
    %110 = tpu.matmul %107, %109, %cst_135 {dimension_numbers = #tpu.dot_dimension_numbers<[1], [0], [0], [1], [0, 0, 1, 1], [], []>} : vector<56x32xf32>, vector<32x256xf32>, vector<56x256xf32> -> vector<56x256xf32>
    %111 = arith.addf %105, %110 : vector<56x256xf32>
    %c0_136 = arith.constant 0 : index
    %c1_137 = arith.constant 1 : index
    %c8_138 = arith.constant 8 : index
    %c0_139 = arith.constant 0 : index
    %112 = vector.load %arg1[%c0_136, %c1_137, %c8_138, %c0_139] : memref<1x4x64x32xf32, #tpu.memory_space<vmem>>, vector<1x1x56x32xf32>
    %113 = vector.shape_cast %112 : vector<1x1x56x32xf32> to vector<56x32xf32>
    %c2_140 = arith.constant 2 : index
    %c0_141 = arith.constant 0 : index
    %c0_142 = arith.constant 0 : index
    %114 = vector.load %arg2[%c2_140, %c0_141, %c0_142] : memref<5x32x256xf32, #tpu.memory_space<vmem>>, vector<1x32x256xf32>
    %115 = vector.shape_cast %114 : vector<1x32x256xf32> to vector<32x256xf32>
    %cst_143 = arith.constant dense<0.000000e+00> : vector<56x256xf32>
    %116 = tpu.matmul %113, %115, %cst_143 {dimension_numbers = #tpu.dot_dimension_numbers<[1], [0], [0], [1], [0, 0, 1, 1], [], []>} : vector<56x32xf32>, vector<32x256xf32>, vector<56x256xf32> -> vector<56x256xf32>
    %117 = arith.addf %111, %116 : vector<56x256xf32>
    %c0_144 = arith.constant 0 : index
    %c2_145 = arith.constant 2 : index
    %c8_146 = arith.constant 8 : index
    %c0_147 = arith.constant 0 : index
    %118 = vector.load %arg1[%c0_144, %c2_145, %c8_146, %c0_147] : memref<1x4x64x32xf32, #tpu.memory_space<vmem>>, vector<1x1x56x32xf32>
    %119 = vector.shape_cast %118 : vector<1x1x56x32xf32> to vector<56x32xf32>
    %c3_148 = arith.constant 3 : index
    %c0_149 = arith.constant 0 : index
    %c0_150 = arith.constant 0 : index
    %120 = vector.load %arg2[%c3_148, %c0_149, %c0_150] : memref<5x32x256xf32, #tpu.memory_space<vmem>>, vector<1x32x256xf32>
    %121 = vector.shape_cast %120 : vector<1x32x256xf32> to vector<32x256xf32>
    %cst_151 = arith.constant dense<0.000000e+00> : vector<56x256xf32>
    %122 = tpu.matmul %119, %121, %cst_151 {dimension_numbers = #tpu.dot_dimension_numbers<[1], [0], [0], [1], [0, 0, 1, 1], [], []>} : vector<56x32xf32>, vector<32x256xf32>, vector<56x256xf32> -> vector<56x256xf32>
    %123 = arith.addf %117, %122 : vector<56x256xf32>
    %c0_152 = arith.constant 0 : index
    %c3_153 = arith.constant 3 : index
    %c8_154 = arith.constant 8 : index
    %c0_155 = arith.constant 0 : index
    %124 = vector.load %arg1[%c0_152, %c3_153, %c8_154, %c0_155] : memref<1x4x64x32xf32, #tpu.memory_space<vmem>>, vector<1x1x56x32xf32>
    %125 = vector.shape_cast %124 : vector<1x1x56x32xf32> to vector<56x32xf32>
    %c4_156 = arith.constant 4 : index
    %c0_157 = arith.constant 0 : index
    %c0_158 = arith.constant 0 : index
    %126 = vector.load %arg2[%c4_156, %c0_157, %c0_158] : memref<5x32x256xf32, #tpu.memory_space<vmem>>, vector<1x32x256xf32>
    %127 = vector.shape_cast %126 : vector<1x32x256xf32> to vector<32x256xf32>
    %cst_159 = arith.constant dense<0.000000e+00> : vector<56x256xf32>
    %128 = tpu.matmul %125, %127, %cst_159 {dimension_numbers = #tpu.dot_dimension_numbers<[1], [0], [0], [1], [0, 0, 1, 1], [], []>} : vector<56x32xf32>, vector<32x256xf32>, vector<56x256xf32> -> vector<56x256xf32>
    %129 = arith.addf %123, %128 : vector<56x256xf32>
    %130 = vector.broadcast %0 : vector<1x256xf32> to vector<56x256xf32>
    %131 = arith.addf %129, %130 : vector<56x256xf32>
    %cst_160 = arith.constant 0.000000e+00 : f32
    %132 = vector.broadcast %cst_160 : f32 to vector<56x256xf32>
    %133 = arith.maximumf %131, %132 : vector<56x256xf32>
    %134 = vector.extract_strided_slice %34 {offsets = [0, 0], sizes = [56, 128], strides = [1, 1]} : vector<56x256xf32> to vector<56x128xf32>
    %135 = vector.extract_strided_slice %34 {offsets = [0, 128], sizes = [56, 128], strides = [1, 1]} : vector<56x256xf32> to vector<56x128xf32>
    %136 = arith.maximumf %134, %135 : vector<56x128xf32>
    %137 = vector.extract_strided_slice %67 {offsets = [0, 0], sizes = [56, 128], strides = [1, 1]} : vector<56x256xf32> to vector<56x128xf32>
    %138 = vector.extract_strided_slice %67 {offsets = [0, 128], sizes = [56, 128], strides = [1, 1]} : vector<56x256xf32> to vector<56x128xf32>
    %139 = arith.maximumf %137, %138 : vector<56x128xf32>
    %140 = arith.maximumf %136, %139 : vector<56x128xf32>
    %141 = vector.extract_strided_slice %100 {offsets = [0, 0], sizes = [56, 128], strides = [1, 1]} : vector<56x256xf32> to vector<56x128xf32>
    %142 = vector.extract_strided_slice %100 {offsets = [0, 128], sizes = [56, 128], strides = [1, 1]} : vector<56x256xf32> to vector<56x128xf32>
    %143 = arith.maximumf %141, %142 : vector<56x128xf32>
    %144 = vector.extract_strided_slice %133 {offsets = [0, 0], sizes = [56, 128], strides = [1, 1]} : vector<56x256xf32> to vector<56x128xf32>
    %145 = vector.extract_strided_slice %133 {offsets = [0, 128], sizes = [56, 128], strides = [1, 1]} : vector<56x256xf32> to vector<56x128xf32>
    %146 = arith.maximumf %144, %145 : vector<56x128xf32>
    %147 = arith.maximumf %143, %146 : vector<56x128xf32>
    %148 = vector.extract_strided_slice %140 {offsets = [0, 0], sizes = [40, 128], strides = [1, 1]} : vector<56x128xf32> to vector<40x128xf32>
    %c0_161 = arith.constant 0 : index
    %c0_162 = arith.constant 0 : index
    %c0_163 = arith.constant 0 : index
    %149 = vector.load %arg4[%c0_161, %c0_162, %c0_163] : memref<5x128x256xf32, #tpu.memory_space<vmem>>, vector<1x128x256xf32>
    %150 = vector.shape_cast %149 : vector<1x128x256xf32> to vector<128x256xf32>
    %cst_164 = arith.constant dense<0.000000e+00> : vector<40x256xf32>
    %151 = tpu.matmul %148, %150, %cst_164 {dimension_numbers = #tpu.dot_dimension_numbers<[1], [0], [0], [1], [0, 0, 1, 1], [], []>} : vector<40x128xf32>, vector<128x256xf32>, vector<40x256xf32> -> vector<40x256xf32>
    %152 = vector.extract_strided_slice %147 {offsets = [0, 0], sizes = [40, 128], strides = [1, 1]} : vector<56x128xf32> to vector<40x128xf32>
    %c1_165 = arith.constant 1 : index
    %c0_166 = arith.constant 0 : index
    %c0_167 = arith.constant 0 : index
    %153 = vector.load %arg4[%c1_165, %c0_166, %c0_167] : memref<5x128x256xf32, #tpu.memory_space<vmem>>, vector<1x128x256xf32>
    %154 = vector.shape_cast %153 : vector<1x128x256xf32> to vector<128x256xf32>
    %cst_168 = arith.constant dense<0.000000e+00> : vector<40x256xf32>
    %155 = tpu.matmul %152, %154, %cst_168 {dimension_numbers = #tpu.dot_dimension_numbers<[1], [0], [0], [1], [0, 0, 1, 1], [], []>} : vector<40x128xf32>, vector<128x256xf32>, vector<40x256xf32> -> vector<40x256xf32>
    %156 = arith.addf %151, %155 : vector<40x256xf32>
    %157 = vector.extract_strided_slice %140 {offsets = [8, 0], sizes = [40, 128], strides = [1, 1]} : vector<56x128xf32> to vector<40x128xf32>
    %c2_169 = arith.constant 2 : index
    %c0_170 = arith.constant 0 : index
    %c0_171 = arith.constant 0 : index
    %158 = vector.load %arg4[%c2_169, %c0_170, %c0_171] : memref<5x128x256xf32, #tpu.memory_space<vmem>>, vector<1x128x256xf32>
    %159 = vector.shape_cast %158 : vector<1x128x256xf32> to vector<128x256xf32>
    %cst_172 = arith.constant dense<0.000000e+00> : vector<40x256xf32>
    %160 = tpu.matmul %157, %159, %cst_172 {dimension_numbers = #tpu.dot_dimension_numbers<[1], [0], [0], [1], [0, 0, 1, 1], [], []>} : vector<40x128xf32>, vector<128x256xf32>, vector<40x256xf32> -> vector<40x256xf32>
    %161 = arith.addf %156, %160 : vector<40x256xf32>
    %162 = vector.extract_strided_slice %147 {offsets = [8, 0], sizes = [40, 128], strides = [1, 1]} : vector<56x128xf32> to vector<40x128xf32>
    %c3_173 = arith.constant 3 : index
    %c0_174 = arith.constant 0 : index
    %c0_175 = arith.constant 0 : index
    %163 = vector.load %arg4[%c3_173, %c0_174, %c0_175] : memref<5x128x256xf32, #tpu.memory_space<vmem>>, vector<1x128x256xf32>
    %164 = vector.shape_cast %163 : vector<1x128x256xf32> to vector<128x256xf32>
    %cst_176 = arith.constant dense<0.000000e+00> : vector<40x256xf32>
    %165 = tpu.matmul %162, %164, %cst_176 {dimension_numbers = #tpu.dot_dimension_numbers<[1], [0], [0], [1], [0, 0, 1, 1], [], []>} : vector<40x128xf32>, vector<128x256xf32>, vector<40x256xf32> -> vector<40x256xf32>
    %166 = arith.addf %161, %165 : vector<40x256xf32>
    %167 = vector.extract_strided_slice %140 {offsets = [16, 0], sizes = [40, 128], strides = [1, 1]} : vector<56x128xf32> to vector<40x128xf32>
    %c4_177 = arith.constant 4 : index
    %c0_178 = arith.constant 0 : index
    %c0_179 = arith.constant 0 : index
    %168 = vector.load %arg4[%c4_177, %c0_178, %c0_179] : memref<5x128x256xf32, #tpu.memory_space<vmem>>, vector<1x128x256xf32>
    %169 = vector.shape_cast %168 : vector<1x128x256xf32> to vector<128x256xf32>
    %cst_180 = arith.constant dense<0.000000e+00> : vector<40x256xf32>
    %170 = tpu.matmul %167, %169, %cst_180 {dimension_numbers = #tpu.dot_dimension_numbers<[1], [0], [0], [1], [0, 0, 1, 1], [], []>} : vector<40x128xf32>, vector<128x256xf32>, vector<40x256xf32> -> vector<40x256xf32>
    %171 = arith.addf %166, %170 : vector<40x256xf32>
    %172 = vector.broadcast %1 : vector<1x256xf32> to vector<40x256xf32>
    %173 = arith.addf %171, %172 : vector<40x256xf32>
    %cst_181 = arith.constant 0.000000e+00 : f32
    %174 = vector.broadcast %cst_181 : f32 to vector<40x256xf32>
    %175 = arith.maximumf %173, %174 : vector<40x256xf32>
    %176 = vector.extract_strided_slice %147 {offsets = [0, 0], sizes = [40, 128], strides = [1, 1]} : vector<56x128xf32> to vector<40x128xf32>
    %c0_182 = arith.constant 0 : index
    %c0_183 = arith.constant 0 : index
    %c0_184 = arith.constant 0 : index
    %177 = vector.load %arg4[%c0_182, %c0_183, %c0_184] : memref<5x128x256xf32, #tpu.memory_space<vmem>>, vector<1x128x256xf32>
    %178 = vector.shape_cast %177 : vector<1x128x256xf32> to vector<128x256xf32>
    %cst_185 = arith.constant dense<0.000000e+00> : vector<40x256xf32>
    %179 = tpu.matmul %176, %178, %cst_185 {dimension_numbers = #tpu.dot_dimension_numbers<[1], [0], [0], [1], [0, 0, 1, 1], [], []>} : vector<40x128xf32>, vector<128x256xf32>, vector<40x256xf32> -> vector<40x256xf32>
    %180 = vector.extract_strided_slice %140 {offsets = [8, 0], sizes = [40, 128], strides = [1, 1]} : vector<56x128xf32> to vector<40x128xf32>
    %c1_186 = arith.constant 1 : index
    %c0_187 = arith.constant 0 : index
    %c0_188 = arith.constant 0 : index
    %181 = vector.load %arg4[%c1_186, %c0_187, %c0_188] : memref<5x128x256xf32, #tpu.memory_space<vmem>>, vector<1x128x256xf32>
    %182 = vector.shape_cast %181 : vector<1x128x256xf32> to vector<128x256xf32>
    %cst_189 = arith.constant dense<0.000000e+00> : vector<40x256xf32>
    %183 = tpu.matmul %180, %182, %cst_189 {dimension_numbers = #tpu.dot_dimension_numbers<[1], [0], [0], [1], [0, 0, 1, 1], [], []>} : vector<40x128xf32>, vector<128x256xf32>, vector<40x256xf32> -> vector<40x256xf32>
    %184 = arith.addf %179, %183 : vector<40x256xf32>
    %185 = vector.extract_strided_slice %147 {offsets = [8, 0], sizes = [40, 128], strides = [1, 1]} : vector<56x128xf32> to vector<40x128xf32>
    %c2_190 = arith.constant 2 : index
    %c0_191 = arith.constant 0 : index
    %c0_192 = arith.constant 0 : index
    %186 = vector.load %arg4[%c2_190, %c0_191, %c0_192] : memref<5x128x256xf32, #tpu.memory_space<vmem>>, vector<1x128x256xf32>
    %187 = vector.shape_cast %186 : vector<1x128x256xf32> to vector<128x256xf32>
    %cst_193 = arith.constant dense<0.000000e+00> : vector<40x256xf32>
    %188 = tpu.matmul %185, %187, %cst_193 {dimension_numbers = #tpu.dot_dimension_numbers<[1], [0], [0], [1], [0, 0, 1, 1], [], []>} : vector<40x128xf32>, vector<128x256xf32>, vector<40x256xf32> -> vector<40x256xf32>
    %189 = arith.addf %184, %188 : vector<40x256xf32>
    %190 = vector.extract_strided_slice %140 {offsets = [16, 0], sizes = [40, 128], strides = [1, 1]} : vector<56x128xf32> to vector<40x128xf32>
    %c3_194 = arith.constant 3 : index
    %c0_195 = arith.constant 0 : index
    %c0_196 = arith.constant 0 : index
    %191 = vector.load %arg4[%c3_194, %c0_195, %c0_196] : memref<5x128x256xf32, #tpu.memory_space<vmem>>, vector<1x128x256xf32>
    %192 = vector.shape_cast %191 : vector<1x128x256xf32> to vector<128x256xf32>
    %cst_197 = arith.constant dense<0.000000e+00> : vector<40x256xf32>
    %193 = tpu.matmul %190, %192, %cst_197 {dimension_numbers = #tpu.dot_dimension_numbers<[1], [0], [0], [1], [0, 0, 1, 1], [], []>} : vector<40x128xf32>, vector<128x256xf32>, vector<40x256xf32> -> vector<40x256xf32>
    %194 = arith.addf %189, %193 : vector<40x256xf32>
    %195 = vector.extract_strided_slice %147 {offsets = [16, 0], sizes = [40, 128], strides = [1, 1]} : vector<56x128xf32> to vector<40x128xf32>
    %c4_198 = arith.constant 4 : index
    %c0_199 = arith.constant 0 : index
    %c0_200 = arith.constant 0 : index
    %196 = vector.load %arg4[%c4_198, %c0_199, %c0_200] : memref<5x128x256xf32, #tpu.memory_space<vmem>>, vector<1x128x256xf32>
    %197 = vector.shape_cast %196 : vector<1x128x256xf32> to vector<128x256xf32>
    %cst_201 = arith.constant dense<0.000000e+00> : vector<40x256xf32>
    %198 = tpu.matmul %195, %197, %cst_201 {dimension_numbers = #tpu.dot_dimension_numbers<[1], [0], [0], [1], [0, 0, 1, 1], [], []>} : vector<40x128xf32>, vector<128x256xf32>, vector<40x256xf32> -> vector<40x256xf32>
    %199 = arith.addf %194, %198 : vector<40x256xf32>
    %200 = vector.broadcast %1 : vector<1x256xf32> to vector<40x256xf32>
    %201 = arith.addf %199, %200 : vector<40x256xf32>
    %cst_202 = arith.constant 0.000000e+00 : f32
    %202 = vector.broadcast %cst_202 : f32 to vector<40x256xf32>
    %203 = arith.maximumf %201, %202 : vector<40x256xf32>
    %204 = vector.extract_strided_slice %175 {offsets = [0, 0], sizes = [40, 128], strides = [1, 1]} : vector<40x256xf32> to vector<40x128xf32>
    %205 = vector.extract_strided_slice %175 {offsets = [0, 128], sizes = [40, 128], strides = [1, 1]} : vector<40x256xf32> to vector<40x128xf32>
    %206 = arith.maximumf %204, %205 : vector<40x128xf32>
    %207 = vector.extract_strided_slice %203 {offsets = [0, 0], sizes = [40, 128], strides = [1, 1]} : vector<40x256xf32> to vector<40x128xf32>
    %208 = vector.extract_strided_slice %203 {offsets = [0, 128], sizes = [40, 128], strides = [1, 1]} : vector<40x256xf32> to vector<40x128xf32>
    %209 = arith.maximumf %207, %208 : vector<40x128xf32>
    %210 = arith.maximumf %206, %209 : vector<40x128xf32>
    %211 = vector.extract_strided_slice %210 {offsets = [0, 0], sizes = [8, 128], strides = [1, 1]} : vector<40x128xf32> to vector<8x128xf32>
    %c0_203 = arith.constant 0 : index
    %c0_204 = arith.constant 0 : index
    %c0_205 = arith.constant 0 : index
    %212 = vector.load %arg6[%c0_203, %c0_204, %c0_205] : memref<5x128x128xf32, #tpu.memory_space<vmem>>, vector<1x128x128xf32>
    %213 = vector.shape_cast %212 : vector<1x128x128xf32> to vector<128x128xf32>
    %cst_206 = arith.constant dense<0.000000e+00> : vector<8x128xf32>
    %214 = tpu.matmul %211, %213, %cst_206 {dimension_numbers = #tpu.dot_dimension_numbers<[1], [0], [0], [1], [0, 0, 1, 1], [], []>} : vector<8x128xf32>, vector<128x128xf32>, vector<8x128xf32> -> vector<8x128xf32>
    %215 = vector.extract_strided_slice %210 {offsets = [8, 0], sizes = [8, 128], strides = [1, 1]} : vector<40x128xf32> to vector<8x128xf32>
    %c1_207 = arith.constant 1 : index
    %c0_208 = arith.constant 0 : index
    %c0_209 = arith.constant 0 : index
    %216 = vector.load %arg6[%c1_207, %c0_208, %c0_209] : memref<5x128x128xf32, #tpu.memory_space<vmem>>, vector<1x128x128xf32>
    %217 = vector.shape_cast %216 : vector<1x128x128xf32> to vector<128x128xf32>
    %cst_210 = arith.constant dense<0.000000e+00> : vector<8x128xf32>
    %218 = tpu.matmul %215, %217, %cst_210 {dimension_numbers = #tpu.dot_dimension_numbers<[1], [0], [0], [1], [0, 0, 1, 1], [], []>} : vector<8x128xf32>, vector<128x128xf32>, vector<8x128xf32> -> vector<8x128xf32>
    %219 = arith.addf %214, %218 : vector<8x128xf32>
    %220 = vector.extract_strided_slice %210 {offsets = [16, 0], sizes = [8, 128], strides = [1, 1]} : vector<40x128xf32> to vector<8x128xf32>
    %c2_211 = arith.constant 2 : index
    %c0_212 = arith.constant 0 : index
    %c0_213 = arith.constant 0 : index
    %221 = vector.load %arg6[%c2_211, %c0_212, %c0_213] : memref<5x128x128xf32, #tpu.memory_space<vmem>>, vector<1x128x128xf32>
    %222 = vector.shape_cast %221 : vector<1x128x128xf32> to vector<128x128xf32>
    %cst_214 = arith.constant dense<0.000000e+00> : vector<8x128xf32>
    %223 = tpu.matmul %220, %222, %cst_214 {dimension_numbers = #tpu.dot_dimension_numbers<[1], [0], [0], [1], [0, 0, 1, 1], [], []>} : vector<8x128xf32>, vector<128x128xf32>, vector<8x128xf32> -> vector<8x128xf32>
    %224 = arith.addf %219, %223 : vector<8x128xf32>
    %225 = vector.extract_strided_slice %210 {offsets = [24, 0], sizes = [8, 128], strides = [1, 1]} : vector<40x128xf32> to vector<8x128xf32>
    %c3_215 = arith.constant 3 : index
    %c0_216 = arith.constant 0 : index
    %c0_217 = arith.constant 0 : index
    %226 = vector.load %arg6[%c3_215, %c0_216, %c0_217] : memref<5x128x128xf32, #tpu.memory_space<vmem>>, vector<1x128x128xf32>
    %227 = vector.shape_cast %226 : vector<1x128x128xf32> to vector<128x128xf32>
    %cst_218 = arith.constant dense<0.000000e+00> : vector<8x128xf32>
    %228 = tpu.matmul %225, %227, %cst_218 {dimension_numbers = #tpu.dot_dimension_numbers<[1], [0], [0], [1], [0, 0, 1, 1], [], []>} : vector<8x128xf32>, vector<128x128xf32>, vector<8x128xf32> -> vector<8x128xf32>
    %229 = arith.addf %224, %228 : vector<8x128xf32>
    %230 = vector.extract_strided_slice %210 {offsets = [32, 0], sizes = [8, 128], strides = [1, 1]} : vector<40x128xf32> to vector<8x128xf32>
    %c4_219 = arith.constant 4 : index
    %c0_220 = arith.constant 0 : index
    %c0_221 = arith.constant 0 : index
    %231 = vector.load %arg6[%c4_219, %c0_220, %c0_221] : memref<5x128x128xf32, #tpu.memory_space<vmem>>, vector<1x128x128xf32>
    %232 = vector.shape_cast %231 : vector<1x128x128xf32> to vector<128x128xf32>
    %cst_222 = arith.constant dense<0.000000e+00> : vector<8x128xf32>
    %233 = tpu.matmul %230, %232, %cst_222 {dimension_numbers = #tpu.dot_dimension_numbers<[1], [0], [0], [1], [0, 0, 1, 1], [], []>} : vector<8x128xf32>, vector<128x128xf32>, vector<8x128xf32> -> vector<8x128xf32>
    %234 = arith.addf %229, %233 : vector<8x128xf32>
    %c0_223 = arith.constant 0 : index
    %c0_224 = arith.constant 0 : index
    %235 = vector.load %arg7[%c0_223, %c0_224] : memref<1x128xf32, #tpu.memory_space<vmem>>, vector<1x128xf32>
    %236 = vector.broadcast %235 : vector<1x128xf32> to vector<8x128xf32>
    %237 = arith.addf %234, %236 : vector<8x128xf32>
    %cst_225 = arith.constant 0.000000e+00 : f32
    %238 = vector.broadcast %cst_225 : f32 to vector<8x128xf32>
    %239 = arith.maximumf %237, %238 : vector<8x128xf32>
    %c0_226 = arith.constant 0 : index
    %c0_227 = arith.constant 0 : index
    %240 = vector.load %arg8[%c0_226, %c0_227] : memref<128x128xf32, #tpu.memory_space<vmem>>, vector<128x128xf32>
    %cst_228 = arith.constant dense<0.000000e+00> : vector<8x128xf32>
    %241 = tpu.matmul %239, %240, %cst_228 {dimension_numbers = #tpu.dot_dimension_numbers<[1], [0], [0], [1], [0, 0, 1, 1], [], []>} : vector<8x128xf32>, vector<128x128xf32>, vector<8x128xf32> -> vector<8x128xf32>
    %c0_229 = arith.constant 0 : index
    %c0_230 = arith.constant 0 : index
    %242 = vector.load %arg9[%c0_229, %c0_230] : memref<1x128xf32, #tpu.memory_space<vmem>>, vector<1x128xf32>
    %243 = vector.broadcast %242 : vector<1x128xf32> to vector<8x128xf32>
    %244 = arith.addf %241, %243 : vector<8x128xf32>
    %cst_231 = arith.constant 0.000000e+00 : f32
    %245 = vector.broadcast %cst_231 : f32 to vector<8x128xf32>
    %246 = arith.maximumf %244, %245 : vector<8x128xf32>
    %c0_232 = arith.constant 0 : index
    %c0_233 = arith.constant 0 : index
    %247 = vector.load %arg10[%c0_232, %c0_233] : memref<128x128xf32, #tpu.memory_space<vmem>>, vector<128x128xf32>
    %cst_234 = arith.constant dense<0.000000e+00> : vector<8x128xf32>
    %248 = tpu.matmul %246, %247, %cst_234 {dimension_numbers = #tpu.dot_dimension_numbers<[1], [0], [0], [1], [0, 0, 1, 1], [], []>} : vector<8x128xf32>, vector<128x128xf32>, vector<8x128xf32> -> vector<8x128xf32>
    %c0_235 = arith.constant 0 : index
    %c0_236 = arith.constant 0 : index
    %249 = vector.load %arg11[%c0_235, %c0_236] : memref<1x128xf32, #tpu.memory_space<vmem>>, vector<1x128xf32>
    %250 = vector.broadcast %249 : vector<1x128xf32> to vector<8x128xf32>
    %251 = arith.addf %248, %250 : vector<8x128xf32>
    %c0_237 = arith.constant 0 : index
    %c0_238 = arith.constant 0 : index
    %252 = vector.load %arg12[%c0_237, %c0_238] : memref<8x128xf32, #tpu.memory_space<vmem>>, vector<8x128xf32>
    tpu.vector_store %arg12[%c0_237, %c0_238], %251 {strides = array<i32>} : memref<8x128xf32, #tpu.memory_space<vmem>>, vector<8x128xf32>,
    return
  }
  func.func @transform_0(%arg0: i32) -> (i32, i32, i32, i32) {
    %c0_i32 = arith.constant 0 : i32
    %c0_i32_0 = arith.constant 0 : i32
    %c0_i32_1 = arith.constant 0 : i32
    %c0_i32_2 = arith.constant 0 : i32
    return %arg0, %c0_i32, %c0_i32_0, %c0_i32_1 : i32, i32, i32, i32
  }
  func.func @transform_1(%arg0: i32) -> (i32, i32, i32) {
    %c0_i32 = arith.constant 0 : i32
    %c0_i32_0 = arith.constant 0 : i32
    %c0_i32_1 = arith.constant 0 : i32
    %c0_i32_2 = arith.constant 0 : i32
    return %c0_i32, %c0_i32_0, %c0_i32_1 : i32, i32, i32
  }
  func.func @transform_2(%arg0: i32) -> (i32, i32) {
    %c0_i32 = arith.constant 0 : i32
    %c0_i32_0 = arith.constant 0 : i32
    %c0_i32_1 = arith.constant 0 : i32
    return %c0_i32, %c0_i32_0 : i32, i32
  }
  func.func @transform_3(%arg0: i32) -> (i32, i32, i32) {
    %c0_i32 = arith.constant 0 : i32
    %c0_i32_0 = arith.constant 0 : i32
    %c0_i32_1 = arith.constant 0 : i32
    %c0_i32_2 = arith.constant 0 : i32
    return %c0_i32, %c0_i32_0, %c0_i32_1 : i32, i32, i32
  }
  func.func @transform_4(%arg0: i32) -> (i32, i32) {
    %c0_i32 = arith.constant 0 : i32
    %c0_i32_0 = arith.constant 0 : i32
    %c0_i32_1 = arith.constant 0 : i32
    return %c0_i32, %c0_i32_0 : i32, i32
  }
  func.func @transform_5(%arg0: i32) -> (i32, i32, i32) {
    %c0_i32 = arith.constant 0 : i32
    %c0_i32_0 = arith.constant 0 : i32
    %c0_i32_1 = arith.constant 0 : i32
    %c0_i32_2 = arith.constant 0 : i32
    return %c0_i32, %c0_i32_0, %c0_i32_1 : i32, i32, i32
  }
  func.func @transform_6(%arg0: i32) -> (i32, i32) {
    %c0_i32 = arith.constant 0 : i32
    %c0_i32_0 = arith.constant 0 : i32
    %c0_i32_1 = arith.constant 0 : i32
    return %c0_i32, %c0_i32_0 : i32, i32
  }
  func.func @transform_7(%arg0: i32) -> (i32, i32) {
    %c0_i32 = arith.constant 0 : i32
    %c0_i32_0 = arith.constant 0 : i32
    %c0_i32_1 = arith.constant 0 : i32
    return %c0_i32, %c0_i32_0 : i32, i32
  }
  func.func @transform_8(%arg0: i32) -> (i32, i32) {
    %c0_i32 = arith.constant 0 : i32
    %c0_i32_0 = arith.constant 0 : i32
    %c0_i32_1 = arith.constant 0 : i32
    return %c0_i32, %c0_i32_0 : i32, i32
  }
  func.func @transform_9(%arg0: i32) -> (i32, i32) {
    %c0_i32 = arith.constant 0 : i32
    %c0_i32_0 = arith.constant 0 : i32
    %c0_i32_1 = arith.constant 0 : i32
    return %c0_i32, %c0_i32_0 : i32, i32
  }
  func.func @transform_10(%arg0: i32) -> (i32, i32) {
    %c0_i32 = arith.constant 0 : i32
    %c0_i32_0 = arith.constant 0 : i32
    %c0_i32_1 = arith.constant 0 : i32
    return %c0_i32, %c0_i32_0 : i32, i32
  }
  func.func @transform_11(%arg0: i32) -> (i32, i32) {
    %c0_i32 = arith.constant 0 : i32
    %c0_i32_0 = arith.constant 0 : i32
    return %arg0, %c0_i32 : i32, i32
  }
}

</mosaic_0001>

<bundles_post_ra>
// kernel: lenet_forward.1
= control target key start
LH: loop header
LB: loop body
LE: loop exit
PB: predicated region body
PF: predicated region fallthrough
CT: control target
= control target key end

     0   :  { %16 = vsyncpa [#allocation3], 0  ;;  %s7899_s0 = inlined_call_operand.vmem [shape: f32[1,4,64,32], index: 0, kind: input, shape index: {}]   ;;  %s7900_s1 = inlined_call_operand.hbm [shape: f32[5,32,256], index: 1, kind: input, shape index: {}]   ;;  %s7901_s2 = inlined_call_operand.vmem [shape: f32[1,256], index: 2, kind: input, shape index: {}]   ;;  %s7902_s3 = inlined_call_operand.hbm [shape: f32[5,128,256], index: 3, kind: input, shape index: {}]   ;;  %s7903_s4 = inlined_call_operand.vmem [shape: f32[1,256], index: 4, kind: input, shape index: {}]   ;;  %s7904_s5 = inlined_call_operand.vmem [shape: f32[5,128,128], index: 5, kind: input, shape index: {}]   ;;  %s7905_s6 = inlined_call_operand.vmem [shape: f32[1,128], index: 6, kind: input, shape index: {}]   ;;  %s7906_s7 = inlined_call_operand.vmem [shape: f32[128,128], index: 7, kind: input, shape index: {}]   ;;  %s7907_s8 = inlined_call_operand.vmem [shape: f32[1,128], index: 8, kind: input, shape index: {}]   ;;  %s7908_s9 = inlined_call_operand.hbm [shape: f32[128,128], index: 9, kind: input, shape index: {}]   ;;  %s7909_s10 = inlined_call_operand.vmem [shape: f32[1,128], index: 10, kind: input, shape index: {}]   ;;  %s7910_s11 = inlined_call_operand.vmem [shape: f32[8,128], index: 11, kind: output, shape index: {}]  }
   0x1   :  { %17 = vsyncpa [#allocation5], 0  ;;  %s5495_s17 = smov [#allocation4]   ;;  %s5496_s19 = smov [#allocation2]  }
   0x2   :  { %s39_s18 = sshll.u32 %s5495_s17, 4  ;;  %s25_s20 = sshll.u32 %s5496_s19, 4  ;;  %s40_s18 = int_to_ptr.vmem [resolvable:$true] %s39_s18  ;;  %s26_s20 = int_to_ptr.vmem [resolvable:$true] %s25_s20 }
   0x3   :  { %s5439_s21 = scalar_lea.vmem %s40_s18, 20480  ;;  %p5444_p1 = scmp.lt.s32.totalorder %s40_s18, %s40_s18 }
   0x4   :  { %p5440_p0 = scmp.ne.s32.totalorder %s40_s18, %s5439_s21  ;;  %p5445_p2 = scmp.lt.s32.totalorder %s5439_s21, %s5439_s21 }
   0x6   :  { %p5446_p3 = por %p5445_p2, %p5444_p1 }
   0x8   :  { %p5447_p4 = pnand %p5446_p3, %p5440_p0 }
   0xa   :  { %5450 = shalt.err (!%p5447_p4)
}
   0xb   :  { %s5497_s22 = smov 256   ;;  %s5498_s23 = smov 16  }
   0xc   :  { %45 = dma.hbm_to_vmem [thread:$0]  %s7902_s3, 20480, %s40_s18, [#allocation5], %s5497_s22, %s5497_s22, %s5498_s23  }
   0xd   :  { %s5459_s26 = scalar_lea.vmem %s26_s20, 5120  ;;  %p5464_p6 = scmp.lt.s32.totalorder %s26_s20, %s26_s20 }
   0xe   :  { %p5460_p5 = scmp.ne.s32.totalorder %s26_s20, %s5459_s26  ;;  %p5465_p7 = scmp.lt.s32.totalorder %s5459_s26, %s5459_s26 }
  0x10   :  { %p5466_p8 = por %p5465_p7, %p5464_p6 }
  0x12   :  { %p5467_p9 = pnand %p5466_p8, %p5460_p5 }
  0x14   :  { %5470 = shalt.err (!%p5467_p9)
}
  0x15   :  { %31 = dma.hbm_to_vmem [thread:$0]  %s7900_s1, 5120, %s26_s20, [#allocation3], %s5497_s22, %s5497_s22, %s5498_s23  }
  0x16   :  { %s5499_s29 = smov [#allocation6]  }
  0x17   :  { %s61_s30 = sshll.u32 %s5499_s29, 4  ;;  %s62_s30 = int_to_ptr.vmem [resolvable:$true] %s61_s30 }
  0x18   :  { %s5479_s12 = scalar_lea.vmem %s62_s30, 2048  ;;  %p5484_p11 = scmp.lt.s32.totalorder %s62_s30, %s62_s30 }
  0x19   :  { %p5480_p10 = scmp.ne.s32.totalorder %s62_s30, %s5479_s12  ;;  %p5485_p12 = scmp.lt.s32.totalorder %s5479_s12, %s5479_s12 }
  0x1b   :  { %p5486_p13 = por %p5485_p12, %p5484_p11 }
  0x1d   :  { %p5487_p0 = pnand %p5486_p13, %p5480_p10 }
  0x1f   :  { %5490 = shalt.err (!%p5487_p0)
}
  0x20   :  { %s5500_s3 = smov 128   ;;  %s5501_s13 = smov 8  }
  0x21   :  { %67 = dma.hbm_to_vmem [thread:$0]  %s7908_s9, 2048, %s62_s30, [#allocation5], %s5500_s3, %s5500_s3, %s5501_s13  }
  0x22   :  { %5491 = dma.done.wait [#allocation3], 5120  }
  0x23   :  { %5492 = vsyncadd [#allocation3], 4294962176 }
  0x24   :  { %5493 = dma.done.wait [#allocation5], 22528  }
  0x25   :  { %5494 = vsyncadd [#allocation5], 4294944768  ;;  %v7931_v0 = vmov 0.0   ;;  %v5575_v1 = vld [vmem:[#allocation2 + $0x78] sm:$0xff]  ;;  %v5577_v2 = vld [vmem:[#allocation2 + $0x70] sm:$0xff]  ;;  %vm113_vm0 = vcmask 261120  }
  0x26   :  { %217 = vmatprep.mubr.f32.mxu1 %v7931_v0  ;;  %199 = vmatprep.mubr.f32.mxu0 %v7931_v0  ;;  %v5579_v3 = vld [vmem:[#allocation2 + $0x68] sm:$0xff]  ;;  %v5582_v4 = vld [vmem:[#allocation2 + $0x60] sm:$0xff]  ;;  %v5586_v5 = vld [vmem:[#allocation2 + $0x58] sm:$0xff]  ;;  %vm5503_vm1 = vmmov 0  }
  0x27   :  { %5319 = vmatprep.subr.mxu1 %v5575_v1  ;;  %159 = vmatprep.subr.mxu0 %v5575_v1  ;;  %v5590_v6 = vld [vmem:[#allocation2 + $0x50] sm:$0xff]  ;;  %v5594_v7 = vld [vmem:[#allocation2 + $0x48] sm:$0xff]  ;;  %v5598_v8 = vld [vmem:[#allocation2 + $0x40] sm:$0xff] }
  0x28   :  { %5323 = vmatpush1.msra.mxu1 %v5577_v2  ;;  %160 = vmatpush1.msra.mxu0 %v5577_v2  ;;  %v5605_v9 = vld [vmem:[%s7899_s0 + $0x58] sm:$0xff]  ;;  %v5611_v11 = vld [vmem:[#allocation2 + $0x30] sm:$0xff]  ;;  %v5619_v12 = vld [vmem:[%s7899_s0 + $0x40] sm:$0xff] }
  0x29   :  { %5320 = vmatprep.subr.mxu1 %v5579_v3  ;;  %161 = vmatprep.subr.mxu0 %v5579_v3  ;;  %v5607_v10 = vld [vmem:[#allocation2 + $0x38] sm:$0xff]  ;;  %7954 = vst [vmem:[#allocation9_spill] sm:$0xff] %v5611_v11  ;;  %v5621_v13 = vld [vmem:[#allocation2 + $0x28] sm:$0xff]  ;;  %v5626_v14 = vld [vmem:[#allocation2 + $0x20] sm:$0xff] }
  0x2a   :  { %5324 = vmatpush1.msra.mxu1 %v5582_v4  ;;  %162 = vmatpush1.msra.mxu0 %v5582_v4  ;;  %7955 = vst [vmem:[#allocation10_spill] sm:$0xff] %v5621_v13  ;;  %v5633_v15 = vld [vmem:[%s7899_s0 + $0x60] sm:$0xff]  ;;  %v5635_v16 = vld [vmem:[#allocation2 + $0x18] sm:$0xff]  ;;  %v5647_v18 = vld [vmem:[%s7899_s0 + $0x48] sm:$0xff] }
  0x2b   :  { %5321 = vmatprep.subr.mxu1 %v5586_v5  ;;  %163 = vmatprep.subr.mxu0 %v5586_v5  ;;  %7956 = vst [vmem:[#allocation11_spill] sm:$0xff] %v5635_v16  ;;  %v5640_v17 = vld [vmem:[#allocation2 + $0xb8] sm:$0xff]  ;;  %v5649_v19 = vld [vmem:[#allocation2 + $0x10] sm:$0xff]  ;;  %v5660_v21 = vld [vmem:[%s7899_s0 + $0x68] sm:$0xff] }
  0x2c   :  { %5325 = vmatpush1.msra.mxu1 %v5590_v6  ;;  %164 = vmatpush1.msra.mxu0 %v5590_v6  ;;  %7957 = vst [vmem:[#allocation12_spill] sm:$0xff] %v5640_v17  ;;  %v5654_v20 = vld [vmem:[#allocation2 + $0xb0] sm:$0xff]  ;;  %v5663_v22 = vld [vmem:[#allocation2 + $0xa8] sm:$0xff]  ;;  %v5668_v23 = vld [vmem:[#allocation2 + $0xa0] sm:$0xff] }
  0x2d   :  { %5322 = vmatprep.subr.mxu1 %v5594_v7  ;;  %165 = vmatprep.subr.mxu0 %v5594_v7  ;;  %7958 = vst [vmem:[#allocation13_spill] sm:$0xff] %v5654_v20  ;;  %v5675_v24 = vld [vmem:[%s7899_s0 + $0x50] sm:$0xff]  ;;  %v5677_v25 = vld [vmem:[#allocation2 + $0x8] sm:$0xff]  ;;  %v5682_v26 = vld [vmem:[#allocation2 + $0x98] sm:$0xff] }
  0x2e   :  { %5326 = vmatpush1.msra.mxu1 %v5598_v8  ;;  %166 = vmatpush1.msra.mxu0 %v5598_v8  ;;  %7959 = vst [vmem:[#allocation14_spill] sm:$0xff] %v5677_v25  ;;  %v5684_v27 = vld [vmem:[#allocation2] sm:$0xff]  ;;  %v5691_v28 = vld [vmem:[%s7899_s0 + $0x70] sm:$0xff]  ;;  %v5698_v30 = vld [vmem:[#allocation2 + $0x88] sm:$0xff] }
  0x2f   :  { %4716 = vmatmul.mubr.msk.f32.vlgmr.msra.gmra.mxu1 %vm113_vm0, %v5605_v9  ;;  %287 = vmatprep.subr.mxu1 %v5607_v10  ;;  %7960 = vst [vmem:[#allocation15_spill] sm:$0xff] %v5684_v27  ;;  %v5693_v29 = vld [vmem:[#allocation2 + $0x90] sm:$0xff]  ;;  %v5702_v31 = vld [vmem:[#allocation2 + $0x80] sm:$0xff]  ;;  %v5712_v33 = vld [vmem:[#allocation2 + $0xf8] sm:$0xff] }
  0x30   :  { %288 = vmatpush1.msra.mxu1 %v5611_v11  ;;  %223 = vmatprep.mubr.f32.mxu1 %v7931_v0  ;;  %v5710_v32 = vld [vmem:[%s7899_s0 + $0x80] sm:$0xff]  ;;  %v5721_v35 = vld [vmem:[#allocation2 + $0xf0] sm:$0xff]  ;;  %v5726_v36 = vld [vmem:[#allocation2 + $0xe8] sm:$0xff] }
  0x31   :  { %4713 = vmatmul.mubr.msk.f32.vlgmr.msra.gmra.mxu0 %vm113_vm0, %v5619_v12  ;;  %289 = vmatprep.subr.mxu1 %v5621_v13  ;;  %v81_v34 = vld [vmem:[%s7899_s0] sm:$0xff]  ;;  %v5728_v37 = vld [vmem:[#allocation2 + $0x138] sm:$0xff]  ;;  %v5735_v38 = vld [vmem:[%s7899_s0 + $0x88] sm:$0xff] }
  0x32   :  { %290 = vmatpush1.msra.mxu1 %v5626_v14  ;;  %205 = vmatprep.mubr.f32.mxu0 %v7931_v0  ;;  %v5737_v39 = vld [vmem:[#allocation2 + $0xe0] sm:$0xff]  ;;  %v5744_v40 = vld [vmem:[%s7899_s0 + $0x8] sm:$0xff]  ;;  %v5747_v41 = vld [vmem:[#allocation2 + $0xd8] sm:$0xff] }
  0x33   :  { %4717 = vmatmul.mubr.msk.f32.gmra.mxu1 %vm113_vm0, %v5633_v15  ;;  %291 = vmatprep.subr.mxu1 %v5635_v16  ;;  %v5753_v42 = vld [vmem:[#allocation2 + $0xd0] sm:$0xff]  ;;  %v5765_v45 = vld [vmem:[#allocation2 + $0xc8] sm:$0xff]  ;;  %v5776_v47 = vld [vmem:[#allocation2 + $0xc0] sm:$0xff] }
  0x34   :  { %229 = vmatprep.mubr.f32.mxu1 %v7931_v0  ;;  %432 = vmatprep.subr.mxu0 %v5640_v17  ;;  %v5755_v43 = vld [vmem:[#allocation2 + $0x130] sm:$0xff]  ;;  %v5781_v48 = vld [vmem:[#allocation2 + $0x128] sm:$0xff]  ;;  %v5789_v49 = vld [vmem:[%s7899_s0 + $0x98] sm:$0xff] }
  0x35   :  { %4714 = vmatmul.mubr.msk.f32.gmra.mxu0 %vm113_vm0, %v5647_v18  ;;  %292 = vmatpush1.msra.mxu1 %v5649_v19  ;;  %v5763_v44 = vld [vmem:[%s7899_s0 + $0x90] sm:$0xff]  ;;  %v5795_v50 = vld [vmem:[%s7899_s0 + $0x18] sm:$0xff]  ;;  %v5799_v51 = vld [vmem:[#allocation2 + $0x120] sm:$0xff] }
  0x36   :  { %433 = vmatpush1.msra.mxu0 %v5654_v20  ;;  %211 = vmatprep.mubr.f32.mxu0 %v7931_v0  ;;  %v5771_v46 = vld [vmem:[%s7899_s0 + $0x10] sm:$0xff]  ;;  %v5804_v52 = vld [vmem:[#allocation2 + $0x118] sm:$0xff]  ;;  %v5812_v53 = vld [vmem:[%s7899_s0 + $0xa0] sm:$0xff] }
  0x37   :  { %4718 = vmatmul.mubr.msk.f32.gmra.mxu1 %vm113_vm0, %v5660_v21  ;;  %434 = vmatprep.subr.mxu0 %v5663_v22  ;;  %v5818_v54 = vld [vmem:[%s7899_s0 + $0x20] sm:$0xff]  ;;  %v5822_v55 = vld [vmem:[#allocation2 + $0x110] sm:$0xff]  ;;  %v5826_v56 = vld [vmem:[#allocation2 + $0x108] sm:$0xff] }
  0x38   :  { %235 = vmatprep.mubr.f32.mxu1 %v7931_v0  ;;  %435 = vmatpush1.msra.mxu0 %v5668_v23  ;;  %v5834_v57 = vld [vmem:[%s7899_s0 + $0xa8] sm:$0xff]  ;;  %v5844_v59 = vld [vmem:[#allocation2 + $0x100] sm:$0xff]  ;;  %v5854_v60 = vld [vmem:[%s7899_s0 + $0xb0] sm:$0xff] }
  0x39   :  { %4715 = vmatmul.mubr.msk.f32.gmra.mxu0 %vm113_vm0, %v5675_v24  ;;  %293 = vmatprep.subr.mxu1 %v5677_v25  ;;  %v5840_v58 = vld [vmem:[%s7899_s0 + $0x28] sm:$0xff]  ;;  %7961 = vst [vmem:[#allocation16_spill] sm:$0xff] %v5854_v60  ;;  %v5860_v61 = vld [vmem:[%s7899_s0 + $0x30] sm:$0xff]  ;;  %v5873_v62 = vld [vmem:[%s7899_s0 + $0xc0] sm:$0xff] }
  0x3a   :  { %436 = vmatprep.subr.mxu0 %v5682_v26  ;;  %294 = vmatpush1.msra.mxu1 %v5684_v27  ;;  %7962 = vst [vmem:[#allocation17_spill] sm:$0xff] %v5873_v62  ;;  %v5885_v63 = vld [vmem:[%s7899_s0 + $0xc8] sm:$0xff] }
  0x3b   :  { %4719 = vmatmul.mubr.msk.f32.gmra.mxu1 %vm113_vm0, %v5691_v28  ;;  %437 = vmatpush1.msra.mxu0 %v5693_v29  ;;  %7963 = vst [vmem:[#allocation18_spill] sm:$0xff] %v5885_v63 }
  0x3c   :  { %438 = vmatprep.subr.mxu0 %v5698_v30  ;;  %327 = vmatprep.mubr.f32.mxu1 %v7931_v0 }
  0x3d   :  { %439 = vmatpush1.msra.mxu0 %v5702_v31  ;;  %472 = vmatprep.mubr.f32.mxu0 %v7931_v0 }
  0x3e   :  { %4734 = vmatmul.mubr.msk.f32.vlgmr.msra.gmra.mxu0 %vm113_vm0, %v5710_v32  ;;  %591 = vmatprep.subr.mxu1 %v5712_v33 }
  0x3f   :  { %4720 = vmatmul.mubr.msk.f32.vlgmr.msra.gmra.mxu1 %vm113_vm0, %v81_v34  ;;  %478 = vmatprep.mubr.f32.mxu0 %v7931_v0  ;;  %v5899_v34 = vld [vmem:[%s7899_s0 + $0xd0] sm:$0xff] }
  0x40   :  { %592 = vmatpush1.msra.mxu1 %v5721_v35  ;;  %333 = vmatprep.mubr.f32.mxu1 %v7931_v0 }
  0x41   :  { %593 = vmatprep.subr.mxu1 %v5726_v36  ;;  %749 = vmatprep.subr.mxu0 %v5728_v37 }
  0x42   :  { %4735 = vmatmul.mubr.msk.f32.gmra.mxu0 %vm113_vm0, %v5735_v38  ;;  %594 = vmatpush1.msra.mxu1 %v5737_v39 }
  0x43   :  { %4721 = vmatmul.mubr.msk.f32.gmra.mxu1 %vm113_vm0, %v5744_v40  ;;  %484 = vmatprep.mubr.f32.mxu0 %v7931_v0 }
  0x44   :  { %339 = vmatprep.mubr.f32.mxu1 %v7931_v0  ;;  %595 = vmatprep.subr.mxu1 %v5747_v41 }
  0x45   :  { %596 = vmatpush1.msra.mxu1 %v5753_v42  ;;  %750 = vmatpush1.msra.mxu0 %v5755_v43 }
  0x46   :  { %4736 = vmatmul.mubr.msk.f32.gmra.mxu0 %vm113_vm0, %v5763_v44  ;;  %597 = vmatprep.subr.mxu1 %v5765_v45 }
  0x47   :  { %4722 = vmatmul.mubr.msk.f32.gmra.mxu1 %vm113_vm0, %v5771_v46  ;;  %490 = vmatprep.mubr.f32.mxu0 %v7931_v0 }
  0x48   :  { %345 = vmatprep.mubr.f32.mxu1 %v7931_v0  ;;  %598 = vmatpush1.msra.mxu1 %v5776_v47 }
  0x49   :  { %751 = vmatprep.subr.mxu0 %v5781_v48  ;;  %909 = vmatprep.subr.mxu1 %v5575_v1 }
  0x4a   :  { %4737 = vmatmul.mubr.msk.f32.gmra.mxu0 %vm113_vm0, %v5789_v49 }
  0x4b   :  { %4723 = vmatmul.mubr.msk.f32.gmra.mxu1 %vm113_vm0, %v5795_v50  ;;  %496 = vmatprep.mubr.f32.mxu0 %v7931_v0 }
  0x4c   :  { %351 = vmatprep.mubr.f32.mxu1 %v7931_v0  ;;  %752 = vmatpush1.msra.mxu0 %v5799_v51 }
  0x4d   :  { %753 = vmatprep.subr.mxu0 %v5804_v52 }
  0x4e   :  { %4738 = vmatmul.mubr.msk.f32.gmra.mxu0 %vm113_vm0, %v5812_v53 }
  0x4f   :  { %4724 = vmatmul.mubr.msk.f32.gmra.mxu1 %vm113_vm0, %v5818_v54  ;;  %502 = vmatprep.mubr.f32.mxu0 %v7931_v0 }
  0x50   :  { %357 = vmatprep.mubr.f32.mxu1 %v7931_v0  ;;  %754 = vmatpush1.msra.mxu0 %v5822_v55 }
  0x51   :  { %755 = vmatprep.subr.mxu0 %v5826_v56 }
  0x52   :  { %4739 = vmatmul.mubr.msk.f32.gmra.mxu0 %vm113_vm0, %v5834_v57 }
  0x53   :  { %4725 = vmatmul.mubr.msk.f32.gmra.mxu1 %vm113_vm0, %v5840_v58  ;;  %508 = vmatprep.mubr.f32.mxu0 %v7931_v0 }
  0x54   :  { %363 = vmatprep.mubr.f32.mxu1 %v7931_v0  ;;  %756 = vmatpush1.msra.mxu0 %v5844_v59 }
  0x55   :  { %1016 = vmatprep.subr.mxu0 %v5607_v10 }
  0x56   :  { %4740 = vmatmul.mubr.msk.f32.gmra.mxu0 %vm113_vm0, %v5854_v60 }
  0x57   :  { %4726 = vmatmul.mubr.msk.f32.gmra.mxu1 %vm113_vm0, %v5860_v61  ;;  %789 = vmatprep.mubr.f32.mxu0 %v7931_v0 }
  0x58   :  { %631 = vmatprep.mubr.f32.mxu1 %v7931_v0 }
  0x5a   :  { %4755 = vmatmul.mubr.msk.f32.vlgmr.msra.gmra.mxu0 %vm113_vm0, %v5744_v40 }
  0x5b   :  { %4748 = vmatmul.mubr.msk.f32.vlgmr.msra.gmra.mxu1 %vm113_vm0, %v5873_v62  ;;  %795 = vmatprep.mubr.f32.mxu0 %v7931_v0 }
  0x5c   :  { %910 = vmatpush1.msra.mxu1 %v5577_v2  ;;  %637 = vmatprep.mubr.f32.mxu1 %v7931_v0 }
  0x5d   :  { %911 = vmatprep.subr.mxu1 %v5579_v3  ;;  %1017 = vmatpush1.msra.mxu0 %v5611_v11  ;;  %v5914_v11 = vld [vmem:[%s7899_s0 + $0xd8] sm:$0xff] }
  0x5e   :  { %4756 = vmatmul.mubr.msk.f32.gmra.mxu0 %vm113_vm0, %v5771_v46  ;;  %912 = vmatpush1.msra.mxu1 %v5582_v4 }
  0x5f   :  { %4749 = vmatmul.mubr.msk.f32.gmra.mxu1 %vm113_vm0, %v5885_v63  ;;  %801 = vmatprep.mubr.f32.mxu0 %v7931_v0 }
  0x60   :  { %643 = vmatprep.mubr.f32.mxu1 %v7931_v0  ;;  %913 = vmatprep.subr.mxu1 %v5586_v5 }
  0x61   :  { %914 = vmatpush1.msra.mxu1 %v5590_v6  ;;  %1018 = vmatprep.subr.mxu0 %v5621_v13  ;;  %v5929_v13 = vld [vmem:[%s7899_s0 + $0xe0] sm:$0xff] }
  0x62   :  { %4757 = vmatmul.mubr.msk.f32.gmra.mxu0 %vm113_vm0, %v5795_v50  ;;  %915 = vmatprep.subr.mxu1 %v5594_v7  ;;  %7964 = vst [vmem:[#allocation19_spill] sm:$0xff] %v5929_v13 }
  0x63   :  { %4750 = vmatmul.mubr.msk.f32.gmra.mxu1 %vm113_vm0, %v5899_v34  ;;  %807 = vmatprep.mubr.f32.mxu0 %v7931_v0 }
  0x64   :  { %649 = vmatprep.mubr.f32.mxu1 %v7931_v0  ;;  %916 = vmatpush1.msra.mxu1 %v5598_v8 }
  0x65   :  { %1019 = vmatpush1.msra.mxu0 %v5626_v14  ;;  %1123 = vmatprep.subr.mxu1 %v5640_v17 }
  0x66   :  { %4758 = vmatmul.mubr.msk.f32.gmra.mxu0 %vm113_vm0, %v5818_v54  ;;  %1020 = vmatprep.subr.mxu0 %v5635_v16  ;;  %v5942_v16 = vld [vmem:[%s7899_s0 + $0xe8] sm:$0xff] }
  0x67   :  { %4751 = vmatmul.mubr.msk.f32.gmra.mxu1 %vm113_vm0, %v5914_v11  ;;  %813 = vmatprep.mubr.f32.mxu0 %v7931_v0 }
  0x68   :  { %655 = vmatprep.mubr.f32.mxu1 %v7931_v0  ;;  %1021 = vmatpush1.msra.mxu0 %v5649_v19 }
  0x69   :  { %1022 = vmatprep.subr.mxu0 %v5677_v25  ;;  %v5954_v25 = vld [vmem:[%s7899_s0 + $0x38] sm:$0xff] }
  0x6a   :  { %4759 = vmatmul.mubr.msk.f32.gmra.mxu0 %vm113_vm0, %v5840_v58 }
  0x6b   :  { %4752 = vmatmul.mubr.msk.f32.gmra.mxu1 %vm113_vm0, %v5929_v13  ;;  %819 = vmatprep.mubr.f32.mxu0 %v7931_v0 }
  0x6c   :  { %661 = vmatprep.mubr.f32.mxu1 %v7931_v0  ;;  %1023 = vmatpush1.msra.mxu0 %v5684_v27  ;;  %v5960_v27 = vld [vmem:[%s7899_s0 + $0xf0] sm:$0xff] }
  0x6d   :  { %1244 = vmatprep.subr.mxu0 %v5712_v33 }
  0x6e   :  { %4760 = vmatmul.mubr.msk.f32.gmra.mxu0 %vm113_vm0, %v5860_v61 }
  0x6f   :  { %4753 = vmatmul.mubr.msk.f32.gmra.mxu1 %vm113_vm0, %v5942_v16  ;;  %825 = vmatprep.mubr.f32.mxu0 %v7931_v0 }
  0x70   :  { %667 = vmatprep.mubr.f32.mxu1 %v7931_v0 }
  0x72   :  { %4761 = vmatmul.mubr.msk.f32.gmra.mxu0 %vm113_vm0, %v5954_v25 }
  0x73   :  { %4754 = vmatmul.mubr.msk.f32.gmra.mxu1 %vm113_vm0, %v5960_v27  ;;  %1056 = vmatprep.mubr.f32.mxu0 %v7931_v0 }
  0x74   :  { %949 = vmatprep.mubr.f32.mxu1 %v7931_v0 }
  0x76   :  { %4769 = vmatmul.mubr.msk.f32.vlgmr.msra.gmra.mxu0 %vm113_vm0, %v5619_v12  ;;  %v7965_v12 = vld [vmem:[#allocation9_spill] sm:$0xff] }
  0x77   :  { %4762 = vmatmul.mubr.msk.f32.vlgmr.msra.gmra.mxu1 %vm113_vm0, %v5710_v32  ;;  %1062 = vmatprep.mubr.f32.mxu0 %v7931_v0 }
  0x78   :  { %1124 = vmatpush1.msra.mxu1 %v5654_v20  ;;  %955 = vmatprep.mubr.f32.mxu1 %v7931_v0 }
  0x79   :  { %1125 = vmatprep.subr.mxu1 %v5663_v22  ;;  %1245 = vmatpush1.msra.mxu0 %v5721_v35 }
  0x7a   :  { %4770 = vmatmul.mubr.msk.f32.gmra.mxu0 %vm113_vm0, %v5647_v18  ;;  %1126 = vmatpush1.msra.mxu1 %v5668_v23 }
  0x7b   :  { %4763 = vmatmul.mubr.msk.f32.gmra.mxu1 %vm113_vm0, %v5735_v38  ;;  %1068 = vmatprep.mubr.f32.mxu0 %v7931_v0 }
  0x7c   :  { %961 = vmatprep.mubr.f32.mxu1 %v7931_v0  ;;  %1127 = vmatprep.subr.mxu1 %v5682_v26 }
  0x7d   :  { %1128 = vmatpush1.msra.mxu1 %v5693_v29  ;;  %1246 = vmatprep.subr.mxu0 %v5726_v36 }
  0x7e   :  { %4771 = vmatmul.mubr.msk.f32.gmra.mxu0 %vm113_vm0, %v5675_v24  ;;  %1129 = vmatprep.subr.mxu1 %v5698_v30 }
  0x7f   :  { %4764 = vmatmul.mubr.msk.f32.gmra.mxu1 %vm113_vm0, %v5763_v44  ;;  %1074 = vmatprep.mubr.f32.mxu0 %v7931_v0 }
  0x80   :  { %967 = vmatprep.mubr.f32.mxu1 %v7931_v0  ;;  %1130 = vmatpush1.msra.mxu1 %v5702_v31 }
  0x81   :  { %1247 = vmatpush1.msra.mxu0 %v5737_v39  ;;  %1393 = vmatprep.subr.mxu1 %v5728_v37 }
  0x82   :  { %4772 = vmatmul.mubr.msk.f32.gmra.mxu0 %vm113_vm0, %v5605_v9  ;;  %1248 = vmatprep.subr.mxu0 %v5747_v41 }
  0x83   :  { %4765 = vmatmul.mubr.msk.f32.gmra.mxu1 %vm113_vm0, %v5789_v49  ;;  %1080 = vmatprep.mubr.f32.mxu0 %v7931_v0 }
  0x84   :  { %973 = vmatprep.mubr.f32.mxu1 %v7931_v0  ;;  %1249 = vmatpush1.msra.mxu0 %v5753_v42 }
  0x85   :  { %1250 = vmatprep.subr.mxu0 %v5765_v45 }
  0x86   :  { %4773 = vmatmul.mubr.msk.f32.gmra.mxu0 %vm113_vm0, %v5633_v15 }
  0x87   :  { %4766 = vmatmul.mubr.msk.f32.gmra.mxu1 %vm113_vm0, %v5812_v53  ;;  %1086 = vmatprep.mubr.f32.mxu0 %v7931_v0 }
  0x88   :  { %979 = vmatprep.mubr.f32.mxu1 %v7931_v0  ;;  %1251 = vmatpush1.msra.mxu0 %v5776_v47 }
  0x89   :  { %1542 = vmatprep.subr.mxu0 %v5575_v1 }
  0x8a   :  { %4774 = vmatmul.mubr.msk.f32.gmra.mxu0 %vm113_vm0, %v5660_v21 }
  0x8b   :  { %4767 = vmatmul.mubr.msk.f32.gmra.mxu1 %vm113_vm0, %v5834_v57  ;;  %1092 = vmatprep.mubr.f32.mxu0 %v7931_v0 }
  0x8c   :  { %985 = vmatprep.mubr.f32.mxu1 %v7931_v0 }
  0x8e   :  { %4775 = vmatmul.mubr.msk.f32.gmra.mxu0 %vm113_vm0, %v5691_v28 }
  0x8f   :  { %4768 = vmatmul.mubr.msk.f32.gmra.mxu1 %vm113_vm0, %v5854_v60  ;;  %1284 = vmatprep.mubr.f32.mxu0 %v7931_v0 }
  0x90   :  { %1163 = vmatprep.mubr.f32.mxu1 %v7931_v0 }
  0x92   :  { %4783 = vmatmul.mubr.msk.f32.vlgmr.msra.gmra.mxu0 %vm113_vm0, %v5744_v40 }
  0x93   :  { %4776 = vmatmul.mubr.msk.f32.vlgmr.msra.gmra.mxu1 %vm113_vm0, %v5873_v62  ;;  %1290 = vmatprep.mubr.f32.mxu0 %v7931_v0 }
  0x94   :  { %1394 = vmatpush1.msra.mxu1 %v5755_v43  ;;  %1169 = vmatprep.mubr.f32.mxu1 %v7931_v0 }
  0x95   :  { %1395 = vmatprep.subr.mxu1 %v5781_v48  ;;  %1543 = vmatpush1.msra.mxu0 %v5577_v2 }
  0x96   :  { %4784 = vmatmul.mubr.msk.f32.gmra.mxu0 %vm113_vm0, %v5771_v46  ;;  %1396 = vmatpush1.msra.mxu1 %v5799_v51 }
  0x97   :  { %4777 = vmatmul.mubr.msk.f32.gmra.mxu1 %vm113_vm0, %v5885_v63  ;;  %1296 = vmatprep.mubr.f32.mxu0 %v7931_v0 }
  0x98   :  { %1175 = vmatprep.mubr.f32.mxu1 %v7931_v0  ;;  %1397 = vmatprep.subr.mxu1 %v5804_v52 }
  0x99   :  { %1398 = vmatpush1.msra.mxu1 %v5822_v55  ;;  %1544 = vmatprep.subr.mxu0 %v5579_v3 }
  0x9a   :  { %4785 = vmatmul.mubr.msk.f32.gmra.mxu0 %vm113_vm0, %v5795_v50  ;;  %1399 = vmatprep.subr.mxu1 %v5826_v56 }
  0x9b   :  { %4778 = vmatmul.mubr.msk.f32.gmra.mxu1 %vm113_vm0, %v5899_v34  ;;  %1302 = vmatprep.mubr.f32.mxu0 %v7931_v0 }
  0x9c   :  { %1181 = vmatprep.mubr.f32.mxu1 %v7931_v0  ;;  %1400 = vmatpush1.msra.mxu1 %v5844_v59 }
  0x9d   :  { %1545 = vmatpush1.msra.mxu0 %v5582_v4  ;;  %1649 = vmatprep.subr.mxu1 %v5607_v10 }
  0x9e   :  { %4786 = vmatmul.mubr.msk.f32.gmra.mxu0 %vm113_vm0, %v5818_v54  ;;  %1546 = vmatprep.subr.mxu0 %v5586_v5 }
  0x9f   :  { %4779 = vmatmul.mubr.msk.f32.gmra.mxu1 %vm113_vm0, %v5914_v11  ;;  %1308 = vmatprep.mubr.f32.mxu0 %v7931_v0 }
  0xa0   :  { %1187 = vmatprep.mubr.f32.mxu1 %v7931_v0  ;;  %1547 = vmatpush1.msra.mxu0 %v5590_v6 }
  0xa1   :  { %1548 = vmatprep.subr.mxu0 %v5594_v7 }
  0xa2   :  { %4787 = vmatmul.mubr.msk.f32.gmra.mxu0 %vm113_vm0, %v5840_v58 }
  0xa3   :  { %4780 = vmatmul.mubr.msk.f32.gmra.mxu1 %vm113_vm0, %v5929_v13  ;;  %1314 = vmatprep.mubr.f32.mxu0 %v7931_v0 }
  0xa4   :  { %1193 = vmatprep.mubr.f32.mxu1 %v7931_v0  ;;  %1549 = vmatpush1.msra.mxu0 %v5598_v8 }
  0xa5   :  { %1756 = vmatprep.subr.mxu0 %v5640_v17  ;;  %v7966_v17 = vld [vmem:[#allocation10_spill] sm:$0xff] }
  0xa6   :  { %4788 = vmatmul.mubr.msk.f32.gmra.mxu0 %vm113_vm0, %v5860_v61 }
  0xa7   :  { %4781 = vmatmul.mubr.msk.f32.gmra.mxu1 %vm113_vm0, %v5942_v16  ;;  %1320 = vmatprep.mubr.f32.mxu0 %v7931_v0 }
  0xa8   :  { %1199 = vmatprep.mubr.f32.mxu1 %v7931_v0 }
  0xaa   :  { %4789 = vmatmul.mubr.msk.f32.gmra.mxu0 %vm113_vm0, %v5954_v25 }
  0xab   :  { %4782 = vmatmul.mubr.msk.f32.gmra.mxu1 %vm113_vm0, %v5960_v27  ;;  %1582 = vmatprep.mubr.f32.mxu0 %v7931_v0 }
  0xac   :  { %1433 = vmatprep.mubr.f32.mxu1 %v7931_v0 }
  0xae   :  { %4804 = vmatmul.mubr.msk.f32.vlgmr.msra.gmra.mxu0 %vm113_vm0, %v5873_v62  ;;  %v7967_v62 = vld [vmem:[#allocation11_spill] sm:$0xff] }
  0xaf   :  { %4797 = vmatmul.mubr.msk.f32.vlgmr.msra.gmra.mxu1 %vm113_vm0, %v5647_v18  ;;  %1588 = vmatprep.mubr.f32.mxu0 %v7931_v0 }
  0xb0   :  { %1650 = vmatpush1.msra.mxu1 %v7965_v12  ;;  %1439 = vmatprep.mubr.f32.mxu1 %v7931_v0 }
  0xb1   :  { %1651 = vmatprep.subr.mxu1 %v7966_v17  ;;  %1757 = vmatpush1.msra.mxu0 %v5654_v20  ;;  %v7968_v20 = vld [vmem:[#allocation14_spill] sm:$0xff] }
  0xb2   :  { %4805 = vmatmul.mubr.msk.f32.gmra.mxu0 %vm113_vm0, %v5885_v63  ;;  %1652 = vmatpush1.msra.mxu1 %v5626_v14  ;;  %v7969_v63 = vld [vmem:[#allocation15_spill] sm:$0xff] }
  0xb3   :  { %4798 = vmatmul.mubr.msk.f32.gmra.mxu1 %vm113_vm0, %v5675_v24  ;;  %1594 = vmatprep.mubr.f32.mxu0 %v7931_v0 }
  0xb4   :  { %1445 = vmatprep.mubr.f32.mxu1 %v7931_v0  ;;  %1653 = vmatprep.subr.mxu1 %v7967_v62 }
  0xb5   :  { %1654 = vmatpush1.msra.mxu1 %v5649_v19  ;;  %1758 = vmatprep.subr.mxu0 %v5663_v22 }
  0xb6   :  { %4806 = vmatmul.mubr.msk.f32.gmra.mxu0 %vm113_vm0, %v5899_v34  ;;  %1655 = vmatprep.subr.mxu1 %v7968_v20 }
  0xb7   :  { %4799 = vmatmul.mubr.msk.f32.gmra.mxu1 %vm113_vm0, %v5605_v9  ;;  %1600 = vmatprep.mubr.f32.mxu0 %v7931_v0 }
  0xb8   :  { %1451 = vmatprep.mubr.f32.mxu1 %v7931_v0  ;;  %1656 = vmatpush1.msra.mxu1 %v7969_v63 }
  0xb9   :  { %1759 = vmatpush1.msra.mxu0 %v5668_v23  ;;  %1877 = vmatprep.subr.mxu1 %v5712_v33 }
  0xba   :  { %4807 = vmatmul.mubr.msk.f32.gmra.mxu0 %vm113_vm0, %v5914_v11  ;;  %1760 = vmatprep.subr.mxu0 %v5682_v26 }
  0xbb   :  { %4800 = vmatmul.mubr.msk.f32.gmra.mxu1 %vm113_vm0, %v5633_v15  ;;  %1606 = vmatprep.mubr.f32.mxu0 %v7931_v0 }
  0xbc   :  { %1457 = vmatprep.mubr.f32.mxu1 %v7931_v0  ;;  %1761 = vmatpush1.msra.mxu0 %v5693_v29 }
  0xbd   :  { %1762 = vmatprep.subr.mxu0 %v5698_v30 }
  0xbe   :  { %4808 = vmatmul.mubr.msk.f32.gmra.mxu0 %vm113_vm0, %v5929_v13  ;;  %v6139_v13 = vld [vmem:[%s7899_s0 + $0x78] sm:$0xff] }
  0xbf   :  { %4801 = vmatmul.mubr.msk.f32.gmra.mxu1 %vm113_vm0, %v5660_v21  ;;  %1612 = vmatprep.mubr.f32.mxu0 %v7931_v0  ;;  %7970 = vst [vmem:[#allocation9_spill] sm:$0xff] %v6139_v13 }
  0xc0   :  { %1463 = vmatprep.mubr.f32.mxu1 %v7931_v0  ;;  %1763 = vmatpush1.msra.mxu0 %v5702_v31 }
  0xc1   :  { %2026 = vmatprep.subr.mxu0 %v5728_v37 }
  0xc2   :  { %4809 = vmatmul.mubr.msk.f32.gmra.mxu0 %vm113_vm0, %v5942_v16 }
  0xc3   :  { %4802 = vmatmul.mubr.msk.f32.gmra.mxu1 %vm113_vm0, %v5691_v28  ;;  %1618 = vmatprep.mubr.f32.mxu0 %v7931_v0 }
  0xc4   :  { %1469 = vmatprep.mubr.f32.mxu1 %v7931_v0 }
  0xc6   :  { %4810 = vmatmul.mubr.msk.f32.gmra.mxu0 %vm113_vm0, %v5960_v27 }
  0xc7   :  { %4803 = vmatmul.mubr.msk.f32.gmra.mxu1 %vm113_vm0, %v6139_v13  ;;  %1796 = vmatprep.mubr.f32.mxu0 %v7931_v0 }
  0xc8   :  { %1689 = vmatprep.mubr.f32.mxu1 %v7931_v0 }
  0xca   :  { %4818 = vmatmul.mubr.msk.f32.vlgmr.msra.gmra.mxu0 %vm113_vm0, %v5744_v40 }
  0xcb   :  { %4811 = vmatmul.mubr.msk.f32.vlgmr.msra.gmra.mxu1 %vm113_vm0, %v5710_v32  ;;  %1802 = vmatprep.mubr.f32.mxu0 %v7931_v0 }
  0xcc   :  { %1878 = vmatpush1.msra.mxu1 %v5721_v35  ;;  %1695 = vmatprep.mubr.f32.mxu1 %v7931_v0 }
  0xcd   :  { %1879 = vmatprep.subr.mxu1 %v5726_v36  ;;  %2027 = vmatpush1.msra.mxu0 %v5755_v43 }
  0xce   :  { %4819 = vmatmul.mubr.msk.f32.gmra.mxu0 %vm113_vm0, %v5771_v46  ;;  %1880 = vmatpush1.msra.mxu1 %v5737_v39 }
  0xcf   :  { %4812 = vmatmul.mubr.msk.f32.gmra.mxu1 %vm113_vm0, %v5735_v38  ;;  %1808 = vmatprep.mubr.f32.mxu0 %v7931_v0 }
  0xd0   :  { %1701 = vmatprep.mubr.f32.mxu1 %v7931_v0  ;;  %1881 = vmatprep.subr.mxu1 %v5747_v41 }
  0xd1   :  { %1882 = vmatpush1.msra.mxu1 %v5753_v42  ;;  %2028 = vmatprep.subr.mxu0 %v5781_v48 }
  0xd2   :  { %4820 = vmatmul.mubr.msk.f32.gmra.mxu0 %vm113_vm0, %v5795_v50  ;;  %1883 = vmatprep.subr.mxu1 %v5765_v45 }
  0xd3   :  { %4813 = vmatmul.mubr.msk.f32.gmra.mxu1 %vm113_vm0, %v5763_v44  ;;  %1814 = vmatprep.mubr.f32.mxu0 %v7931_v0 }
  0xd4   :  { %1707 = vmatprep.mubr.f32.mxu1 %v7931_v0  ;;  %1884 = vmatpush1.msra.mxu1 %v5776_v47 }
  0xd5   :  { %2029 = vmatpush1.msra.mxu0 %v5799_v51  ;;  %2175 = vmatprep.subr.mxu1 %v5575_v1 }
  0xd6   :  { %4821 = vmatmul.mubr.msk.f32.gmra.mxu0 %vm113_vm0, %v5818_v54  ;;  %2030 = vmatprep.subr.mxu0 %v5804_v52 }
  0xd7   :  { %4814 = vmatmul.mubr.msk.f32.gmra.mxu1 %vm113_vm0, %v5789_v49  ;;  %1820 = vmatprep.mubr.f32.mxu0 %v7931_v0 }
  0xd8   :  { %1713 = vmatprep.mubr.f32.mxu1 %v7931_v0  ;;  %2031 = vmatpush1.msra.mxu0 %v5822_v55 }
  0xd9   :  { %2032 = vmatprep.subr.mxu0 %v5826_v56 }
  0xda   :  { %4822 = vmatmul.mubr.msk.f32.gmra.mxu0 %vm113_vm0, %v5840_v58 }
  0xdb   :  { %4815 = vmatmul.mubr.msk.f32.gmra.mxu1 %vm113_vm0, %v5812_v53  ;;  %1826 = vmatprep.mubr.f32.mxu0 %v7931_v0 }
  0xdc   :  { %1719 = vmatprep.mubr.f32.mxu1 %v7931_v0  ;;  %2033 = vmatpush1.msra.mxu0 %v5844_v59 }
  0xdd   :  { %2282 = vmatprep.subr.mxu0 %v5607_v10 }
  0xde   :  { %4823 = vmatmul.mubr.msk.f32.gmra.mxu0 %vm113_vm0, %v5860_v61 }
  0xdf   :  { %4816 = vmatmul.mubr.msk.f32.gmra.mxu1 %vm113_vm0, %v5834_v57  ;;  %1832 = vmatprep.mubr.f32.mxu0 %v7931_v0 }
  0xe0   :  { %1725 = vmatprep.mubr.f32.mxu1 %v7931_v0 }
  0xe2   :  { %4824 = vmatmul.mubr.msk.f32.gmra.mxu0 %vm113_vm0, %v5954_v25 }
  0xe3   :  { %4817 = vmatmul.mubr.msk.f32.gmra.mxu1 %vm113_vm0, %v5854_v60  ;;  %2066 = vmatprep.mubr.f32.mxu0 %v7931_v0 }
  0xe4   :  { %1917 = vmatprep.mubr.f32.mxu1 %v7931_v0 }
  0xe6   :  { %4839 = vmatmul.mubr.msk.f32.vlgmr.msra.gmra.mxu0 %vm113_vm0, %v5735_v38 }
  0xe7   :  { %4825 = vmatmul.mubr.msk.f32.vlgmr.msra.gmra.mxu1 %vm113_vm0, %v5647_v18  ;;  %2072 = vmatprep.mubr.f32.mxu0 %v7931_v0 }
  0xe8   :  { %2176 = vmatpush1.msra.mxu1 %v5577_v2  ;;  %1923 = vmatprep.mubr.f32.mxu1 %v7931_v0 }
  0xe9   :  { %2177 = vmatprep.subr.mxu1 %v5579_v3  ;;  %2283 = vmatpush1.msra.mxu0 %v7965_v12 }
  0xea   :  { %4840 = vmatmul.mubr.msk.f32.gmra.mxu0 %vm113_vm0, %v5763_v44  ;;  %2178 = vmatpush1.msra.mxu1 %v5582_v4  ;;  %v7971_v4 = vld [vmem:[#allocation12_spill] sm:$0xff] }
  0xeb   :  { %4826 = vmatmul.mubr.msk.f32.gmra.mxu1 %vm113_vm0, %v5675_v24  ;;  %2078 = vmatprep.mubr.f32.mxu0 %v7931_v0 }
  0xec   :  { %1929 = vmatprep.mubr.f32.mxu1 %v7931_v0  ;;  %2179 = vmatprep.subr.mxu1 %v5586_v5 }
  0xed   :  { %2180 = vmatpush1.msra.mxu1 %v5590_v6  ;;  %2284 = vmatprep.subr.mxu0 %v7966_v17 }
  0xee   :  { %4841 = vmatmul.mubr.msk.f32.gmra.mxu0 %vm113_vm0, %v5789_v49  ;;  %2181 = vmatprep.subr.mxu1 %v5594_v7 }
  0xef   :  { %v6227_v1 = vpop.f32.mrf.mxu1  ;;  %4827 = vmatmul.mubr.msk.f32.gmra.mxu1 %vm113_vm0, %v5605_v9  ;;  %2084 = vmatprep.mubr.f32.mxu0 %v7931_v0 }
  0xf0   :  { %1935 = vmatprep.mubr.f32.mxu1 %v7931_v0  ;;  %2182 = vmatpush1.msra.mxu1 %v5598_v8 }
  0xf1   :  { %v6234_v2 = vpop.f32.mrf.mxu1  ;;  %v201_v3 = vpop.f32.mrf.mxu0  ;;  %2285 = vmatpush1.msra.mxu0 %v5626_v14  ;;  %2389 = vmatprep.subr.mxu1 %v7971_v4  ;;  %v7973_v4 = vld [vmem:[#allocation17_spill] sm:$0xff] }
  0xf2   :  { %4842 = vmatmul.mubr.msk.f32.gmra.mxu0 %vm113_vm0, %v5812_v53  ;;  %2286 = vmatprep.subr.mxu0 %v7967_v62 }
  0xf3   :  { %v6241_v5 = vpop.f32.mrf.mxu1  ;;  %4828 = vmatmul.mubr.msk.f32.gmra.mxu1 %vm113_vm0, %v5633_v15  ;;  %v203_v6 = vpop.f32.mrf.mxu0  ;;  %2090 = vmatprep.mubr.f32.mxu0 %v7931_v0 }
  0xf4   :  { %1941 = vmatprep.mubr.f32.mxu1 %v7931_v0  ;;  %2287 = vmatpush1.msra.mxu0 %v5649_v19  ;;  %v6273_v19 = vld [vmem:[%s7899_s0 + $0xb8] sm:$0xff] }
  0xf5   :  { %v6248_v7 = vpop.f32.mrf.mxu1  ;;  %v207_v8 = vpop.f32.mrf.mxu0  ;;  %2288 = vmatprep.subr.mxu0 %v7968_v20  ;;  %7972 = vst [vmem:[#allocation10_spill] sm:$0xff] %v6273_v19 }
  0xf6   :  { %4843 = vmatmul.mubr.msk.f32.gmra.mxu0 %vm113_vm0, %v5834_v57 }
  0xf7   :  { %v6253_v9 = vpop.f32.mrf.mxu1  ;;  %4829 = vmatmul.mubr.msk.f32.gmra.mxu1 %vm113_vm0, %v5660_v21  ;;  %v209_v10 = vpop.f32.mrf.mxu0  ;;  %2096 = vmatprep.mubr.f32.mxu0 %v7931_v0 }
  0xf8   :  { %1947 = vmatprep.mubr.f32.mxu1 %v7931_v0  ;;  %2289 = vmatpush1.msra.mxu0 %v7969_v63 }
  0xf9   :  { %v6260_v14 = vpop.f32.mrf.mxu1  ;;  %v213_v15 = vpop.f32.mrf.mxu0  ;;  %2510 = vmatprep.subr.mxu0 %v5712_v33 }
  0xfa   :  { %4844 = vmatmul.mubr.msk.f32.gmra.mxu0 %vm113_vm0, %v5854_v60 }
  0xfb   :  { %v6265_v17 = vpop.f32.mrf.mxu1  ;;  %4830 = vmatmul.mubr.msk.f32.gmra.mxu1 %vm113_vm0, %v5691_v28  ;;  %v215_v18 = vpop.f32.mrf.mxu0  ;;  %2102 = vmatprep.mubr.f32.mxu0 %v7931_v0 }
  0xfc   :  { %1953 = vmatprep.mubr.f32.mxu1 %v7931_v0 }
  0xfd   :  { %v6276_v20 = vpop.f32.mrf.mxu1 }
  0xfe   :  { %v474_v21 = vpop.f32.mrf.mxu0  ;;  %4845 = vmatmul.mubr.msk.f32.gmra.mxu0 %vm113_vm0, %v6273_v19 }
  0xff   :  { %v329_v24 = vpop.f32.mrf.mxu1  ;;  %4831 = vmatmul.mubr.msk.f32.gmra.mxu1 %vm113_vm0, %v6139_v13  ;;  %2322 = vmatprep.mubr.f32.mxu0 %v7931_v0 }
 0x100   :  { %v330_v28 = vadd.f32 %v329_v24, %v201_v3  ;;  %v476_v32 = vpop.f32.mrf.mxu0  ;;  %2215 = vmatprep.mubr.f32.mxu1 %v7931_v0  ;;  %v7974_v24 = vld [vmem:[#allocation13_spill] sm:$0xff] }
 0x101   :  { %v331_v33 = vpop.f32.mrf.mxu1 }
 0x102   :  { %v6284_v62 = vadd.f32 %v474_v21, %v330_v28  ;;  %v332_v63 = vadd.f32 %v331_v33, %v203_v6  ;;  %v480_v12 = vpop.f32.mrf.mxu0  ;;  %4853 = vmatmul.mubr.msk.f32.vlgmr.msra.gmra.mxu0 %vm113_vm0, %v7973_v4 }
 0x103   :  { %v335_v60 = vpop.f32.mrf.mxu1  ;;  %4846 = vmatmul.mubr.msk.f32.vlgmr.msra.gmra.mxu1 %vm113_vm0, %v5744_v40  ;;  %2328 = vmatprep.mubr.f32.mxu0 %v7931_v0  ;;  %v7975_v40 = vld [vmem:[#allocation18_spill] sm:$0xff] }
 0x104   :  { %v6291_v13 = vadd.f32 %v476_v32, %v332_v63  ;;  %v336_v3 = vadd.f32 %v335_v60, %v207_v8  ;;  %2390 = vmatpush1.msra.mxu1 %v7974_v24  ;;  %v482_v19 = vpop.f32.mrf.mxu0  ;;  %2221 = vmatprep.mubr.f32.mxu1 %v7931_v0 }
 0x105   :  { %v337_v21 = vpop.f32.mrf.mxu1  ;;  %2391 = vmatprep.subr.mxu1 %v5663_v22  ;;  %2511 = vmatpush1.msra.mxu0 %v5721_v35 }
 0x106   :  { %v6297_v6 = vadd.f32 %v480_v12, %v336_v3  ;;  %v338_v28 = vadd.f32 %v337_v21, %v209_v10  ;;  %v486_v33 = vpop.f32.mrf.mxu0  ;;  %4854 = vmatmul.mubr.msk.f32.gmra.mxu0 %vm113_vm0, %v7975_v40  ;;  %2392 = vmatpush1.msra.mxu1 %v5668_v23 }
 0x107   :  { %v341_v60 = vpop.f32.mrf.mxu1  ;;  %4847 = vmatmul.mubr.msk.f32.gmra.mxu1 %vm113_vm0, %v5771_v46  ;;  %2334 = vmatprep.mubr.f32.mxu0 %v7931_v0 }
 0x108   :  { %v6305_v8 = vadd.f32 %v482_v19, %v338_v28  ;;  %v342_v22 = vadd.f32 %v341_v60, %v213_v15  ;;  %v488_v32 = vpop.f32.mrf.mxu0  ;;  %2227 = vmatprep.mubr.f32.mxu1 %v7931_v0  ;;  %2393 = vmatprep.subr.mxu1 %v5682_v26  ;;  %v7976_v19 = vld [vmem:[#allocation19_spill] sm:$0xff] }
 0x109   :  { %v343_v35 = vpop.f32.mrf.mxu1  ;;  %2394 = vmatpush1.msra.mxu1 %v5693_v29  ;;  %2512 = vmatprep.subr.mxu0 %v5726_v36 }
 0x10a   :  { %v6311_v23 = vadd.f32 %v486_v33, %v342_v22  ;;  %v344_v10 = vadd.f32 %v343_v35, %v215_v18  ;;  %v492_v63 = vpop.f32.mrf.mxu0  ;;  %4855 = vmatmul.mubr.msk.f32.gmra.mxu0 %vm113_vm0, %v5899_v34  ;;  %2395 = vmatprep.subr.mxu1 %v5698_v30 }
 0x10b   :  { %v347_v46 = vpop.f32.mrf.mxu1  ;;  %4848 = vmatmul.mubr.msk.f32.gmra.mxu1 %vm113_vm0, %v5795_v50  ;;  %2340 = vmatprep.mubr.f32.mxu0 %v7931_v0 }
 0x10c   :  { %v6319_v26 = vadd.f32 %v488_v32, %v344_v10  ;;  %v348_v29 = vadd.f32 %v347_v46, %v6227_v1  ;;  %v494_v36 = vpop.f32.mrf.mxu0  ;;  %2233 = vmatprep.mubr.f32.mxu1 %v7931_v0  ;;  %2396 = vmatpush1.msra.mxu1 %v5702_v31 }
 0x10d   :  { %v349_v15 = vpop.f32.mrf.mxu1  ;;  %2513 = vmatpush1.msra.mxu0 %v5737_v39  ;;  %2659 = vmatprep.subr.mxu1 %v5728_v37 }
 0x10e   :  { %v6326_v30 = vadd.f32 %v492_v63, %v348_v29  ;;  %v350_v50 = vadd.f32 %v349_v15, %v6234_v2  ;;  %v498_v34 = vpop.f32.mrf.mxu0  ;;  %4856 = vmatmul.mubr.msk.f32.gmra.mxu0 %vm113_vm0, %v5914_v11  ;;  %2514 = vmatprep.subr.mxu0 %v5747_v41  ;;  %v847_v2 = vlaneseq }
 0x10f   :  { %v353_v1 = vpop.f32.mrf.mxu1  ;;  %4849 = vmatmul.mubr.msk.f32.gmra.mxu1 %vm113_vm0, %v5818_v54  ;;  %2346 = vmatprep.mubr.f32.mxu0 %v7931_v0 }
 0x110   :  { %v6335_v31 = vadd.f32 %v494_v36, %v350_v50  ;;  %v354_v37 = vadd.f32 %v353_v1, %v6241_v5  ;;  %v500_v39 = vpop.f32.mrf.mxu0  ;;  %2239 = vmatprep.mubr.f32.mxu1 %v7931_v0  ;;  %2515 = vmatpush1.msra.mxu0 %v5753_v42  ;;  %v5336_v36 = vld [vmem:[%s7899_s0 + $0x48] sm:$0xff] }
 0x111   :  { %v355_v18 = vpop.f32.mrf.mxu1  ;;  %2516 = vmatprep.subr.mxu0 %v5765_v45  ;;  %v6353_v45 = vshrl.u32 %v847_v2, 7 }
 0x112   :  { %v6341_v11 = vadd.f32 %v498_v34, %v354_v37  ;;  %v356_v41 = vadd.f32 %v355_v18, %v6248_v7  ;;  %v504_v54 = vpop.f32.mrf.mxu0  ;;  %4857 = vmatmul.mubr.msk.f32.gmra.mxu0 %vm113_vm0, %v7976_v19 }
 0x113   :  { %v359_v12 = vpop.f32.mrf.mxu1  ;;  %4850 = vmatmul.mubr.msk.f32.gmra.mxu1 %vm113_vm0, %v5840_v58  ;;  %2352 = vmatprep.mubr.f32.mxu0 %v7931_v0  ;;  %7977 = vst [vmem:[#allocation11_spill] sm:$0xff] %v6353_v45  ;;  %v7930_v33 = vsub.s32 0, %v6353_v45 }
 0x114   :  { %v6349_v5 = vadd.f32 %v500_v39, %v356_v41  ;;  %v360_v42 = vadd.f32 %v359_v12, %v6253_v9  ;;  %v506_v4 = vpop.f32.mrf.mxu0  ;;  %2245 = vmatprep.mubr.f32.mxu1 %v7931_v0  ;;  %2517 = vmatpush1.msra.mxu0 %v5776_v47 }
 0x115   :  { %v361_v7 = vpop.f32.mrf.mxu1 }
 0x116   :  { %v6356_v3 = vadd.f32 %v504_v54, %v360_v42  ;;  %v362_v24 = vadd.f32 %v361_v7, %v6260_v14  ;;  %v510_v21 = vpop.f32.mrf.mxu0  ;;  %4858 = vmatmul.mubr.msk.f32.gmra.mxu0 %vm113_vm0, %v5942_v16  ;;  %v79_v16 = vld [vmem:[%s7901_s2] sm:$0x3] }
 0x117   :  { %v365_v58 = vpop.f32.mrf.mxu1  ;;  %4851 = vmatmul.mubr.msk.f32.gmra.mxu1 %vm113_vm0, %v5860_v61  ;;  %2358 = vmatprep.mubr.f32.mxu0 %v7931_v0  ;;  %v6386_v10 = vrot.slane %v79_v16, %v7930_v33  ;;  %v2889_v33 = vld [vmem:[#allocation4 + $0x1f0] sm:$0xff] }
 0x118   :  { %v6364_v9 = vadd.f32 %v506_v4, %v362_v24  ;;  %v366_v28 = vadd.f32 %v365_v58, %v6265_v17  ;;  %v512_v47 = vpop.f32.mrf.mxu0  ;;  %2251 = vmatprep.mubr.f32.mxu1 %v7931_v0  ;;  %v7929_v17 = vsub.s32 1, %v6353_v45  ;;  %v2888_v45 = vld [vmem:[#allocation4 + $0x1e8] sm:$0xff] }
 0x119   :  { %v367_v14 = vpop.f32.mrf.mxu1 }
 0x11a   :  { %v6372_v40 = vadd.f32 %v510_v21, %v366_v28  ;;  %v368_v61 = vadd.f32 %v367_v14, %v6276_v20  ;;  %v791_v60 = vpop.f32.mrf.mxu0  ;;  %4859 = vmatmul.mubr.msk.f32.gmra.mxu0 %vm113_vm0, %v5960_v27 }
 0x11b   :  { %v633_v22 = vpop.f32.mrf.mxu1  ;;  %4852 = vmatmul.mubr.msk.f32.gmra.mxu1 %vm113_vm0, %v5954_v25  ;;  %2550 = vmatprep.mubr.f32.mxu0 %v7931_v0  ;;  %v6392_v25 = vrot.slane %v79_v16, %v7929_v17 }
 0x11c   :  { %v6381_v32 = vadd.f32 %v512_v47, %v368_v61  ;;  %v674_v35 = vadd.f32 %v633_v22, %v6284_v62  ;;  %v793_v20 = vpop.f32.mrf.mxu0  ;;  %2429 = vmatprep.mubr.f32.mxu1 %v7931_v0 }
 0x11d   :  { %v635_v27 = vpop.f32.mrf.mxu1 }
 0x11e   :  { %v832_v63 = vadd.f32 %v791_v60, %v674_v35  ;;  %v675_v46 = vadd.f32 %v635_v27, %v6291_v13  ;;  %v797_v29 = vpop.f32.mrf.mxu0  ;;  %4867 = vmatmul.mubr.msk.f32.vlgmr.msra.gmra.mxu0 %vm113_vm0, %v5735_v38 }
 0x11f   :  { %v639_v62 = vpop.f32.mrf.mxu1  ;;  %4860 = vmatmul.mubr.msk.f32.vlgmr.msra.gmra.mxu1 %vm113_vm0, %v5336_v36  ;;  %2556 = vmatprep.mubr.f32.mxu0 %v7931_v0 }
 0x120   :  { %v857_v15 = vadd.f32 %v6386_v10, %v832_v63  ;;  %v833_v13 = vadd.f32 %v793_v20, %v675_v46  ;;  %v676_v50 = vadd.f32 %v639_v62, %v6297_v6  ;;  %2660 = vmatpush1.msra.mxu1 %v5755_v43  ;;  %v799_v34 = vpop.f32.mrf.mxu0  ;;  %2435 = vmatprep.mubr.f32.mxu1 %v7931_v0  ;;  %v5337_v43 = vld [vmem:[%s7899_s0 + $0x50] sm:$0xff] }
 0x121   :  { %v641_v38 = vpop.f32.mrf.mxu1  ;;  %2661 = vmatprep.subr.mxu1 %v5781_v48 }
 0x122   :  { %v858_v1 = vadd.f32 %v6392_v25, %v833_v13  ;;  %v834_v37 = vadd.f32 %v797_v29, %v676_v50  ;;  %v677_v39 = vadd.f32 %v641_v38, %v6305_v8  ;;  %v803_v2 = vpop.f32.mrf.mxu0  ;;  %4868 = vmatmul.mubr.msk.f32.gmra.mxu0 %vm113_vm0, %v5763_v44  ;;  %2662 = vmatpush1.msra.mxu1 %v5799_v51  ;;  %v871_v6 = vmax.f32 %v857_v15, 0.0 }
 0x123   :  { %v645_v18 = vpop.f32.mrf.mxu1  ;;  %4861 = vmatmul.mubr.msk.f32.gmra.mxu1 %vm113_vm0, %v5337_v43  ;;  %2562 = vmatprep.mubr.f32.mxu0 %v7931_v0  ;;  %v7980_v43 = vld [vmem:[#allocation16_spill] sm:$0xff] }
 0x124   :  { %v872_v48 = vmax.f32 %v858_v1, 0.0  ;;  %v859_v41 = vadd.f32 %v6386_v10, %v834_v37  ;;  %v835_v8 = vadd.f32 %v799_v34, %v677_v39  ;;  %v678_v54 = vadd.f32 %v645_v18, %v6311_v23  ;;  %v805_v19 = vpop.f32.mrf.mxu0  ;;  %2441 = vmatprep.mubr.f32.mxu1 %v7931_v0  ;;  %2663 = vmatprep.subr.mxu1 %v5804_v52  ;;  %v2857_v23 = vld [vmem:[#allocation4 + $0xf8] sm:$0xff] }
 0x125   :  { %v647_v44 = vpop.f32.mrf.mxu1  ;;  %2664 = vmatpush1.msra.mxu1 %v5822_v55  ;;  %v5338_v52 = vld [vmem:[%s7899_s0 + $0x58] sm:$0xff] }
 0x126   :  { %v6421_v51 = vmax.f32 %v871_v6, %v872_v48  ;;  %v860_v12 = vadd.f32 %v6392_v25, %v835_v8  ;;  %v836_v42 = vadd.f32 %v803_v2, %v678_v54  ;;  %v809_v4 = vpop.f32.mrf.mxu0  ;;  %4869 = vmatmul.mubr.msk.f32.gmra.mxu0 %vm113_vm0, %v5789_v49  ;;  %2665 = vmatprep.subr.mxu1 %v5826_v56  ;;  %v873_v55 = vmax.f32 %v859_v41, 0.0 }
 0x127   :  { %v679_v7 = vadd.f32 %v647_v44, %v6319_v26  ;;  %v651_v24 = vpop.f32.mrf.mxu1  ;;  %4862 = vmatmul.mubr.msk.f32.gmra.mxu1 %vm113_vm0, %v5338_v52  ;;  %2568 = vmatprep.mubr.f32.mxu0 %v7931_v0  ;;  %v7982_v52 = vld [vmem:[#allocation10_spill] sm:$0xff] }
 0x128   :  { %v874_v21 = vmax.f32 %v860_v12, 0.0  ;;  %v680_v58 = vadd.f32 %v651_v24, %v6326_v30  ;;  %v811_v28 = vpop.f32.mrf.mxu0  ;;  %2447 = vmatprep.mubr.f32.mxu1 %v7931_v0  ;;  %2666 = vmatpush1.msra.mxu1 %v5844_v59  ;;  %v861_v49 = vadd.f32 %v6386_v10, %v836_v42  ;;  %v5339_v59 = vld [vmem:[%s7899_s0 + $0x60] sm:$0xff] }
 0x129   :  { %v837_v56 = vadd.f32 %v805_v19, %v679_v7  ;;  %v653_v26 = vpop.f32.mrf.mxu1  ;;  %2986 = vmatprep.subr.mxu1 %v2857_v23 }
 0x12a   :  { %v6437_v47 = vmax.f32 %v873_v55, %v874_v21  ;;  %v838_v14 = vadd.f32 %v809_v4, %v680_v58  ;;  %v681_v16 = vadd.f32 %v653_v26, %v6335_v31  ;;  %v815_v61 = vpop.f32.mrf.mxu0  ;;  %4870 = vmatmul.mubr.msk.f32.gmra.mxu0 %vm113_vm0, %v5812_v53  ;;  %v875_v53 = vmax.f32 %v861_v49, 0.0  ;;  %v7983_v21 = vld [vmem:[#allocation9_spill] sm:$0xff] }
 0x12b   :  { %v862_v30 = vadd.f32 %v6392_v25, %v837_v56  ;;  %v657_v60 = vpop.f32.mrf.mxu1  ;;  %4863 = vmatmul.mubr.msk.f32.gmra.mxu1 %vm113_vm0, %v5339_v59  ;;  %2574 = vmatprep.mubr.f32.mxu0 %v7931_v0 }
 0x12c   :  { %v863_v22 = vadd.f32 %v6386_v10, %v838_v14  ;;  %v839_v35 = vadd.f32 %v811_v28, %v681_v16  ;;  %v682_v31 = vadd.f32 %v657_v60, %v6341_v11  ;;  %v817_v20 = vpop.f32.mrf.mxu0  ;;  %2453 = vmatprep.mubr.f32.mxu1 %v7931_v0  ;;  %v5340_v11 = vld [vmem:[%s7899_s0 + $0x68] sm:$0xff]  ;;  %v2856_v16 = vld [vmem:[#allocation4 + $0xf0] sm:$0xff] }
 0x12d   :  { %v876_v27 = vmax.f32 %v862_v30, 0.0  ;;  %v659_v63 = vpop.f32.mrf.mxu1  ;;  %v2855_v60 = vld [vmem:[#allocation4 + $0xe8] sm:$0xff] }
 0x12e   :  { %v864_v46 = vadd.f32 %v6392_v25, %v839_v35  ;;  %v840_v29 = vadd.f32 %v815_v61, %v682_v31  ;;  %v683_v62 = vadd.f32 %v659_v63, %v6349_v5  ;;  %v821_v36 = vpop.f32.mrf.mxu0  ;;  %4871 = vmatmul.mubr.msk.f32.gmra.mxu0 %vm113_vm0, %v5834_v57  ;;  %v877_v13 = vmax.f32 %v863_v22, 0.0  ;;  %v2854_v35 = vld [vmem:[#allocation4 + $0xe0] sm:$0xff]  ;;  %v2853_v63 = vld [vmem:[#allocation4 + $0xd8] sm:$0xff] }
 0x12f   :  { %v6455_v15 = vmax.f32 %v875_v53, %v876_v27  ;;  %v663_v50 = vpop.f32.mrf.mxu1  ;;  %4864 = vmatmul.mubr.msk.f32.gmra.mxu1 %vm113_vm0, %v5340_v11  ;;  %2580 = vmatprep.mubr.f32.mxu0 %v7931_v0  ;;  %v4875_v27 = vld [vmem:[%s7899_s0 + $0xd0] sm:$0xff]  ;;  %v2850_v11 = vld [vmem:[#allocation4 + $0xc0] sm:$0xff] }
 0x130   :  { %v878_v34 = vmax.f32 %v864_v46, 0.0  ;;  %v865_v38 = vadd.f32 %v6386_v10, %v840_v29  ;;  %v841_v5 = vadd.f32 %v817_v20, %v683_v62  ;;  %v684_v1 = vadd.f32 %v663_v50, %v6356_v3  ;;  %v823_v37 = vpop.f32.mrf.mxu0  ;;  %2459 = vmatprep.mubr.f32.mxu1 %v7931_v0  ;;  %v5341_v3 = vld [vmem:[%s7899_s0 + $0x70] sm:$0xff] }
 0x131   :  { %7978 = vst [vmem:[#allocation14_spill] sm:$0xff] %v6455_v15  ;;  %v665_v57 = vpop.f32.mrf.mxu1  ;;  %v2852_v29 = vld [vmem:[#allocation4 + $0xd0] sm:$0xff] }
 0x132   :  { %v6465_v39 = vmax.f32 %v877_v13, %v878_v34  ;;  %v866_v2 = vadd.f32 %v6392_v25, %v841_v5  ;;  %v842_v6 = vadd.f32 %v821_v36, %v684_v1  ;;  %v827_v18 = vpop.f32.mrf.mxu0  ;;  %4872 = vmatmul.mubr.msk.f32.gmra.mxu0 %vm113_vm0, %v7980_v43  ;;  %v685_v48 = vadd.f32 %v665_v57, %v6364_v9  ;;  %v2851_v13 = vld [vmem:[#allocation4 + $0xc8] sm:$0xff]  ;;  %v2849_v5 = vld [vmem:[#allocation4 + $0xb8] sm:$0xff] }
 0x133   :  { %v669_v41 = vpop.f32.mrf.mxu1  ;;  %4865 = vmatmul.mubr.msk.f32.gmra.mxu1 %vm113_vm0, %v5341_v3  ;;  %2586 = vmatprep.mubr.f32.mxu0 %v7931_v0  ;;  %v879_v8 = vmax.f32 %v865_v38, 0.0  ;;  %v4876_v38 = vld [vmem:[%s7899_s0 + $0xd8] sm:$0xff] }
 0x134   :  { %7979 = vst [vmem:[#allocation15_spill] sm:$0xff] %v6465_v39  ;;  %v880_v54 = vmax.f32 %v866_v2, 0.0  ;;  %v686_v19 = vadd.f32 %v669_v41, %v6372_v40  ;;  %v829_v44 = vpop.f32.mrf.mxu0  ;;  %2465 = vmatprep.mubr.f32.mxu1 %v7931_v0  ;;  %v867_v12 = vadd.f32 %v6386_v10, %v842_v6  ;;  %v843_v42 = vadd.f32 %v823_v37, %v685_v48  ;;  %v2848_v37 = vld [vmem:[#allocation4 + $0xb0] sm:$0xff]  ;;  %v2847_v2 = vld [vmem:[#allocation4 + $0xa8] sm:$0xff]  ;;  %v4877_v48 = vld [vmem:[%s7899_s0 + $0xe0] sm:$0xff] }
 0x135   :  { %v671_v9 = vpop.f32.mrf.mxu1  ;;  %v2845_v41 = vld [vmem:[#allocation4 + $0x98] sm:$0xff] }
 0x136   :  { %v6479_v4 = vmax.f32 %v879_v8, %v880_v54  ;;  %v844_v23 = vadd.f32 %v827_v18, %v686_v19  ;;  %v687_v7 = vadd.f32 %v671_v9, %v6381_v32  ;;  %v6482_v24 = vpop.f32.mrf.mxu0  ;;  %4873 = vmatmul.mubr.msk.f32.gmra.mxu0 %vm113_vm0, %v7982_v52  ;;  %v868_v55 = vadd.f32 %v6392_v25, %v843_v42  ;;  %v4874_v32 = vld [vmem:[%s7899_s0 + $0xc8] sm:$0xff]  ;;  %v2846_v18 = vld [vmem:[#allocation4 + $0xa0] sm:$0xff]  ;;  %v2844_v8 = vld [vmem:[#allocation4 + $0x90] sm:$0xff] }
 0x137   :  { %v6487_v40 = vpop.f32.mrf.mxu1  ;;  %4866 = vmatmul.mubr.msk.f32.gmra.mxu1 %vm113_vm0, %v7983_v21  ;;  %2955 = vmatprep.mubr.f32.mxu0 %v7931_v0  ;;  %v881_v56 = vmax.f32 %v867_v12, 0.0  ;;  %v2843_v19 = vld [vmem:[#allocation4 + $0x88] sm:$0xff]  ;;  %v2842_v12 = vld [vmem:[#allocation4 + $0x80] sm:$0xff]  ;;  %v2840_v52 = vld [vmem:[#allocation4 + $0x70] sm:$0xff] }
 0x138   :  { %7981 = vst [vmem:[#allocation12_spill] sm:$0xff] %v6479_v4  ;;  %v869_v58 = vadd.f32 %v6386_v10, %v844_v23  ;;  %v845_v28 = vadd.f32 %v829_v44, %v687_v7  ;;  %v6493_v49 = vpop.f32.mrf.mxu0  ;;  %2699 = vmatprep.mubr.f32.mxu1 %v7931_v0  ;;  %v882_v26 = vmax.f32 %v868_v55, 0.0  ;;  %v4878_v9 = vld [vmem:[%s7899_s0 + $0xe8] sm:$0xff]  ;;  %v2841_v23 = vld [vmem:[#allocation4 + $0x78] sm:$0xff] }
 0x139   :  { %v6499_v14 = vpop.f32.mrf.mxu1  ;;  %v2839_v21 = vld [vmem:[#allocation4 + $0x68] sm:$0xff] }
 0x13a   :  { %v870_v61 = vadd.f32 %v6392_v25, %v845_v28  ;;  %v6502_v30 = vpop.f32.mrf.mxu0  ;;  %v6504_v59 = vmax.f32 %v881_v56, %v882_v26  ;;  %v883_v31 = vmax.f32 %v869_v58, 0.0  ;;  %v2838_v28 = vld [vmem:[#allocation4 + $0x60] sm:$0xff]  ;;  %v4879_v26 = vld [vmem:[%s7899_s0 + $0xf0] sm:$0xff] }
 0x13b   :  { %v6506_v22 = vpop.f32.mrf.mxu1  ;;  %4881 = vmatmul.mubr.msk.f32.vlgmr.msra.gmra.mxu1 %vm113_vm0, %v4874_v32 }
 0x13c   :  { %7984 = vst [vmem:[#allocation17_spill] sm:$0xff] %v6504_v59  ;;  %v884_v20 = vmax.f32 %v870_v61, 0.0  ;;  %v6509_v53 = vpop.f32.mrf.mxu0  ;;  %2705 = vmatprep.mubr.f32.mxu1 %v7931_v0  ;;  %2987 = vmatpush1.msra.mxu1 %v2856_v16  ;;  %v2837_v16 = vld [vmem:[#allocation4 + $0x58] sm:$0xff] }
 0x13d   :  { %v6515_v46 = vpop.f32.mrf.mxu1  ;;  %2988 = vmatprep.subr.mxu1 %v2855_v60  ;;  %v2836_v60 = vld [vmem:[#allocation4 + $0x50] sm:$0xff] }
 0x13e   :  { %v6517_v62 = vmax.f32 %v883_v31, %v884_v20  ;;  %v6519_v36 = vpop.f32.mrf.mxu0  ;;  %2989 = vmatpush1.msra.mxu1 %v2854_v35  ;;  %v2835_v31 = vld [vmem:[#allocation4 + $0x48] sm:$0xff] }
 0x13f   :  { %v6521_v50 = vpop.f32.mrf.mxu1  ;;  %4882 = vmatmul.mubr.msk.f32.gmra.mxu1 %vm113_vm0, %v4875_v27  ;;  %2990 = vmatprep.subr.mxu1 %v2853_v63  ;;  %v2834_v27 = vld [vmem:[#allocation4 + $0x40] sm:$0xff] }
 0x140   :  { %7985 = vst [vmem:[#allocation13_spill] sm:$0xff] %v6517_v62  ;;  %v6524_v34 = vpop.f32.mrf.mxu0  ;;  %2711 = vmatprep.mubr.f32.mxu1 %v7931_v0  ;;  %2991 = vmatpush1.msra.mxu1 %v2852_v29  ;;  %v1061_v62 = vadd.f32 %v6493_v49, %v6499_v14  ;;  %v2885_v49 = vld [vmem:[#allocation4 + $0x1d0] sm:$0xff] }
 0x141   :  { %v6530_v1 = vpop.f32.mrf.mxu1  ;;  %2992 = vmatprep.subr.mxu1 %v2851_v13  ;;  %v4880_v13 = vld [vmem:[%s7899_s0 + $0xf8] sm:$0xff] }
 0x142   :  { %v6532_v57 = vpop.f32.mrf.mxu0  ;;  %2993 = vmatpush1.msra.mxu1 %v2850_v11  ;;  %v2833_v11 = vld [vmem:[#allocation4 + $0x38] sm:$0xff] }
 0x143   :  { %v6534_v6 = vpop.f32.mrf.mxu1  ;;  %4883 = vmatmul.mubr.msk.f32.gmra.mxu1 %vm113_vm0, %v4876_v38  ;;  %2994 = vmatprep.subr.mxu1 %v2849_v5  ;;  %v2832_v5 = vld [vmem:[#allocation4 + $0x30] sm:$0xff] }
 0x144   :  { %v6537_v43 = vpop.f32.mrf.mxu0  ;;  %2717 = vmatprep.mubr.f32.mxu1 %v7931_v0  ;;  %2995 = vmatpush1.msra.mxu1 %v2848_v37 }
 0x145   :  { %v6543_v3 = vpop.f32.mrf.mxu1  ;;  %2996 = vmatprep.subr.mxu1 %v2847_v2  ;;  %v2831_v2 = vld [vmem:[#allocation4 + $0x28] sm:$0xff] }
 0x146   :  { %v6545_v54 = vpop.f32.mrf.mxu0  ;;  %2997 = vmatpush1.msra.mxu1 %v2846_v18 }
 0x147   :  { %v6547_v44 = vpop.f32.mrf.mxu1  ;;  %4884 = vmatmul.mubr.msk.f32.gmra.mxu1 %vm113_vm0, %v4877_v48  ;;  %2998 = vmatprep.subr.mxu1 %v2845_v41  ;;  %v2830_v48 = vld [vmem:[#allocation4 + $0x20] sm:$0xff] }
 0x148   :  { %v6550_v42 = vpop.f32.mrf.mxu0  ;;  %2723 = vmatprep.mubr.f32.mxu1 %v7931_v0  ;;  %2999 = vmatpush1.msra.mxu1 %v2844_v8  ;;  %v2829_v8 = vld [vmem:[#allocation4 + $0x18] sm:$0xff] }
 0x149   :  { %v6556_v7 = vpop.f32.mrf.mxu1  ;;  %3000 = vmatprep.subr.mxu1 %v2843_v19 }
 0x14a   :  { %v1088_v55 = vpop.f32.mrf.mxu0  ;;  %3001 = vmatpush1.msra.mxu1 %v2842_v12  ;;  %v2828_v12 = vld [vmem:[#allocation4 + $0x10] sm:$0xff] }
 0x14b   :  { %v981_v58 = vpop.f32.mrf.mxu1  ;;  %4885 = vmatmul.mubr.msk.f32.gmra.mxu1 %vm113_vm0, %v4878_v9  ;;  %3002 = vmatprep.subr.mxu1 %v2841_v23  ;;  %v2827_v23 = vld [vmem:[#allocation4 + $0x8] sm:$0xff] }
 0x14c   :  { %v6559_v32 = vadd.f32 %v1088_v55, %v981_v58  ;;  %v6561_v56 = vpop.f32.mrf.mxu0  ;;  %2729 = vmatprep.mubr.f32.mxu1 %v7931_v0  ;;  %3003 = vmatpush1.msra.mxu1 %v2840_v52  ;;  %v2826_v55 = vld [vmem:[#allocation4] sm:$0xff] }
 0x14d   :  { %v6567_v61 = vpop.f32.mrf.mxu1  ;;  %3004 = vmatprep.subr.mxu1 %v2839_v21 }
 0x14e   :  { %v1094_v35 = vpop.f32.mrf.mxu0  ;;  %3005 = vmatpush1.msra.mxu1 %v2838_v28 }
 0x14f   :  { %v987_v20 = vpop.f32.mrf.mxu1  ;;  %4886 = vmatmul.mubr.msk.f32.gmra.mxu1 %vm113_vm0, %v4879_v26  ;;  %3006 = vmatprep.subr.mxu1 %v2837_v16 }
 0x150   :  { %v6570_v63 = vadd.f32 %v1094_v35, %v987_v20  ;;  %v6572_v29 = vpop.f32.mrf.mxu0  ;;  %2735 = vmatprep.mubr.f32.mxu1 %v7931_v0  ;;  %3007 = vmatpush1.msra.mxu1 %v2836_v60 }
 0x151   :  { %v6578_v38 = vpop.f32.mrf.mxu1  ;;  %3008 = vmatprep.subr.mxu1 %v2835_v31 }
 0x152   :  { %v6580_v37 = vpop.f32.mrf.mxu0  ;;  %3009 = vmatpush1.msra.mxu1 %v2834_v27 }
 0x153   :  { %v1165_v18 = vpop.f32.mrf.mxu1  ;;  %4887 = vmatmul.mubr.msk.f32.gmra.mxu1 %vm113_vm0, %v4880_v13  ;;  %3010 = vmatprep.subr.mxu1 %v2833_v11 }
 0x154   :  { %v6583_v41 = vpop.f32.mrf.mxu0  ;;  %3011 = vmatpush1.msra.mxu1 %v2832_v5  ;;  %3050 = vmatprep.mubr.f32.mxu1 %v7931_v0 }
 0x155   :  { %v1167_v19 = vpop.f32.mrf.mxu1  ;;  %3012 = vmatprep.subr.mxu1 %v2831_v2 }
 0x156   :  { %v6586_v9 = vpop.f32.mrf.mxu0  ;;  %3013 = vmatpush1.msra.mxu1 %v2830_v48 }
 0x157   :  { %v1171_v52 = vpop.f32.mrf.mxu1  ;;  %3014 = vmatprep.subr.mxu1 %v2829_v8 }
 0x158   :  { %v6588_v21 = vpop.f32.mrf.mxu0  ;;  %3015 = vmatpush1.msra.mxu1 %v2828_v12  ;;  %v6612_v12 = vld [vmem:[#allocation4 + $0x1f8] sm:$0xff] }
 0x159   :  { %v1173_v58 = vpop.f32.mrf.mxu1  ;;  %3016 = vmatprep.subr.mxu1 %v2827_v23  ;;  %7986 = vst [vmem:[#allocation18_spill] sm:$0xff] %v6612_v12  ;;  %v1059_v23 = vadd.f32 %v6482_v24, %v6487_v40  ;;  %2891 = vmatprep.subr.mxu0 %v6612_v12  ;;  %v2887_v24 = vld [vmem:[#allocation4 + $0x1e0] sm:$0xff]  ;;  %v1065_v12 = vadd.f32 %v6502_v30, %v6506_v22 }
 0x15a   :  { %v6590_v28 = vpop.f32.mrf.mxu0  ;;  %3017 = vmatpush1.msra.mxu1 %v2826_v55  ;;  %2892 = vmatpush1.msra.mxu0 %v2889_v33  ;;  %v2883_v22 = vld [vmem:[#allocation4 + $0x1c0] sm:$0xff] }
 0x15b   :  { %v1177_v26 = vpop.f32.mrf.mxu1  ;;  %v1206_v59 = vadd.f32 %v1165_v18, %v1059_v23  ;;  %2893 = vmatprep.subr.mxu0 %v2888_v45  ;;  %v2884_v45 = vld [vmem:[#allocation4 + $0x1c8] sm:$0xff]  ;;  %v1067_v18 = vadd.f32 %v6509_v53, %v6515_v46  ;;  %v1208_v23 = vadd.f32 %v1171_v52, %v1065_v12  ;;  %v1073_v52 = vadd.f32 %v6524_v34, %v6530_v1 }
 0x15c   :  { %v6592_v16 = vpop.f32.mrf.mxu0  ;;  %2894 = vmatpush1.msra.mxu0 %v2887_v24 }
 0x15d   :  { %v6594_v60 = vpop.f32.mrf.mxu1 }
 0x15e   :  { %v6596_v35 = vpop.f32.mrf.mxu0 }
 0x15f   :  { %v6598_v31 = vpop.f32.mrf.mxu1 }
 0x160   :  { %v6600_v20 = vpop.f32.mrf.mxu0 }
 0x161   :  { %v6602_v27 = vpop.f32.mrf.mxu1 }
 0x162   :  { %v6604_v13 = vpop.f32.mrf.mxu0 }
 0x163   :  { %v6606_v11 = vpop.f32.mrf.mxu1 }
 0x164   :  { %v6608_v5 = vpop.f32.mrf.mxu0 }
 0x165   :  { %v6610_v2 = vpop.f32.mrf.mxu1 }
 0x166   :  { %v1316_v48 = vpop.f32.mrf.mxu0 }
 0x167   :  { %v1195_v8 = vpop.f32.mrf.mxu1 }
 0x168   :  { %v1216_v55 = vadd.f32 %v1195_v8, %v6559_v32  ;;  %v6617_v17 = vpop.f32.mrf.mxu0  ;;  %v2886_v32 = vld [vmem:[#allocation4 + $0x1d8] sm:$0xff] }
 0x169   :  { %7987 = vst [vmem:[#allocation19_spill] sm:$0xff] %v6617_v17  ;;  %v6620_v0 = vpop.f32.mrf.mxu1  ;;  %v3251_v8 = vld [vmem:[#allocation4 + $0x3f8] sm:$0xff]  ;;  %v1207_v17 = vadd.f32 %v1167_v19, %v1061_v62  ;;  %2895 = vmatprep.subr.mxu0 %v2886_v32  ;;  %v1071_v62 = vadd.f32 %v6519_v36, %v6521_v50  ;;  %v1329_v36 = vadd.f32 %v6586_v9, %v1208_v23  ;;  %v2876_v23 = vld [vmem:[#allocation4 + $0x188] sm:$0xff] }
 0x16a   :  { %v6624_v4 = vadd.f32 %v1316_v48, %v1216_v55  ;;  %v1322_v39 = vpop.f32.mrf.mxu0  ;;  %3252 = vmatprep.subr.mxu1 %v3251_v8  ;;  %2896 = vmatpush1.msra.mxu0 %v2885_v49  ;;  %v1327_v48 = vadd.f32 %v6580_v37, %v1206_v59  ;;  %v2882_v19 = vld [vmem:[#allocation4 + $0x1b8] sm:$0xff]  ;;  %v2881_v59 = vld [vmem:[#allocation4 + $0x1b0] sm:$0xff]  ;;  %v2880_v37 = vld [vmem:[#allocation4 + $0x1a8] sm:$0xff]  ;;  %v1211_v49 = vadd.f32 %v6594_v60, %v1073_v52 }
 0x16b   :  { %v1201_v40 = vpop.f32.mrf.mxu1  ;;  %2897 = vmatprep.subr.mxu0 %v2884_v45  ;;  %v1328_v24 = vadd.f32 %v6583_v41, %v1207_v17  ;;  %v2879_v17 = vld [vmem:[#allocation4 + $0x1a0] sm:$0xff]  ;;  %v1077_v41 = vadd.f32 %v6532_v57, %v6534_v6  ;;  %v2877_v45 = vld [vmem:[#allocation4 + $0x190] sm:$0xff] }
 0x16c   :  { %v1218_v33 = vadd.f32 %v1201_v40, %v6570_v63  ;;  %v6629_v15 = vpop.f32.mrf.mxu0  ;;  %2898 = vmatpush1.msra.mxu0 %v2883_v22  ;;  %v1209_v40 = vadd.f32 %v1173_v58, %v1067_v18  ;;  %v1079_v18 = vadd.f32 %v6537_v43, %v6543_v3 }
 0x16d   :  { %v6631_v14 = vpop.f32.mrf.mxu1  ;;  %2899 = vmatprep.subr.mxu0 %v2882_v19  ;;  %v1212_v57 = vadd.f32 %v6598_v31, %v1077_v41  ;;  %v2875_v19 = vld [vmem:[#allocation4 + $0x180] sm:$0xff]  ;;  %v1332_v31 = vadd.f32 %v6592_v16, %v1211_v49 }
 0x16e   :  { %v6636_v55 = vadd.f32 %v1322_v39, %v1218_v33  ;;  %v6638_v30 = vpop.f32.mrf.mxu0  ;;  %v1210_v39 = vadd.f32 %v1177_v26, %v1071_v62  ;;  %2900 = vmatpush1.msra.mxu0 %v2881_v59  ;;  %v2878_v26 = vld [vmem:[#allocation4 + $0x198] sm:$0xff]  ;;  %v1330_v33 = vadd.f32 %v6588_v21, %v1209_v40  ;;  %v1213_v43 = vadd.f32 %v6602_v27, %v1079_v18  ;;  %v2869_v18 = vld [vmem:[#allocation4 + $0x150] sm:$0xff] }
 0x16f   :  { %v1435_v63 = vpop.f32.mrf.mxu1  ;;  %2901 = vmatprep.subr.mxu0 %v2880_v37  ;;  %v1085_v37 = vadd.f32 %v6550_v42, %v6556_v7 }
 0x170   :  { %v1476_v32 = vadd.f32 %v1435_v63, %v1327_v48  ;;  %v6643_v53 = vpop.f32.mrf.mxu0  ;;  %2902 = vmatpush1.msra.mxu0 %v2879_v17  ;;  %v1331_v48 = vadd.f32 %v6590_v28, %v1210_v39  ;;  %v2874_v28 = vld [vmem:[#allocation4 + $0x178] sm:$0xff]  ;;  %v1334_v42 = vadd.f32 %v6600_v20, %v1213_v43 }
 0x171   :  { %v1437_v46 = vpop.f32.mrf.mxu1  ;;  %2903 = vmatprep.subr.mxu0 %v2878_v26  ;;  %v2871_v26 = vld [vmem:[#allocation4 + $0x160] sm:$0xff]  ;;  %v1215_v7 = vadd.f32 %v6610_v2, %v1085_v37 }
 0x172   :  { %v1490_v50 = vadd.f32 %v1476_v32, %v6386_v10  ;;  %v1477_v12 = vadd.f32 %v1437_v46, %v1328_v24  ;;  %v6649_v8 = vpop.f32.mrf.mxu0  ;;  %2904 = vmatpush1.msra.mxu0 %v2877_v45  ;;  %v1083_v24 = vadd.f32 %v6545_v54, %v6547_v44  ;;  %v2873_v46 = vld [vmem:[#allocation4 + $0x170] sm:$0xff]  ;;  %v1333_v54 = vadd.f32 %v6596_v35, %v1212_v57  ;;  %v3248_v45 = vld [vmem:[#allocation4 + $0x3e0] sm:$0xff] }
 0x173   :  { %v1441_v58 = vpop.f32.mrf.mxu1  ;;  %2905 = vmatprep.subr.mxu0 %v2876_v23  ;;  %v3247_v23 = vld [vmem:[#allocation4 + $0x3d8] sm:$0xff] }
 0x174   :  { %v1491_v34 = vadd.f32 %v1477_v12, %v6392_v25  ;;  %v1478_v1 = vadd.f32 %v1441_v58, %v1329_v36  ;;  %v6656_v9 = vpop.f32.mrf.mxu0  ;;  %v1504_v21 = vmax.f32 %v1490_v50, 0.0  ;;  %2906 = vmatpush1.msra.mxu0 %v2875_v19  ;;  %v1214_v44 = vadd.f32 %v6606_v11, %v1083_v24  ;;  %v2872_v36 = vld [vmem:[#allocation4 + $0x168] sm:$0xff]  ;;  %v3250_v58 = vld [vmem:[#allocation4 + $0x3f0] sm:$0xff] }
 0x175   :  { %v1443_v6 = vpop.f32.mrf.mxu1  ;;  %2907 = vmatprep.subr.mxu0 %v2874_v28  ;;  %v3249_v11 = vld [vmem:[#allocation4 + $0x3e8] sm:$0xff]  ;;  %v2867_v28 = vld [vmem:[#allocation4 + $0x140] sm:$0xff] }
 0x176   :  { %v1505_v22 = vmax.f32 %v1491_v34, 0.0  ;;  %v1492_v60 = vadd.f32 %v1478_v1, %v6386_v10  ;;  %v1479_v62 = vadd.f32 %v1443_v6, %v1330_v33  ;;  %v6663_v63 = vpop.f32.mrf.mxu0  ;;  %2908 = vmatpush1.msra.mxu0 %v2873_v46  ;;  %v2870_v33 = vld [vmem:[#allocation4 + $0x158] sm:$0xff]  ;;  %v1335_v20 = vadd.f32 %v6604_v13, %v1214_v44  ;;  %v7990_v44 = vld [vmem:[#allocation14_spill] sm:$0xff] }
 0x177   :  { %v1447_v3 = vpop.f32.mrf.mxu1  ;;  %2909 = vmatprep.subr.mxu0 %v2872_v36  ;;  %v7988_v6 = vmov 0.0   ;;  %v2866_v46 = vld [vmem:[#allocation4 + $0x138] sm:$0xff] }
 0x178   :  { %v2791_v40 = vmax.f32 %v1504_v21, %v1505_v22  ;;  %v1493_v32 = vadd.f32 %v1479_v62, %v6392_v25  ;;  %v1480_v59 = vadd.f32 %v1447_v3, %v1331_v48  ;;  %v6670_v39 = vpop.f32.mrf.mxu0  ;;  %v1506_v27 = vmax.f32 %v1492_v60, 0.0  ;;  %2910 = vmatpush1.msra.mxu0 %v2871_v26  ;;  %v2868_v21 = vld [vmem:[#allocation4 + $0x148] sm:$0xff] }
 0x179   :  { %v1449_v52 = vpop.f32.mrf.mxu1  ;;  %2911 = vmatprep.subr.mxu0 %v2870_v33  ;;  %v1091_v48 = vadd.f32 %v6561_v56, %v6567_v61  ;;  %v3246_v56 = vld [vmem:[#allocation4 + $0x3d0] sm:$0xff]  ;;  %v1336_v61 = vadd.f32 %v6608_v5, %v1215_v7  ;;  %v3245_v3 = vld [vmem:[#allocation4 + $0x3c8] sm:$0xff]  ;;  %v1097_v5 = vadd.f32 %v6572_v29, %v6578_v38 }
 0x17a   :  { %v2798_v16 = vmax.f32 %v6421_v51, %v2791_v40  ;;  %v1507_v50 = vmax.f32 %v1493_v32, 0.0  ;;  %v1494_v12 = vadd.f32 %v1480_v59, %v6386_v10  ;;  %v1481_v17 = vadd.f32 %v1449_v52, %v1332_v31  ;;  %v6678_v41 = vpop.f32.mrf.mxu0  ;;  %2912 = vmatpush1.msra.mxu0 %v2869_v18  ;;  %v3244_v59 = vld [vmem:[#allocation4 + $0x3c0] sm:$0xff]  ;;  %v3241_v26 = vld [vmem:[#allocation4 + $0x3a8] sm:$0xff]  ;;  %v7994_v18 = vld [vmem:[#allocation15_spill] sm:$0xff] }
 0x17b   :  { %v1453_v35 = vpop.f32.mrf.mxu1  ;;  %v1217_v13 = vadd.f32 %v6620_v0, %v1091_v48  ;;  %2913 = vmatprep.subr.mxu0 %v2868_v21  ;;  %v1219_v38 = vadd.f32 %v6631_v14, %v1097_v5 }
 0x17c   :  { %v2792_v49 = vmax.f32 %v1506_v27, %v1507_v50  ;;  %v1495_v51 = vadd.f32 %v1481_v17, %v6392_v25  ;;  %v1482_v34 = vadd.f32 %v1453_v35, %v1333_v54  ;;  %3051 = vmatmul.mubr.f32.vlgmr.msra.gmra.mxu1 %v2798_v16  ;;  %v6683_v1 = vpop.f32.mrf.mxu0  ;;  %v1508_v2 = vmax.f32 %v1494_v12, 0.0  ;;  %v3243_v54 = vld [vmem:[#allocation4 + $0x3b8] sm:$0xff]  ;;  %v3242_v12 = vld [vmem:[#allocation4 + $0x3b0] sm:$0xff]  ;;  %2914 = vmatpush1.msra.mxu0 %v2867_v28 }
 0x17d   :  { %v1455_v57 = vpop.f32.mrf.mxu1  ;;  %3056 = vmatprep.mubr.f32.mxu1 %v7988_v6  ;;  %3253 = vmatpush1.msra.mxu1 %v3250_v58  ;;  %v7992_v17 = vld [vmem:[#allocation19_spill] sm:$0xff]  ;;  %v1340_v21 = vadd.f32 %v6629_v15, %v1219_v38  ;;  %v6735_v28 = vld [vmem:[#allocation4 + $0x118] sm:$0xff]  ;;  %v3232_v38 = vld [vmem:[#allocation4 + $0x360] sm:$0xff] }
 0x17e   :  { %v1509_v22 = vmax.f32 %v1495_v51, 0.0  ;;  %v1496_v60 = vadd.f32 %v1482_v34, %v6386_v10  ;;  %v1483_v62 = vadd.f32 %v1455_v57, %v1334_v42  ;;  %v6690_v19 = vpop.f32.mrf.mxu0  ;;  %v6693_v24 = vmax.f32 %v6437_v47, %v2792_v49  ;;  %3254 = vmatprep.subr.mxu1 %v3249_v11  ;;  %2915 = vmatprep.subr.mxu0 %v2866_v46  ;;  %v2865_v42 = vld [vmem:[#allocation4 + $0x130] sm:$0xff]  ;;  %v3240_v49 = vld [vmem:[#allocation4 + $0x3a0] sm:$0xff]  ;;  %v6717_v51 = vld [vmem:[#allocation4 + $0x128] sm:$0xff] }
 0x17f   :  { %v1459_v43 = vpop.f32.mrf.mxu1  ;;  %3255 = vmatpush1.msra.mxu1 %v3248_v45  ;;  %v1338_v29 = vadd.f32 %v7992_v17, %v1217_v13  ;;  %7993 = vst [vmem:[#allocation9_spill] sm:$0xff] %v6717_v51  ;;  %v3239_v45 = vld [vmem:[#allocation4 + $0x398] sm:$0xff]  ;;  %2916 = vmatpush1.msra.mxu0 %v2865_v42  ;;  %7997 = vst [vmem:[#allocation15_spill] sm:$0xff] %v6735_v28 }
 0x180   :  { %7989 = vst [vmem:[#allocation16_spill] sm:$0xff] %v6693_v24  ;;  %v2793_v31 = vmax.f32 %v1508_v2, %v1509_v22  ;;  %v1497_v40 = vadd.f32 %v1483_v62, %v6392_v25  ;;  %v1484_v32 = vadd.f32 %v1459_v43, %v1335_v20  ;;  %3057 = vmatmul.mubr.f32.gmra.mxu1 %v6693_v24  ;;  %v6699_v47 = vpop.f32.mrf.mxu0  ;;  %v1510_v0 = vmax.f32 %v1496_v60, 0.0  ;;  %v3237_v60 = vld [vmem:[#allocation4 + $0x388] sm:$0xff]  ;;  %v6728_v62 = vld [vmem:[#allocation4 + $0x120] sm:$0xff]  ;;  %v3231_v42 = vld [vmem:[#allocation4 + $0x358] sm:$0xff] }
 0x181   :  { %3256 = vmatprep.subr.mxu1 %v3247_v23  ;;  %v1461_v37 = vpop.f32.mrf.mxu1  ;;  %3062 = vmatprep.mubr.f32.mxu1 %v7988_v6  ;;  %v3238_v23 = vld [vmem:[#allocation4 + $0x390] sm:$0xff]  ;;  %7996 = vst [vmem:[#allocation19_spill] sm:$0xff] %v6728_v62 }
 0x182   :  { %3257 = vmatpush1.msra.mxu1 %v3246_v56  ;;  %v6705_v27 = vmax.f32 %v7990_v44, %v2793_v31  ;;  %v1511_v52 = vmax.f32 %v1497_v40, 0.0  ;;  %v1498_v36 = vadd.f32 %v1484_v32, %v6386_v10  ;;  %v1485_v16 = vadd.f32 %v1461_v37, %v1336_v61  ;;  %v6708_v50 = vpop.f32.mrf.mxu0  ;;  %2917 = vmatprep.subr.mxu0 %v6717_v51  ;;  %v3235_v40 = vld [vmem:[#allocation4 + $0x378] sm:$0xff]  ;;  %v3234_v37 = vld [vmem:[#allocation4 + $0x370] sm:$0xff] }
 0x183   :  { %3258 = vmatprep.subr.mxu1 %v3245_v3  ;;  %v1465_v58 = vpop.f32.mrf.mxu1  ;;  %v3236_v3 = vld [vmem:[#allocation4 + $0x380] sm:$0xff]  ;;  %v7998_v32 = vld [vmem:[#allocation12_spill] sm:$0xff]  ;;  %2918 = vmatpush1.msra.mxu0 %v6728_v62 }
 0x184   :  { %7991 = vst [vmem:[#allocation10_spill] sm:$0xff] %v6705_v27  ;;  %3259 = vmatpush1.msra.mxu1 %v3244_v59  ;;  %v2794_v7 = vmax.f32 %v1510_v0, %v1511_v52  ;;  %v1499_v35 = vadd.f32 %v1485_v16, %v6392_v25  ;;  %v1486_v11 = vadd.f32 %v1465_v58, %v6624_v4  ;;  %v6715_v33 = vpop.f32.mrf.mxu0  ;;  %v1512_v34 = vmax.f32 %v1498_v36, 0.0  ;;  %v3233_v52 = vld [vmem:[#allocation4 + $0x368] sm:$0xff]  ;;  %v6753_v58 = vld [vmem:[#allocation4 + $0x100] sm:$0xff] }
 0x185   :  { %3063 = vmatmul.mubr.f32.gmra.mxu1 %v6705_v27  ;;  %3260 = vmatprep.subr.mxu1 %v3243_v54  ;;  %v1467_v14 = vpop.f32.mrf.mxu1  ;;  %v6743_v54 = vld [vmem:[#allocation4 + $0x110] sm:$0xff]  ;;  %v6746_v36 = vld [vmem:[#allocation4 + $0x108] sm:$0xff]  ;;  %8002 = vst [vmem:[#allocation22_spill] sm:$0xff] %v6753_v58 }
 0x186   :  { %3068 = vmatprep.mubr.f32.mxu1 %v7988_v6  ;;  %3261 = vmatpush1.msra.mxu1 %v3242_v12  ;;  %v6721_v48 = vmax.f32 %v7994_v18, %v2794_v7  ;;  %v1513_v20 = vmax.f32 %v1499_v35, 0.0  ;;  %v1500_v4 = vadd.f32 %v1486_v11, %v6386_v10  ;;  %v1487_v2 = vadd.f32 %v1467_v14, %v1338_v29  ;;  %v6724_v57 = vpop.f32.mrf.mxu0  ;;  %v6758_v7 = vld [vmem:[#allocation4 + $0x2f8] sm:$0xff]  ;;  %v8004_v14 = vld [vmem:[#allocation17_spill] sm:$0xff] }
 0x187   :  { %3262 = vmatprep.subr.mxu1 %v3241_v26  ;;  %v1471_v22 = vpop.f32.mrf.mxu1  ;;  %8000 = vst [vmem:[#allocation20_spill] sm:$0xff] %v6743_v54  ;;  %2919 = vmatprep.subr.mxu0 %v6735_v28  ;;  %8001 = vst [vmem:[#allocation21_spill] sm:$0xff] %v6746_v36 }
 0x188   :  { %7995 = vst [vmem:[#allocation14_spill] sm:$0xff] %v6721_v48  ;;  %3263 = vmatpush1.msra.mxu1 %v3240_v49  ;;  %v2795_v56 = vmax.f32 %v1512_v34, %v1513_v20  ;;  %v1501_v61 = vadd.f32 %v1487_v2, %v6392_v25  ;;  %v1488_v13 = vadd.f32 %v1471_v22, %v6636_v55  ;;  %v6733_v43 = vpop.f32.mrf.mxu0  ;;  %v1514_v15 = vmax.f32 %v1500_v4, 0.0  ;;  %v3230_v34 = vld [vmem:[#allocation4 + $0x350] sm:$0xff]  ;;  %v3229_v20 = vld [vmem:[#allocation4 + $0x348] sm:$0xff] }
 0x189   :  { %3069 = vmatmul.mubr.f32.gmra.mxu1 %v6721_v48  ;;  %3264 = vmatprep.subr.mxu1 %v3239_v45  ;;  %v1473_v31 = vpop.f32.mrf.mxu1  ;;  %8003 = vst [vmem:[#allocation23_spill] sm:$0xff] %v6758_v7 }
 0x18a   :  { %3074 = vmatprep.mubr.f32.mxu1 %v7988_v6  ;;  %3265 = vmatpush1.msra.mxu1 %v3238_v23  ;;  %v6739_v59 = vmax.f32 %v7998_v32, %v2795_v56  ;;  %v1515_v46 = vmax.f32 %v1501_v61, 0.0  ;;  %v1502_v55 = vadd.f32 %v1488_v13, %v6386_v10  ;;  %v1489_v5 = vadd.f32 %v1473_v31, %v1340_v21  ;;  %v1798_v0 = vpop.f32.mrf.mxu0  ;;  %v3228_v21 = vld [vmem:[#allocation4 + $0x340] sm:$0xff]  ;;  %v3226_v13 = vld [vmem:[#allocation4 + $0x330] sm:$0xff]  ;;  %v3225_v31 = vld [vmem:[#allocation4 + $0x328] sm:$0xff] }
 0x18b   :  { %3266 = vmatprep.subr.mxu1 %v3237_v60  ;;  %v1691_v44 = vpop.f32.mrf.mxu1  ;;  %2920 = vmatpush1.msra.mxu0 %v6743_v54  ;;  %v3227_v60 = vld [vmem:[#allocation4 + $0x338] sm:$0xff] }
 0x18c   :  { %7999 = vst [vmem:[#allocation12_spill] sm:$0xff] %v6739_v59  ;;  %3267 = vmatpush1.msra.mxu1 %v3236_v3  ;;  %v2796_v16 = vmax.f32 %v1514_v15, %v1515_v46  ;;  %v1503_v12 = vadd.f32 %v1489_v5, %v6392_v25  ;;  %v1692_v17 = vadd.f32 %v1691_v44, %v6638_v30  ;;  %v6751_v29 = vpop.f32.mrf.mxu0  ;;  %v1516_v35 = vmax.f32 %v1502_v55, 0.0  ;;  %v8006_v3 = vld [vmem:[#allocation13_spill] sm:$0xff]  ;;  %v3223_v5 = vld [vmem:[#allocation4 + $0x318] sm:$0xff]  ;;  %v3222_v44 = vld [vmem:[#allocation4 + $0x310] sm:$0xff] }
 0x18d   :  { %3075 = vmatmul.mubr.f32.gmra.mxu1 %v6739_v59  ;;  %3268 = vmatprep.subr.mxu1 %v3235_v40  ;;  %v6755_v26 = vpop.f32.mrf.mxu1  ;;  %v3224_v46 = vld [vmem:[#allocation4 + $0x320] sm:$0xff] }
 0x18e   :  { %3269 = vmatpush1.msra.mxu1 %v3234_v37  ;;  %v1517_v11 = vmax.f32 %v1503_v12, 0.0  ;;  %v6760_v49 = vadd.f32 %v1798_v0, %v1692_v17  ;;  %v1804_v30 = vpop.f32.mrf.mxu0  ;;  %2921 = vmatprep.subr.mxu0 %v6746_v36  ;;  %v6764_v45 = vmax.f32 %v8004_v14, %v2796_v16  ;;  %v3221_v16 = vld [vmem:[#allocation4 + $0x308] sm:$0xff] }
 0x18f   :  { %3270 = vmatprep.subr.mxu1 %v3233_v52  ;;  %v1697_v18 = vpop.f32.mrf.mxu1  ;;  %2922 = vmatpush1.msra.mxu0 %v6753_v58  ;;  %v8008_v14 = vld [vmem:[#allocation18_spill] sm:$0xff] }
 0x190   :  { %8005 = vst [vmem:[#allocation17_spill] sm:$0xff] %v6764_v45  ;;  %3271 = vmatpush1.msra.mxu1 %v3232_v38  ;;  %v2797_v4 = vmax.f32 %v1516_v35, %v1517_v11  ;;  %v1698_v2 = vadd.f32 %v1697_v18, %v6649_v8  ;;  %v6768_v23 = vpop.f32.mrf.mxu0  ;;  %3114 = vmatprep.subr.mxu0 %v6758_v7 }
 0x191   :  { %3272 = vmatprep.subr.mxu1 %v3231_v42  ;;  %v1699_v22 = vpop.f32.mrf.mxu1  ;;  %3316 = vmatprep.mubr.f32.mxu1 %v7988_v6 }
 0x192   :  { %3273 = vmatpush1.msra.mxu1 %v3230_v34  ;;  %v6772_v56 = vadd.f32 %v1804_v30, %v1698_v2  ;;  %v1810_v61 = vpop.f32.mrf.mxu0  ;;  %v6775_v15 = vmax.f32 %v8006_v3, %v2797_v4 }
 0x193   :  { %3274 = vmatprep.subr.mxu1 %v3229_v20  ;;  %v1703_v8 = vpop.f32.mrf.mxu1 }
 0x194   :  { %8007 = vst [vmem:[#allocation13_spill] sm:$0xff] %v6775_v15  ;;  %3275 = vmatpush1.msra.mxu1 %v3228_v21  ;;  %v1704_v40 = vadd.f32 %v1703_v8, %v6663_v63  ;;  %v6778_v32 = vpop.f32.mrf.mxu0  ;;  %v3220_v63 = vld [vmem:[#allocation4 + $0x300] sm:$0xff] }
 0x195   :  { %3276 = vmatprep.subr.mxu1 %v3227_v60  ;;  %v1705_v55 = vpop.f32.mrf.mxu1 }
 0x196   :  { %3277 = vmatpush1.msra.mxu1 %v3226_v13  ;;  %v6780_v0 = vadd.f32 %v1810_v61, %v1704_v40  ;;  %v1816_v37 = vpop.f32.mrf.mxu0 }
 0x197   :  { %3278 = vmatprep.subr.mxu1 %v3225_v31  ;;  %v1709_v52 = vpop.f32.mrf.mxu1 }
 0x198   :  { %3279 = vmatpush1.msra.mxu1 %v3224_v46  ;;  %v1710_v12 = vadd.f32 %v1709_v52, %v6678_v41  ;;  %v6783_v17 = vpop.f32.mrf.mxu0 }
 0x199   :  { %3280 = vmatprep.subr.mxu1 %v3223_v5  ;;  %v1711_v38 = vpop.f32.mrf.mxu1 }
 0x19a   :  { %3281 = vmatpush1.msra.mxu1 %v3222_v44  ;;  %v6785_v42 = vadd.f32 %v1816_v37, %v1710_v12  ;;  %v1822_v35 = vpop.f32.mrf.mxu0  ;;  %v1700_v44 = vadd.f32 %v1699_v22, %v6656_v9 }
 0x19b   :  { %3282 = vmatprep.subr.mxu1 %v3221_v16  ;;  %v1715_v11 = vpop.f32.mrf.mxu1 }
 0x19c   :  { %3283 = vmatpush1.msra.mxu1 %v3220_v63  ;;  %v1716_v30 = vadd.f32 %v1715_v11, %v6690_v19  ;;  %v6788_v34 = vpop.f32.mrf.mxu0  ;;  %v1694_v19 = vadd.f32 %v6755_v26, %v6643_v53 }
 0x19d   :  { %3526 = vmatprep.subr.mxu1 %v8008_v14  ;;  %v1717_v18 = vpop.f32.mrf.mxu1 }
 0x19e   :  { %v6791_v41 = vadd.f32 %v1822_v35, %v1716_v30  ;;  %v1828_v20 = vpop.f32.mrf.mxu0  ;;  %v1840_v37 = vadd.f32 %v6751_v29, %v1694_v19  ;;  %v1842_v35 = vadd.f32 %v6768_v23, %v1700_v44  ;;  %v1706_v29 = vadd.f32 %v1705_v55, %v6670_v39 }
 0x19f   :  { %v1721_v4 = vpop.f32.mrf.mxu1 }
 0x1a0   :  { %v1722_v2 = vadd.f32 %v1721_v4, %v6708_v50  ;;  %v6794_v21 = vpop.f32.mrf.mxu0 }
 0x1a1   :  { %v6796_v60 = vpop.f32.mrf.mxu1 }
 0x1a2   :  { %v6798_v61 = vadd.f32 %v1828_v20, %v1722_v2  ;;  %v1834_v13 = vpop.f32.mrf.mxu0 }
 0x1a3   :  { %v1727_v3 = vpop.f32.mrf.mxu1 }
 0x1a4   :  { %v1728_v8 = vadd.f32 %v1727_v3, %v6724_v57  ;;  %v6803_v31 = vpop.f32.mrf.mxu0 }
 0x1a5   :  { %v6805_v40 = vpop.f32.mrf.mxu1 }
 0x1a6   :  { %v6807_v46 = vadd.f32 %v1834_v13, %v1728_v8  ;;  %v2068_v50 = vpop.f32.mrf.mxu0  ;;  %v1712_v13 = vadd.f32 %v1711_v38, %v6683_v1 }
 0x1a7   :  { %v1919_v5 = vpop.f32.mrf.mxu1 }
 0x1a8   :  { %v1960_v52 = vadd.f32 %v1919_v5, %v6760_v49  ;;  %v2070_v16 = vpop.f32.mrf.mxu0  ;;  %v1846_v1 = vadd.f32 %v6783_v17, %v1712_v13 }
 0x1a9   :  { %v1921_v12 = vpop.f32.mrf.mxu1 }
 0x1aa   :  { %v2109_v63 = vadd.f32 %v2068_v50, %v1960_v52  ;;  %v1961_v53 = vadd.f32 %v1921_v12, %v1840_v37  ;;  %v2074_v26 = vpop.f32.mrf.mxu0  ;;  %v1844_v37 = vadd.f32 %v6778_v32, %v1706_v29 }
 0x1ab   :  { %v1925_v57 = vpop.f32.mrf.mxu1 }
 0x1ac   :  { %v2123_v11 = vadd.f32 %v2109_v63, %v6386_v10  ;;  %v2110_v30 = vadd.f32 %v2070_v16, %v1961_v53  ;;  %v1962_v14 = vadd.f32 %v1925_v57, %v6772_v56  ;;  %v2076_v20 = vpop.f32.mrf.mxu0  ;;  %v1718_v63 = vadd.f32 %v1717_v18, %v6699_v47 }
 0x1ad   :  { %v1927_v4 = vpop.f32.mrf.mxu1 }
 0x1ae   :  { %v2124_v9 = vadd.f32 %v2110_v30, %v6392_v25  ;;  %v2111_v49 = vadd.f32 %v2074_v26, %v1962_v14  ;;  %v1963_v22 = vadd.f32 %v1927_v4, %v1842_v35  ;;  %v2080_v2 = vpop.f32.mrf.mxu0  ;;  %v2137_v3 = vmax.f32 %v2123_v11, 0.0 }
 0x1af   :  { %v1931_v19 = vpop.f32.mrf.mxu1 }
 0x1b0   :  { %v2138_v8 = vmax.f32 %v2124_v9, 0.0  ;;  %v2125_v23 = vadd.f32 %v2111_v49, %v6386_v10  ;;  %v2112_v50 = vadd.f32 %v2076_v20, %v1963_v22  ;;  %v1964_v5 = vadd.f32 %v1931_v19, %v6780_v0  ;;  %v2082_v56 = vpop.f32.mrf.mxu0 }
 0x1b1   :  { %v1933_v39 = vpop.f32.mrf.mxu1  ;;  %v1848_v9 = vadd.f32 %v6788_v34, %v1718_v63  ;;  %v1724_v22 = vadd.f32 %v6796_v60, %v6715_v33  ;;  %v1730_v34 = vadd.f32 %v6805_v40, %v6733_v43 }
 0x1b2   :  { %v6821_v55 = vmax.f32 %v2137_v3, %v2138_v8  ;;  %v2126_v44 = vadd.f32 %v2112_v50, %v6392_v25  ;;  %v2113_v52 = vadd.f32 %v2080_v2, %v1964_v5  ;;  %v2086_v16 = vpop.f32.mrf.mxu0  ;;  %v1965_v38 = vadd.f32 %v1933_v39, %v1844_v37 }
 0x1b3   :  { %v1937_v12 = vpop.f32.mrf.mxu1  ;;  %v2139_v53 = vmax.f32 %v2125_v23, 0.0 }
 0x1b4   :  { %v2140_v26 = vmax.f32 %v2126_v44, 0.0  ;;  %v1966_v0 = vadd.f32 %v1937_v12, %v6785_v42  ;;  %v2088_v57 = vpop.f32.mrf.mxu0  ;;  %v2127_v32 = vadd.f32 %v2113_v52, %v6386_v10  ;;  %v2114_v35 = vadd.f32 %v2082_v56, %v1965_v38 }
 0x1b5   :  { %v1939_v11 = vpop.f32.mrf.mxu1  ;;  %v1850_v52 = vadd.f32 %v6794_v21, %v1724_v22 }
 0x1b6   :  { %v6828_v30 = vmax.f32 %v2139_v53, %v2140_v26  ;;  %v2115_v14 = vadd.f32 %v2086_v16, %v1966_v0  ;;  %v1967_v20 = vadd.f32 %v1939_v11, %v1846_v1  ;;  %v2092_v29 = vpop.f32.mrf.mxu0  ;;  %v2128_v17 = vadd.f32 %v2114_v35, %v6392_v25 }
 0x1b7   :  { %v1943_v4 = vpop.f32.mrf.mxu1  ;;  %v2141_v2 = vmax.f32 %v2127_v32, 0.0  ;;  %v1852_v53 = vadd.f32 %v6803_v31, %v1730_v34 }
 0x1b8   :  { %8009 = vst [vmem:[#allocation18_spill] sm:$0xff] %v6828_v30  ;;  %v2129_v47 = vadd.f32 %v2115_v14, %v6386_v10  ;;  %v2116_v18 = vadd.f32 %v2088_v57, %v1967_v20  ;;  %v1968_v42 = vadd.f32 %v1943_v4, %v6791_v41  ;;  %v2094_v49 = vpop.f32.mrf.mxu0  ;;  %v2142_v13 = vmax.f32 %v2128_v17, 0.0 }
 0x1b9   :  { %v1945_v3 = vpop.f32.mrf.mxu1 }
 0x1ba   :  { %v2130_v19 = vadd.f32 %v2116_v18, %v6392_v25  ;;  %v2117_v8 = vadd.f32 %v2092_v29, %v1968_v42  ;;  %v1969_v23 = vadd.f32 %v1945_v3, %v1848_v9  ;;  %v2098_v50 = vpop.f32.mrf.mxu0  ;;  %v6839_v5 = vmax.f32 %v2141_v2, %v2142_v13 }
 0x1bb   :  { %v2143_v56 = vmax.f32 %v2129_v47, 0.0  ;;  %v1949_v37 = vpop.f32.mrf.mxu1 }
 0x1bc   :  { %8010 = vst [vmem:[#allocation24_spill] sm:$0xff] %v6839_v5  ;;  %v2144_v41 = vmax.f32 %v2130_v19, 0.0  ;;  %v2131_v39 = vadd.f32 %v2117_v8, %v6386_v10  ;;  %v2118_v44 = vadd.f32 %v2094_v49, %v1969_v23  ;;  %v1970_v33 = vadd.f32 %v1949_v37, %v6798_v61  ;;  %v2100_v60 = vpop.f32.mrf.mxu0 }
 0x1bd   :  { %v1951_v16 = vpop.f32.mrf.mxu1 }
 0x1be   :  { %v6844_v1 = vmax.f32 %v2143_v56, %v2144_v41  ;;  %v2132_v38 = vadd.f32 %v2118_v44, %v6392_v25  ;;  %v2119_v12 = vadd.f32 %v2098_v50, %v1970_v33  ;;  %v2104_v43 = vpop.f32.mrf.mxu0  ;;  %v1971_v40 = vadd.f32 %v1951_v16, %v1850_v52 }
 0x1bf   :  { %v1955_v63 = vpop.f32.mrf.mxu1  ;;  %v2145_v26 = vmax.f32 %v2131_v39, 0.0 }
 0x1c0   :  { %8011 = vst [vmem:[#allocation25_spill] sm:$0xff] %v6844_v1  ;;  %v2146_v0 = vmax.f32 %v2132_v38, 0.0  ;;  %v1972_v57 = vadd.f32 %v1955_v63, %v6807_v46  ;;  %v2106_v32 = vpop.f32.mrf.mxu0  ;;  %v2133_v61 = vadd.f32 %v2119_v12, %v6386_v10  ;;  %v2120_v35 = vadd.f32 %v2100_v60, %v1971_v40 }
 0x1c1   :  { %v1957_v21 = vpop.f32.mrf.mxu1 }
 0x1c2   :  { %v6850_v11 = vmax.f32 %v2145_v26, %v2146_v0  ;;  %v2121_v14 = vadd.f32 %v2104_v43, %v1972_v57  ;;  %v1973_v20 = vadd.f32 %v1957_v21, %v1852_v53  ;;  %v2324_v29 = vpop.f32.mrf.mxu0  ;;  %v2134_v17 = vadd.f32 %v2120_v35, %v6392_v25 }
 0x1c3   :  { %v2217_v4 = vpop.f32.mrf.mxu1  ;;  %v2147_v18 = vmax.f32 %v2133_v61, 0.0 }
 0x1c4   :  { %8012 = vst [vmem:[#allocation26_spill] sm:$0xff] %v6850_v11  ;;  %v2135_v9 = vadd.f32 %v2121_v14, %v6386_v10  ;;  %v2122_v31 = vadd.f32 %v2106_v32, %v1973_v20  ;;  %v2326_v47 = vpop.f32.mrf.mxu0  ;;  %v2148_v42 = vmax.f32 %v2134_v17, 0.0 }
 0x1c5   :  { %v2219_v46 = vpop.f32.mrf.mxu1 }
 0x1c6   :  { %v2136_v49 = vadd.f32 %v2122_v31, %v6392_v25  ;;  %v2330_v22 = vpop.f32.mrf.mxu0  ;;  %v6855_v2 = vmax.f32 %v2147_v18, %v2148_v42  ;;  %v2149_v3 = vmax.f32 %v2135_v9, 0.0  ;;  %v2327_v27 = vadd.f32 %v2326_v47, %v2219_v46 }
 0x1c7   :  { %v2223_v13 = vpop.f32.mrf.mxu1 }
 0x1c8   :  { %8013 = vst [vmem:[#allocation27_spill] sm:$0xff] %v6855_v2  ;;  %v2150_v19 = vmax.f32 %v2136_v49, 0.0  ;;  %v2332_v8 = vpop.f32.mrf.mxu0  ;;  %v2331_v54 = vadd.f32 %v2330_v22, %v2223_v13 }
 0x1c9   :  { %v2225_v23 = vpop.f32.mrf.mxu1 }
 0x1ca   :  { %v6857_v50 = vmax.f32 %v2149_v3, %v2150_v19  ;;  %v2336_v34 = vpop.f32.mrf.mxu0  ;;  %v2333_v2 = vadd.f32 %v2332_v8, %v2225_v23 }
 0x1cb   :  { %v2229_v56 = vpop.f32.mrf.mxu1 }
 0x1cc   :  { %8014 = vst [vmem:[#allocation28_spill] sm:$0xff] %v6857_v50  ;;  %v2338_v37 = vpop.f32.mrf.mxu0  ;;  %v2337_v5 = vadd.f32 %v2336_v34, %v2229_v56 }
 0x1cd   :  { %v2231_v41 = vpop.f32.mrf.mxu1 }
 0x1ce   :  { %v2342_v39 = vpop.f32.mrf.mxu0  ;;  %v2339_v47 = vadd.f32 %v2338_v37, %v2231_v41 }
 0x1cf   :  { %v2235_v44 = vpop.f32.mrf.mxu1 }
 0x1d0   :  { %v6859_v33 = vpop.f32.mrf.mxu0  ;;  %v2343_v13 = vadd.f32 %v2342_v39, %v2235_v44 }
 0x1d1   :  { %v6861_v60 = vpop.f32.mrf.mxu1 }
 0x1d2   :  { %v6863_v52 = vpop.f32.mrf.mxu0 }
 0x1d3   :  { %v6865_v16 = vpop.f32.mrf.mxu1 }
 0x1d4   :  { %v6867_v38 = vpop.f32.mrf.mxu0  ;;  %v2349_v41 = vadd.f32 %v6863_v52, %v6865_v16 }
 0x1d5   :  { %v6869_v12 = vpop.f32.mrf.mxu1 }
 0x1d6   :  { %v6871_v43 = vpop.f32.mrf.mxu0 }
 0x1d7   :  { %v6873_v40 = vpop.f32.mrf.mxu1 }
 0x1d8   :  { %v6875_v63 = vpop.f32.mrf.mxu0 }
 0x1d9   :  { %v6877_v53 = vpop.f32.mrf.mxu1 }
 0x1da   :  { %v2360_v26 = vpop.f32.mrf.mxu0 }
 0x1db   :  { %v2253_v0 = vpop.f32.mrf.mxu1 }
 0x1dc   :  { %v2361_v57 = vadd.f32 %v2360_v26, %v2253_v0  ;;  %v2362_v32 = vpop.f32.mrf.mxu0  ;;  %v2325_v0 = vadd.f32 %v2324_v29, %v2217_v4 }
 0x1dd   :  { %v2255_v61 = vpop.f32.mrf.mxu1 }
 0x1de   :  { %v2363_v35 = vadd.f32 %v2362_v32, %v2255_v61  ;;  %v2552_v21 = vpop.f32.mrf.mxu0 }
 0x1df   :  { %v2431_v14 = vpop.f32.mrf.mxu1 }
 0x1e0   :  { %v2554_v20 = vpop.f32.mrf.mxu0  ;;  %v2472_v58 = vadd.f32 %v2431_v14, %v2325_v0 }
 0x1e1   :  { %v2433_v17 = vpop.f32.mrf.mxu1 }
 0x1e2   :  { %v2558_v31 = vpop.f32.mrf.mxu0  ;;  %v2473_v28 = vadd.f32 %v2433_v17, %v2327_v27  ;;  %v2593_v50 = vadd.f32 %v2552_v21, %v2472_v58 }
 0x1e3   :  { %v2437_v9 = vpop.f32.mrf.mxu1 }
 0x1e4   :  { %v2560_v49 = vpop.f32.mrf.mxu0  ;;  %v2474_v11 = vadd.f32 %v2437_v9, %v2331_v54  ;;  %v2594_v29 = vadd.f32 %v2554_v20, %v2473_v28  ;;  %v2345_v28 = vadd.f32 %v6859_v33, %v6861_v60 }
 0x1e5   :  { %v2439_v18 = vpop.f32.mrf.mxu1 }
 0x1e6   :  { %v2564_v15 = vpop.f32.mrf.mxu0  ;;  %v2475_v4 = vadd.f32 %v2439_v18, %v2333_v2  ;;  %v2595_v22 = vadd.f32 %v2558_v31, %v2474_v11 }
 0x1e7   :  { %v2443_v42 = vpop.f32.mrf.mxu1 }
 0x1e8   :  { %v2566_v48 = vpop.f32.mrf.mxu0  ;;  %v2476_v46 = vadd.f32 %v2443_v42, %v2337_v5  ;;  %v2596_v58 = vadd.f32 %v2560_v49, %v2475_v4  ;;  %v6915_v4 = vld [vmem:[#allocation4 + $0x2d8] sm:$0xff] }
 0x1e9   :  { %v2445_v3 = vpop.f32.mrf.mxu1 }
 0x1ea   :  { %v2570_v32 = vpop.f32.mrf.mxu0  ;;  %v2597_v2 = vadd.f32 %v2564_v15, %v2476_v46  ;;  %v2351_v15 = vadd.f32 %v6867_v38, %v6869_v12 }
 0x1eb   :  { %v2449_v19 = vpop.f32.mrf.mxu1 }
 0x1ec   :  { %v2572_v24 = vpop.f32.mrf.mxu0 }
 0x1ed   :  { %v2451_v45 = vpop.f32.mrf.mxu1 }
 0x1ee   :  { %v2576_v30 = vpop.f32.mrf.mxu0 }
 0x1ef   :  { %v2455_v59 = vpop.f32.mrf.mxu1 }
 0x1f0   :  { %v2578_v54 = vpop.f32.mrf.mxu0  ;;  %v2480_v60 = vadd.f32 %v2455_v59, %v2349_v41 }
 0x1f1   :  { %v2457_v7 = vpop.f32.mrf.mxu1 }
 0x1f2   :  { %v2582_v21 = vpop.f32.mrf.mxu0  ;;  %v2481_v16 = vadd.f32 %v2457_v7, %v2351_v15  ;;  %v2601_v7 = vadd.f32 %v2576_v30, %v2480_v60  ;;  %v6946_v60 = vld [vmem:[#allocation4 + $0x2b0] sm:$0xff] }
 0x1f3   :  { %v6879_v26 = vpop.f32.mrf.mxu1 }
 0x1f4   :  { %8015 = vst [vmem:[#allocation29_spill] sm:$0xff] %v6879_v26  ;;  %v2584_v0 = vpop.f32.mrf.mxu0 }
 0x1f5   :  { %v6881_v61 = vpop.f32.mrf.mxu1 }
 0x1f6   :  { %8016 = vst [vmem:[#allocation30_spill] sm:$0xff] %v6881_v61 }
 0x1f7   :  { %v2467_v36 = vpop.f32.mrf.mxu1 }
 0x1f8   :  { %v6883_v62 = vadd.f32 %v2467_v36, %v2361_v57  ;;  %v2477_v57 = vadd.f32 %v2445_v3, %v2339_v47  ;;  %v8017_v47 = vld [vmem:[#allocation18_spill] sm:$0xff] }
 0x1f9   :  { %v2469_v51 = vpop.f32.mrf.mxu1 }
 0x1fa   :  { %v6885_v1 = vadd.f32 %v2469_v51, %v2363_v35  ;;  %v2598_v39 = vadd.f32 %v2566_v48, %v2477_v57  ;;  %v2479_v35 = vadd.f32 %v2451_v45, %v2345_v28  ;;  %v6901_v45 = vld [vmem:[#allocation4 + $0x2f0] sm:$0xff]  ;;  %v6927_v57 = vld [vmem:[#allocation4 + $0x2c8] sm:$0xff]  ;;  %v6932_v28 = vld [vmem:[#allocation4 + $0x2c0] sm:$0xff] }
 0x1fb   :  { %v2701_v26 = vpop.f32.mrf.mxu1  ;;  %v8018_v30 = vld [vmem:[#allocation29_spill] sm:$0xff] }
 0x1fc   :  { %v2742_v61 = vadd.f32 %v2701_v26, %v2593_v50  ;;  %v2478_v50 = vadd.f32 %v2449_v19, %v2343_v13  ;;  %v6903_v19 = vld [vmem:[#allocation4 + $0x2e8] sm:$0xff]  ;;  %v2600_v26 = vadd.f32 %v2572_v24, %v2479_v35 }
 0x1fd   :  { %v2703_v14 = vpop.f32.mrf.mxu1 }
 0x1fe   :  { %v2756_v27 = vadd.f32 %v2742_v61, %v6386_v10  ;;  %v2743_v36 = vadd.f32 %v2703_v14, %v2594_v29  ;;  %v2599_v33 = vadd.f32 %v2570_v32, %v2478_v50  ;;  %v2355_v32 = vadd.f32 %v6871_v43, %v6873_v40  ;;  %v6922_v43 = vld [vmem:[#allocation4 + $0x2d0] sm:$0xff] }
 0x1ff   :  { %v2707_v8 = vpop.f32.mrf.mxu1  ;;  %v2357_v61 = vadd.f32 %v6875_v63, %v6877_v53  ;;  %v2602_v63 = vadd.f32 %v2578_v54, %v2481_v16  ;;  %v8019_v53 = vld [vmem:[#allocation30_spill] sm:$0xff] }
 0x200   :  { %v2757_v51 = vadd.f32 %v2743_v36, %v6392_v25  ;;  %v2744_v23 = vadd.f32 %v2707_v8, %v2595_v22  ;;  %v2770_v5 = vmax.f32 %v2756_v27, 0.0  ;;  %v2482_v40 = vadd.f32 %v8018_v30, %v2355_v32  ;;  %v2588_v8 = vpop.f32.mrf.mxu0 }
 0x201   :  { %v2709_v34 = vpop.f32.mrf.mxu1  ;;  %v2483_v36 = vadd.f32 %v8019_v53, %v2357_v61  ;;  %v5349_v53 = vld [vmem:[#allocation4 + $0x1b8] sm:$0xff] }
 0x202   :  { %v2771_v56 = vmax.f32 %v2757_v51, 0.0  ;;  %v2758_v11 = vadd.f32 %v2744_v23, %v6386_v10  ;;  %v2745_v37 = vadd.f32 %v2709_v34, %v2596_v58  ;;  %v2603_v41 = vadd.f32 %v2582_v21, %v2482_v40  ;;  %v6974_v40 = vld [vmem:[#allocation4 + $0x288] sm:$0xff] }
 0x203   :  { %v2713_v44 = vpop.f32.mrf.mxu1 }
 0x204   :  { %v2812_v20 = vmax.f32 %v2770_v5, %v2771_v56  ;;  %v2759_v17 = vadd.f32 %v2745_v37, %v6392_v25  ;;  %v2746_v9 = vadd.f32 %v2713_v44, %v2597_v2  ;;  %v2772_v31 = vmax.f32 %v2758_v11, 0.0  ;;  %v8020_v2 = vld [vmem:[#allocation24_spill] sm:$0xff]  ;;  %v5342_v56 = vld [vmem:[#allocation4 + $0x1f0] sm:$0xff]  ;;  %v5343_v44 = vld [vmem:[#allocation4 + $0x1e8] sm:$0xff] }
 0x205   :  { %v2715_v18 = vpop.f32.mrf.mxu1  ;;  %v6940_v37 = vld [vmem:[#allocation4 + $0x2b8] sm:$0xff] }
 0x206   :  { %v6898_v42 = vmax.f32 %v6821_v55, %v2812_v20  ;;  %v2773_v49 = vmax.f32 %v2759_v17, 0.0  ;;  %v2760_v48 = vadd.f32 %v2746_v9, %v6386_v10  ;;  %v2747_v52 = vadd.f32 %v2715_v18, %v2598_v39  ;;  %v6907_v55 = vld [vmem:[#allocation4 + $0x2e0] sm:$0xff]  ;;  %v2590_v20 = vpop.f32.mrf.mxu0  ;;  %v6950_v18 = vld [vmem:[#allocation4 + $0x2a8] sm:$0xff] }
 0x207   :  { %v2719_v3 = vpop.f32.mrf.mxu1  ;;  %v2604_v39 = vadd.f32 %v2584_v0, %v2483_v36 }
 0x208   :  { %v2813_v38 = vmax.f32 %v2772_v31, %v2773_v49  ;;  %v2761_v59 = vadd.f32 %v2747_v52, %v6392_v25  ;;  %v2748_v12 = vadd.f32 %v2719_v3, %v2599_v33  ;;  %2956 = vmatmul.mubr.f32.vlgmr.msra.gmra.mxu0 %v6898_v42  ;;  %v2774_v29 = vmax.f32 %v2760_v48, 0.0  ;;  %v5344_v33 = vld [vmem:[#allocation4 + $0x1e0] sm:$0xff]  ;;  %v5345_v52 = vld [vmem:[#allocation4 + $0x1d8] sm:$0xff] }
 0x209   :  { %3115 = vmatpush1.msra.mxu0 %v6901_v45  ;;  %v2721_v24 = vpop.f32.mrf.mxu1  ;;  %2961 = vmatprep.mubr.f32.mxu0 %v7988_v6  ;;  %v2605_v49 = vadd.f32 %v2588_v8, %v6883_v62  ;;  %v6954_v3 = vld [vmem:[#allocation4 + $0x2a0] sm:$0xff]  ;;  %v5346_v62 = vld [vmem:[#allocation4 + $0x1d0] sm:$0xff] }
 0x20a   :  { %v6918_v46 = vmax.f32 %v8017_v47, %v2813_v38  ;;  %v2775_v14 = vmax.f32 %v2761_v59, 0.0  ;;  %v2762_v22 = vadd.f32 %v2748_v12, %v6386_v10  ;;  %v2749_v27 = vadd.f32 %v2721_v24, %v2600_v26  ;;  %3116 = vmatprep.subr.mxu0 %v6903_v19  ;;  %v8021_v38 = vld [vmem:[#allocation25_spill] sm:$0xff] }
 0x20b   :  { %3117 = vmatpush1.msra.mxu0 %v6907_v55  ;;  %v2725_v13 = vpop.f32.mrf.mxu1  ;;  %v2606_v26 = vadd.f32 %v2590_v20, %v6885_v1  ;;  %v7001_v20 = vld [vmem:[#allocation4 + $0x260] sm:$0xff] }
 0x20c   :  { %v2814_v58 = vmax.f32 %v2774_v29, %v2775_v14  ;;  %v2763_v51 = vadd.f32 %v2749_v27, %v6392_v25  ;;  %v2750_v23 = vadd.f32 %v2725_v13, %v2601_v7  ;;  %3118 = vmatprep.subr.mxu0 %v6915_v4  ;;  %2962 = vmatmul.mubr.f32.gmra.mxu0 %v6918_v46  ;;  %v2776_v34 = vmax.f32 %v2762_v22, 0.0  ;;  %v6964_v7 = vld [vmem:[#allocation4 + $0x298] sm:$0xff]  ;;  %v5347_v29 = vld [vmem:[#allocation4 + $0x1c8] sm:$0xff]  ;;  %v5348_v14 = vld [vmem:[#allocation4 + $0x1c0] sm:$0xff] }
 0x20d   :  { %3119 = vmatpush1.msra.mxu0 %v6922_v43  ;;  %3317 = vmatmul.mubr.f32.vlgmr.msra.gmra.mxu1 %v6918_v46  ;;  %v2727_v54 = vpop.f32.mrf.mxu1  ;;  %v6970_v27 = vld [vmem:[#allocation4 + $0x290] sm:$0xff]  ;;  %v6978_v13 = vld [vmem:[#allocation4 + $0x280] sm:$0xff] }
 0x20e   :  { %v6937_v50 = vmax.f32 %v8020_v2, %v2814_v58  ;;  %v2777_v5 = vmax.f32 %v2763_v51, 0.0  ;;  %3527 = vmatpush1.msra.mxu1 %v5342_v56  ;;  %v2751_v11 = vadd.f32 %v2727_v54, %v2602_v63  ;;  %3120 = vmatprep.subr.mxu0 %v6927_v57  ;;  %v2764_v9 = vadd.f32 %v2750_v23, %v6386_v10  ;;  %v5350_v23 = vld [vmem:[#allocation4 + $0x1b0] sm:$0xff]  ;;  %v6986_v2 = vld [vmem:[#allocation4 + $0x278] sm:$0xff]  ;;  %v5352_v56 = vld [vmem:[#allocation4 + $0x1a0] sm:$0xff] }
 0x20f   :  { %3528 = vmatprep.subr.mxu1 %v5343_v44  ;;  %3121 = vmatpush1.msra.mxu0 %v6932_v28  ;;  %v2731_v35 = vpop.f32.mrf.mxu1 }
 0x210   :  { %v2815_v17 = vmax.f32 %v2776_v34, %v2777_v5  ;;  %v2765_v15 = vadd.f32 %v2751_v11, %v6392_v25  ;;  %3529 = vmatpush1.msra.mxu1 %v5344_v33  ;;  %2967 = vmatprep.mubr.f32.mxu0 %v7988_v6  ;;  %v2752_v31 = vadd.f32 %v2731_v35, %v2603_v41  ;;  %v2778_v12 = vmax.f32 %v2764_v9, 0.0  ;;  %v5351_v34 = vld [vmem:[#allocation4 + $0x1a8] sm:$0xff]  ;;  %v6992_v11 = vld [vmem:[#allocation4 + $0x270] sm:$0xff]  ;;  %v5353_v35 = vld [vmem:[#allocation4 + $0x198] sm:$0xff] }
 0x211   :  { %3122 = vmatprep.subr.mxu0 %v6940_v37  ;;  %3322 = vmatprep.mubr.f32.mxu1 %v7988_v6  ;;  %v2733_v21 = vpop.f32.mrf.mxu1  ;;  %v6996_v41 = vld [vmem:[#allocation4 + $0x268] sm:$0xff]  ;;  %v8024_v9 = vld [vmem:[#allocation27_spill] sm:$0xff] }
 0x212   :  { %v2779_v48 = vmax.f32 %v2765_v15, 0.0  ;;  %3530 = vmatprep.subr.mxu1 %v5345_v52  ;;  %2968 = vmatmul.mubr.f32.gmra.mxu0 %v6937_v50  ;;  %v2753_v16 = vadd.f32 %v2733_v21, %v2604_v39  ;;  %v6960_v59 = vmax.f32 %v8021_v38, %v2815_v17  ;;  %v2766_v1 = vadd.f32 %v2752_v31, %v6386_v10  ;;  %v8023_v39 = vld [vmem:[#allocation28_spill] sm:$0xff]  ;;  %v5354_v33 = vld [vmem:[#allocation4 + $0x190] sm:$0xff]  ;;  %v5355_v31 = vld [vmem:[#allocation4 + $0x188] sm:$0xff] }
 0x213   :  { %3123 = vmatpush1.msra.mxu0 %v6946_v60  ;;  %3323 = vmatmul.mubr.f32.gmra.mxu1 %v6937_v50  ;;  %v2737_v0 = vpop.f32.mrf.mxu1  ;;  %v7005_v17 = vld [vmem:[#allocation4 + $0x258] sm:$0xff]  ;;  %v7012_v21 = vld [vmem:[#allocation4 + $0x250] sm:$0xff] }
 0x214   :  { %3531 = vmatpush1.msra.mxu1 %v5346_v62  ;;  %v2767_v32 = vadd.f32 %v2753_v16, %v6392_v25  ;;  %3124 = vmatprep.subr.mxu0 %v6950_v18  ;;  %v2754_v61 = vadd.f32 %v2737_v0, %v2605_v49  ;;  %v2816_v47 = vmax.f32 %v2778_v12, %v2779_v48  ;;  %v2780_v58 = vmax.f32 %v2766_v1, 0.0  ;;  %v5356_v49 = vld [vmem:[#allocation4 + $0x180] sm:$0xff]  ;;  %v7015_v48 = vld [vmem:[#allocation4 + $0x248] sm:$0xff]  ;;  %v5357_v52 = vld [vmem:[#allocation4 + $0x178] sm:$0xff] }
 0x215   :  { %3532 = vmatprep.subr.mxu1 %v5347_v29  ;;  %3125 = vmatpush1.msra.mxu0 %v6954_v3  ;;  %v2739_v24 = vpop.f32.mrf.mxu1  ;;  %v7018_v16 = vld [vmem:[#allocation4 + $0x240] sm:$0xff]  ;;  %v5358_v0 = vld [vmem:[#allocation4 + $0x170] sm:$0xff]  ;;  %v5359_v12 = vld [vmem:[#allocation4 + $0x168] sm:$0xff] }
 0x216   :  { %3533 = vmatpush1.msra.mxu1 %v5348_v14  ;;  %v2768_v22 = vadd.f32 %v2754_v61, %v6386_v10  ;;  %2973 = vmatprep.mubr.f32.mxu0 %v7988_v6  ;;  %v2755_v30 = vadd.f32 %v2739_v24, %v2606_v26  ;;  %v2781_v63 = vmax.f32 %v2767_v32, 0.0  ;;  %v8022_v10 = vld [vmem:[#allocation26_spill] sm:$0xff]  ;;  %v7022_v26 = vld [vmem:[#allocation4 + $0x238] sm:$0xff]  ;;  %v7025_v38 = vld [vmem:[#allocation4 + $0x230] sm:$0xff] }
 0x217   :  { %3126 = vmatprep.subr.mxu0 %v6964_v7  ;;  %3328 = vmatprep.mubr.f32.mxu1 %v7988_v6  ;;  %v6983_v8 = vmax.f32 %v8022_v10, %v2816_v47  ;;  %v7028_v62 = vld [vmem:[#allocation4 + $0x228] sm:$0xff]  ;;  %v5360_v32 = vld [vmem:[#allocation4 + $0x160] sm:$0xff]  ;;  %v5361_v1 = vld [vmem:[#allocation4 + $0x158] sm:$0xff] }
 0x218   :  { %3534 = vmatprep.subr.mxu1 %v5349_v53  ;;  %2974 = vmatmul.mubr.f32.gmra.mxu0 %v6960_v59  ;;  %v2769_v36 = vadd.f32 %v2755_v30, %v6392_v25  ;;  %v2782_v51 = vmax.f32 %v2768_v22, 0.0  ;;  %v2817_v25 = vmax.f32 %v2780_v58, %v2781_v63  ;;  %v7031_v61 = vld [vmem:[#allocation4 + $0x220] sm:$0xff]  ;;  %v7034_v29 = vld [vmem:[#allocation4 + $0x218] sm:$0xff]  ;;  %v5362_v24 = vld [vmem:[#allocation4 + $0x150] sm:$0xff] }
 0x219   :  { %3127 = vmatpush1.msra.mxu0 %v6970_v27  ;;  %3329 = vmatmul.mubr.f32.gmra.mxu1 %v6960_v59  ;;  %v7037_v47 = vld [vmem:[#allocation4 + $0x210] sm:$0xff]  ;;  %v5363_v14 = vld [vmem:[#allocation4 + $0x148] sm:$0xff]  ;;  %v5364_v30 = vld [vmem:[#allocation4 + $0x140] sm:$0xff] }
 0x21a   :  { %3535 = vmatpush1.msra.mxu1 %v5350_v23  ;;  %v2783_v54 = vmax.f32 %v2769_v36, 0.0  ;;  %3128 = vmatprep.subr.mxu0 %v6974_v40  ;;  %v7008_v15 = vmax.f32 %v8024_v9, %v2817_v25  ;;  %v7040_v22 = vld [vmem:[#allocation4 + $0x208] sm:$0xff]  ;;  %v7043_v63 = vld [vmem:[#allocation4 + $0x200] sm:$0xff]  ;;  %v5365_v53 = vld [vmem:[#allocation4 + $0x138] sm:$0xff] }
 0x21b   :  { %3536 = vmatprep.subr.mxu1 %v5351_v34  ;;  %3129 = vmatpush1.msra.mxu0 %v6978_v13  ;;  %v5366_v36 = vld [vmem:[#allocation4 + $0x130] sm:$0xff]  ;;  %v7047_v10 = vld [vmem:[#allocation4 + $0x4f8] sm:$0xff]  ;;  %v8025_v58 = vld [vmem:[#allocation9_spill] sm:$0xff] }
 0x21c   :  { %v6989_v5 = vmax.f32 %v2782_v51, %v2783_v54  ;;  %3537 = vmatpush1.msra.mxu1 %v5352_v56  ;;  %2979 = vmatprep.mubr.f32.mxu0 %v7988_v6  ;;  %v7051_v51 = vld [vmem:[#allocation4 + $0x4f0] sm:$0xff]  ;;  %v7055_v54 = vld [vmem:[#allocation4 + $0x4e8] sm:$0xff]  ;;  %v8027_v34 = vld [vmem:[#allocation16_spill] sm:$0xff] }
 0x21d   :  { %3130 = vmatprep.subr.mxu0 %v6986_v2  ;;  %3334 = vmatprep.mubr.f32.mxu1 %v7988_v6  ;;  %v8026_v23 = vld [vmem:[#allocation19_spill] sm:$0xff]  ;;  %v7061_v56 = vld [vmem:[#allocation4 + $0x4e0] sm:$0xff] }
 0x21e   :  { %v2825_v44 = vmax.f32 %v8023_v39, %v6989_v5  ;;  %3538 = vmatprep.subr.mxu1 %v5353_v35  ;;  %2980 = vmatmul.mubr.f32.gmra.mxu0 %v6983_v8  ;;  %v8028_v25 = vld [vmem:[#allocation15_spill] sm:$0xff]  ;;  %v8029_v35 = vld [vmem:[#allocation20_spill] sm:$0xff]  ;;  %v8030_v9 = vld [vmem:[#allocation21_spill] sm:$0xff] }
 0x21f   :  { %3131 = vmatpush1.msra.mxu0 %v6992_v11  ;;  %3335 = vmatmul.mubr.f32.gmra.mxu1 %v6983_v8  ;;  %v5429_v5 = vld [vmem:[#allocation4 + $0x308] sm:$0xff]  ;;  %v5430_v39 = vld [vmem:[#allocation4 + $0x300] sm:$0xff] }
 0x220   :  { %3539 = vmatpush1.msra.mxu1 %v5354_v33  ;;  %3132 = vmatprep.subr.mxu0 %v6996_v41  ;;  %v7067_v33 = vld [vmem:[#allocation4 + $0x4d8] sm:$0xff] }
 0x221   :  { %3540 = vmatprep.subr.mxu1 %v5355_v31  ;;  %3133 = vmatpush1.msra.mxu0 %v7001_v20  ;;  %v8031_v31 = vld [vmem:[#allocation22_spill] sm:$0xff] }
 0x222   :  { %3541 = vmatpush1.msra.mxu1 %v5356_v49  ;;  %3134 = vmatprep.subr.mxu0 %v7005_v17  ;;  %v7071_v49 = vld [vmem:[#allocation4 + $0x4d0] sm:$0xff] }
 0x223   :  { %3340 = vmatprep.mubr.f32.mxu1 %v7988_v6  ;;  %3542 = vmatprep.subr.mxu1 %v5357_v52  ;;  %v8032_v52 = vld [vmem:[#allocation10_spill] sm:$0xff] }
 0x224   :  { %3135 = vmatpush1.msra.mxu0 %v7012_v21  ;;  %3341 = vmatmul.mubr.f32.gmra.mxu1 %v7008_v15 }
 0x225   :  { %3543 = vmatpush1.msra.mxu1 %v5358_v0  ;;  %3136 = vmatprep.subr.mxu0 %v7015_v48  ;;  %v7075_v0 = vld [vmem:[#allocation4 + $0x4c8] sm:$0xff] }
 0x226   :  { %3544 = vmatprep.subr.mxu1 %v5359_v12  ;;  %3137 = vmatpush1.msra.mxu0 %v7018_v16  ;;  %v8033_v12 = vld [vmem:[#allocation23_spill] sm:$0xff] }
 0x227   :  { %3545 = vmatpush1.msra.mxu1 %v5360_v32  ;;  %3138 = vmatprep.subr.mxu0 %v7022_v26  ;;  %v7081_v32 = vld [vmem:[#allocation4 + $0x4c0] sm:$0xff] }
 0x228   :  { %3546 = vmatprep.subr.mxu1 %v5361_v1  ;;  %3139 = vmatpush1.msra.mxu0 %v7025_v38  ;;  %v7087_v1 = vld [vmem:[#allocation4 + $0x4b8] sm:$0xff] }
 0x229   :  { %3547 = vmatpush1.msra.mxu1 %v5362_v24  ;;  %3140 = vmatprep.subr.mxu0 %v7028_v62  ;;  %v7091_v24 = vld [vmem:[#allocation4 + $0x4b0] sm:$0xff] }
 0x22a   :  { %3548 = vmatprep.subr.mxu1 %v5363_v14  ;;  %3141 = vmatpush1.msra.mxu0 %v7031_v61  ;;  %v8034_v14 = vld [vmem:[#allocation14_spill] sm:$0xff] }
 0x22b   :  { %3549 = vmatpush1.msra.mxu1 %v5364_v30  ;;  %3142 = vmatprep.subr.mxu0 %v7034_v29  ;;  %v7095_v30 = vld [vmem:[#allocation4 + $0x4a8] sm:$0xff] }
 0x22c   :  { %3550 = vmatprep.subr.mxu1 %v5365_v53  ;;  %3143 = vmatpush1.msra.mxu0 %v7037_v47  ;;  %v7115_v53 = vld [vmem:[#allocation4 + $0x488] sm:$0xff] }
 0x22d   :  { %3551 = vmatpush1.msra.mxu1 %v5366_v36  ;;  %3144 = vmatprep.subr.mxu0 %v7040_v22  ;;  %v7135_v36 = vld [vmem:[#allocation4 + $0x468] sm:$0xff] }
 0x22e   :  { %3552 = vmatprep.subr.mxu1 %v8025_v58  ;;  %3145 = vmatpush1.msra.mxu0 %v7043_v63  ;;  %v7153_v58 = vld [vmem:[#allocation4 + $0x448] sm:$0xff] }
 0x22f   :  { %3178 = vmatprep.mubr.f32.mxu0 %v7988_v6  ;;  %3553 = vmatpush1.msra.mxu1 %v8026_v23  ;;  %v5380_v23 = vld [vmem:[#allocation4 + $0x90] sm:$0xff] }
 0x230   :  { %3179 = vmatmul.mubr.f32.vlgmr.msra.gmra.mxu0 %v8027_v34  ;;  %3390 = vmatprep.subr.mxu0 %v7047_v10 }
 0x231   :  { %3554 = vmatprep.subr.mxu1 %v8028_v25  ;;  %3391 = vmatpush1.msra.mxu0 %v7051_v51  ;;  %v8037_v25 = vld [vmem:[#allocation13_spill] sm:$0xff] }
 0x232   :  { %3555 = vmatpush1.msra.mxu1 %v8029_v35  ;;  %3392 = vmatprep.subr.mxu0 %v7055_v54  ;;  %v5384_v35 = vld [vmem:[#allocation4 + $0x70] sm:$0xff] }
 0x233   :  { %3556 = vmatprep.subr.mxu1 %v8030_v9  ;;  %3184 = vmatprep.mubr.f32.mxu0 %v7988_v6  ;;  %v5385_v9 = vld [vmem:[#allocation4 + $0x68] sm:$0xff] }
 0x234   :  { %3393 = vmatpush1.msra.mxu0 %v7061_v56  ;;  %3557 = vmatpush1.msra.mxu1 %v8031_v31  ;;  %v5387_v31 = vld [vmem:[#allocation4 + $0x58] sm:$0xff] }
 0x235   :  { %3590 = vmatprep.mubr.f32.mxu1 %v7988_v6  ;;  %3185 = vmatmul.mubr.f32.gmra.mxu0 %v8032_v52 }
 0x236   :  { %3394 = vmatprep.subr.mxu0 %v7067_v33  ;;  %3591 = vmatmul.mubr.f32.vlgmr.msra.gmra.mxu1 %v8027_v34  ;;  %v5382_v34 = vld [vmem:[#allocation4 + $0x80] sm:$0xff] }
 0x237   :  { %3716 = vmatprep.subr.mxu1 %v8033_v12  ;;  %3395 = vmatpush1.msra.mxu0 %v7071_v49  ;;  %v5390_v12 = vld [vmem:[#allocation4 + $0x40] sm:$0xff] }
 0x238   :  { %3717 = vmatpush1.msra.mxu1 %v6901_v45  ;;  %3396 = vmatprep.subr.mxu0 %v7075_v0  ;;  %v7101_v45 = vld [vmem:[#allocation4 + $0x4a0] sm:$0xff] }
 0x239   :  { %3718 = vmatprep.subr.mxu1 %v6903_v19  ;;  %3190 = vmatprep.mubr.f32.mxu0 %v7988_v6  ;;  %v7107_v19 = vld [vmem:[#allocation4 + $0x498] sm:$0xff] }
 0x23a   :  { %3397 = vmatpush1.msra.mxu0 %v7081_v32  ;;  %3596 = vmatprep.mubr.f32.mxu1 %v7988_v6 }
 0x23b   :  { %3719 = vmatpush1.msra.mxu1 %v6907_v55  ;;  %3191 = vmatmul.mubr.f32.gmra.mxu0 %v8034_v14  ;;  %v7111_v55 = vld [vmem:[#allocation4 + $0x490] sm:$0xff] }
 0x23c   :  { %3398 = vmatprep.subr.mxu0 %v7087_v1  ;;  %3597 = vmatmul.mubr.f32.gmra.mxu1 %v8032_v52 }
 0x23d   :  { %3720 = vmatprep.subr.mxu1 %v6915_v4  ;;  %3399 = vmatpush1.msra.mxu0 %v7091_v24  ;;  %v8035_v4 = vld [vmem:[#allocation12_spill] sm:$0xff] }
 0x23e   :  { %3721 = vmatpush1.msra.mxu1 %v6922_v43  ;;  %3400 = vmatprep.subr.mxu0 %v7095_v30  ;;  %v7121_v43 = vld [vmem:[#allocation4 + $0x480] sm:$0xff] }
 0x23f   :  { %3722 = vmatprep.subr.mxu1 %v6927_v57  ;;  %3196 = vmatprep.mubr.f32.mxu0 %v7988_v6  ;;  %v7127_v57 = vld [vmem:[#allocation4 + $0x478] sm:$0xff] }
 0x240   :  { %3401 = vmatpush1.msra.mxu0 %v7101_v45  ;;  %3602 = vmatprep.mubr.f32.mxu1 %v7988_v6 }
 0x241   :  { %3723 = vmatpush1.msra.mxu1 %v6932_v28  ;;  %3197 = vmatmul.mubr.f32.gmra.mxu0 %v8035_v4  ;;  %v7131_v28 = vld [vmem:[#allocation4 + $0x470] sm:$0xff] }
 0x242   :  { %3402 = vmatprep.subr.mxu0 %v7107_v19  ;;  %3603 = vmatmul.mubr.f32.gmra.mxu1 %v8034_v14 }
 0x243   :  { %3724 = vmatprep.subr.mxu1 %v6940_v37  ;;  %3403 = vmatpush1.msra.mxu0 %v7111_v55  ;;  %v8036_v37 = vld [vmem:[#allocation17_spill] sm:$0xff] }
 0x244   :  { %3725 = vmatpush1.msra.mxu1 %v6946_v60  ;;  %3404 = vmatprep.subr.mxu0 %v7115_v53  ;;  %v7139_v60 = vld [vmem:[#allocation4 + $0x460] sm:$0xff] }
 0x245   :  { %3726 = vmatprep.subr.mxu1 %v6950_v18  ;;  %3202 = vmatprep.mubr.f32.mxu0 %v7988_v6  ;;  %v7145_v18 = vld [vmem:[#allocation4 + $0x458] sm:$0xff] }
 0x246   :  { %3405 = vmatpush1.msra.mxu0 %v7121_v43  ;;  %3608 = vmatprep.mubr.f32.mxu1 %v7988_v6 }
 0x247   :  { %3727 = vmatpush1.msra.mxu1 %v6954_v3  ;;  %3203 = vmatmul.mubr.f32.gmra.mxu0 %v8036_v37  ;;  %v7149_v3 = vld [vmem:[#allocation4 + $0x450] sm:$0xff] }
 0x248   :  { %3406 = vmatprep.subr.mxu0 %v7127_v57  ;;  %3609 = vmatmul.mubr.f32.gmra.mxu1 %v8035_v4 }
 0x249   :  { %3728 = vmatprep.subr.mxu1 %v6964_v7  ;;  %3407 = vmatpush1.msra.mxu0 %v7131_v28  ;;  %v7157_v7 = vld [vmem:[#allocation4 + $0x440] sm:$0xff] }
 0x24a   :  { %3729 = vmatpush1.msra.mxu1 %v6970_v27  ;;  %3408 = vmatprep.subr.mxu0 %v7135_v36  ;;  %v7161_v27 = vld [vmem:[#allocation4 + $0x438] sm:$0xff] }
 0x24b   :  { %3730 = vmatprep.subr.mxu1 %v6974_v40  ;;  %3409 = vmatpush1.msra.mxu0 %v7139_v60  ;;  %v7165_v40 = vld [vmem:[#allocation4 + $0x430] sm:$0xff] }
 0x24c   :  { %3614 = vmatprep.mubr.f32.mxu1 %v7988_v6  ;;  %3731 = vmatpush1.msra.mxu1 %v6978_v13  ;;  %v7169_v13 = vld [vmem:[#allocation4 + $0x428] sm:$0xff] }
 0x24d   :  { %3410 = vmatprep.subr.mxu0 %v7145_v18  ;;  %3615 = vmatmul.mubr.f32.gmra.mxu1 %v8036_v37 }
 0x24e   :  { %3732 = vmatprep.subr.mxu1 %v6986_v2  ;;  %3411 = vmatpush1.msra.mxu0 %v7149_v3  ;;  %v7173_v2 = vld [vmem:[#allocation4 + $0x420] sm:$0xff] }
 0x24f   :  { %3733 = vmatpush1.msra.mxu1 %v6992_v11  ;;  %3412 = vmatprep.subr.mxu0 %v7153_v58  ;;  %v7177_v11 = vld [vmem:[#allocation4 + $0x418] sm:$0xff] }
 0x250   :  { %3734 = vmatprep.subr.mxu1 %v6996_v41  ;;  %3413 = vmatpush1.msra.mxu0 %v7157_v7  ;;  %v7181_v41 = vld [vmem:[#allocation4 + $0x410] sm:$0xff] }
 0x251   :  { %3735 = vmatpush1.msra.mxu1 %v7001_v20  ;;  %3414 = vmatprep.subr.mxu0 %v7161_v27  ;;  %v7185_v20 = vld [vmem:[#allocation4 + $0x408] sm:$0xff] }
 0x252   :  { %3736 = vmatprep.subr.mxu1 %v7005_v17  ;;  %3415 = vmatpush1.msra.mxu0 %v7165_v40  ;;  %v7189_v17 = vld [vmem:[#allocation4 + $0x400] sm:$0xff] }
 0x253   :  { %3737 = vmatpush1.msra.mxu1 %v7012_v21  ;;  %3416 = vmatprep.subr.mxu0 %v7169_v13  ;;  %v5367_v21 = vld [vmem:[#allocation4 + $0xf8] sm:$0xff] }
 0x254   :  { %3738 = vmatprep.subr.mxu1 %v7015_v48  ;;  %3417 = vmatpush1.msra.mxu0 %v7173_v2  ;;  %v5368_v48 = vld [vmem:[#allocation4 + $0xf0] sm:$0xff] }
 0x255   :  { %3739 = vmatpush1.msra.mxu1 %v7018_v16  ;;  %3418 = vmatprep.subr.mxu0 %v7177_v11  ;;  %v5369_v16 = vld [vmem:[#allocation4 + $0xe8] sm:$0xff] }
 0x256   :  { %3740 = vmatprep.subr.mxu1 %v7022_v26  ;;  %3419 = vmatpush1.msra.mxu0 %v7181_v41  ;;  %v5370_v26 = vld [vmem:[#allocation4 + $0xe0] sm:$0xff] }
 0x257   :  { %3741 = vmatpush1.msra.mxu1 %v7025_v38  ;;  %3420 = vmatprep.subr.mxu0 %v7185_v20  ;;  %v5371_v38 = vld [vmem:[#allocation4 + $0xd8] sm:$0xff] }
 0x258   :  { %3742 = vmatprep.subr.mxu1 %v7028_v62  ;;  %3421 = vmatpush1.msra.mxu0 %v7189_v17  ;;  %v5372_v62 = vld [vmem:[#allocation4 + $0xd0] sm:$0xff] }
 0x259   :  { %3454 = vmatprep.mubr.f32.mxu0 %v7988_v6  ;;  %3743 = vmatpush1.msra.mxu1 %v7031_v61  ;;  %v5373_v61 = vld [vmem:[#allocation4 + $0xc8] sm:$0xff] }
 0x25a   :  { %3455 = vmatmul.mubr.f32.vlgmr.msra.gmra.mxu0 %v8032_v52  ;;  %3621 = vmatprep.subr.mxu0 %v5367_v21  ;;  %v5421_v21 = vld [vmem:[#allocation4 + $0x348] sm:$0xff] }
 0x25b   :  { %3744 = vmatprep.subr.mxu1 %v7034_v29  ;;  %3622 = vmatpush1.msra.mxu0 %v5368_v48  ;;  %v5374_v29 = vld [vmem:[#allocation4 + $0xc0] sm:$0xff]  ;;  %v5423_v48 = vld [vmem:[#allocation4 + $0x338] sm:$0xff] }
 0x25c   :  { %3745 = vmatpush1.msra.mxu1 %v7037_v47  ;;  %3623 = vmatprep.subr.mxu0 %v5369_v16  ;;  %v5375_v47 = vld [vmem:[#allocation4 + $0xb8] sm:$0xff]  ;;  %v5424_v16 = vld [vmem:[#allocation4 + $0x330] sm:$0xff] }
 0x25d   :  { %3746 = vmatprep.subr.mxu1 %v7040_v22  ;;  %3460 = vmatprep.mubr.f32.mxu0 %v7988_v6  ;;  %v5376_v22 = vld [vmem:[#allocation4 + $0xb0] sm:$0xff] }
 0x25e   :  { %3624 = vmatpush1.msra.mxu0 %v5370_v26  ;;  %3747 = vmatpush1.msra.mxu1 %v7043_v63  ;;  %v5377_v63 = vld [vmem:[#allocation4 + $0xa8] sm:$0xff] }
 0x25f   :  { %3780 = vmatprep.mubr.f32.mxu1 %v7988_v6  ;;  %3461 = vmatmul.mubr.f32.gmra.mxu0 %v8034_v14  ;;  %v5425_v26 = vld [vmem:[#allocation4 + $0x328] sm:$0xff] }
 0x260   :  { %3625 = vmatprep.subr.mxu0 %v5371_v38  ;;  %3781 = vmatmul.mubr.f32.vlgmr.msra.gmra.mxu1 %v6918_v46  ;;  %v5426_v38 = vld [vmem:[#allocation4 + $0x320] sm:$0xff] }
 0x261   :  { %3926 = vmatprep.subr.mxu1 %v7047_v10  ;;  %3626 = vmatpush1.msra.mxu0 %v5372_v62  ;;  %v5378_v10 = vld [vmem:[#allocation4 + $0xa0] sm:$0xff]  ;;  %v5427_v62 = vld [vmem:[#allocation4 + $0x318] sm:$0xff] }
 0x262   :  { %3927 = vmatpush1.msra.mxu1 %v7051_v51  ;;  %3627 = vmatprep.subr.mxu0 %v5373_v61  ;;  %v5379_v51 = vld [vmem:[#allocation4 + $0x98] sm:$0xff]  ;;  %v5428_v61 = vld [vmem:[#allocation4 + $0x310] sm:$0xff] }
 0x263   :  { %3928 = vmatprep.subr.mxu1 %v7055_v54  ;;  %3466 = vmatprep.mubr.f32.mxu0 %v7988_v6  ;;  %v5381_v54 = vld [vmem:[#allocation4 + $0x88] sm:$0xff] }
 0x264   :  { %3628 = vmatpush1.msra.mxu0 %v5374_v29  ;;  %3786 = vmatprep.mubr.f32.mxu1 %v7988_v6 }
 0x265   :  { %3929 = vmatpush1.msra.mxu1 %v7061_v56  ;;  %3467 = vmatmul.mubr.f32.gmra.mxu0 %v8035_v4  ;;  %v5383_v56 = vld [vmem:[#allocation4 + $0x78] sm:$0xff] }
 0x266   :  { %3629 = vmatprep.subr.mxu0 %v5375_v47  ;;  %3787 = vmatmul.mubr.f32.gmra.mxu1 %v6937_v50 }
 0x267   :  { %3930 = vmatprep.subr.mxu1 %v7067_v33  ;;  %3630 = vmatpush1.msra.mxu0 %v5376_v22  ;;  %v5386_v33 = vld [vmem:[#allocation4 + $0x60] sm:$0xff] }
 0x268   :  { %3931 = vmatpush1.msra.mxu1 %v7071_v49  ;;  %3631 = vmatprep.subr.mxu0 %v5377_v63  ;;  %v5388_v49 = vld [vmem:[#allocation4 + $0x50] sm:$0xff] }
 0x269   :  { %3932 = vmatprep.subr.mxu1 %v7075_v0  ;;  %3472 = vmatprep.mubr.f32.mxu0 %v7988_v6  ;;  %v5389_v0 = vld [vmem:[#allocation4 + $0x48] sm:$0xff] }
 0x26a   :  { %3632 = vmatpush1.msra.mxu0 %v5378_v10  ;;  %3792 = vmatprep.mubr.f32.mxu1 %v7988_v6 }
 0x26b   :  { %3933 = vmatpush1.msra.mxu1 %v7081_v32  ;;  %3473 = vmatmul.mubr.f32.gmra.mxu0 %v8036_v37  ;;  %v5391_v32 = vld [vmem:[#allocation4 + $0x38] sm:$0xff] }
 0x26c   :  { %3633 = vmatprep.subr.mxu0 %v5379_v51  ;;  %3793 = vmatmul.mubr.f32.gmra.mxu1 %v6960_v59 }
 0x26d   :  { %3934 = vmatprep.subr.mxu1 %v7087_v1  ;;  %3634 = vmatpush1.msra.mxu0 %v5380_v23  ;;  %v5392_v1 = vld [vmem:[#allocation4 + $0x30] sm:$0xff] }
 0x26e   :  { %3935 = vmatpush1.msra.mxu1 %v7091_v24  ;;  %3635 = vmatprep.subr.mxu0 %v5381_v54  ;;  %v5393_v24 = vld [vmem:[#allocation4 + $0x28] sm:$0xff] }
 0x26f   :  { %3936 = vmatprep.subr.mxu1 %v7095_v30  ;;  %3478 = vmatprep.mubr.f32.mxu0 %v7988_v6  ;;  %v5394_v30 = vld [vmem:[#allocation4 + $0x20] sm:$0xff] }
 0x270   :  { %3636 = vmatpush1.msra.mxu0 %v5382_v34  ;;  %3798 = vmatprep.mubr.f32.mxu1 %v7988_v6  ;;  %v4081_v34 = vld [vmem:[%s7904_s5 + $0x78] sm:$0xff] }
 0x271   :  { %3937 = vmatpush1.msra.mxu1 %v7101_v45  ;;  %3479 = vmatmul.mubr.f32.gmra.mxu0 %v8037_v25  ;;  %v5395_v45 = vld [vmem:[#allocation4 + $0x18] sm:$0xff] }
 0x272   :  { %3637 = vmatprep.subr.mxu0 %v5383_v56  ;;  %3799 = vmatmul.mubr.f32.gmra.mxu1 %v6983_v8 }
 0x273   :  { %3938 = vmatprep.subr.mxu1 %v7107_v19  ;;  %3638 = vmatpush1.msra.mxu0 %v5384_v35  ;;  %v5396_v19 = vld [vmem:[#allocation4 + $0x10] sm:$0xff] }
 0x274   :  { %3939 = vmatpush1.msra.mxu1 %v7111_v55  ;;  %3639 = vmatprep.subr.mxu0 %v5385_v9  ;;  %v5397_v55 = vld [vmem:[#allocation4 + $0x8] sm:$0xff]  ;;  %v4903_v9 = vld [vmem:[%s7904_s5 + $0xf8] sm:$0xff] }
 0x275   :  { %3940 = vmatprep.subr.mxu1 %v7115_v53  ;;  %3640 = vmatpush1.msra.mxu0 %v5386_v33  ;;  %v5398_v53 = vld [vmem:[#allocation4] sm:$0xff]  ;;  %v4079_v33 = vld [vmem:[%s7904_s5 + $0x68] sm:$0xff] }
 0x276   :  { %3804 = vmatprep.mubr.f32.mxu1 %v7988_v6  ;;  %3941 = vmatpush1.msra.mxu1 %v7121_v43  ;;  %v5399_v43 = vld [vmem:[#allocation4 + $0x3f8] sm:$0xff] }
 0x277   :  { %3641 = vmatprep.subr.mxu0 %v5387_v31  ;;  %3805 = vmatmul.mubr.f32.gmra.mxu1 %v7008_v15 }
 0x278   :  { %3942 = vmatprep.subr.mxu1 %v7127_v57  ;;  %3642 = vmatpush1.msra.mxu0 %v5388_v49  ;;  %v5400_v57 = vld [vmem:[#allocation4 + $0x3f0] sm:$0xff] }
 0x279   :  { %3943 = vmatpush1.msra.mxu1 %v7131_v28  ;;  %3643 = vmatprep.subr.mxu0 %v5389_v0  ;;  %v5401_v28 = vld [vmem:[#allocation4 + $0x3e8] sm:$0xff]  ;;  %v4902_v49 = vld [vmem:[%s7904_s5 + $0xf0] sm:$0xff]  ;;  %v4078_v0 = vld [vmem:[%s7904_s5 + $0x60] sm:$0xff] }
 0x27a   :  { %3944 = vmatprep.subr.mxu1 %v7135_v36  ;;  %3644 = vmatpush1.msra.mxu0 %v5390_v12  ;;  %v5402_v36 = vld [vmem:[#allocation4 + $0x3e0] sm:$0xff] }
 0x27b   :  { %3945 = vmatpush1.msra.mxu1 %v7139_v60  ;;  %3645 = vmatprep.subr.mxu0 %v5391_v32  ;;  %v5404_v60 = vld [vmem:[#allocation4 + $0x3d0] sm:$0xff]  ;;  %v4901_v32 = vld [vmem:[%s7904_s5 + $0xe8] sm:$0xff] }
 0x27c   :  { %3946 = vmatprep.subr.mxu1 %v7145_v18  ;;  %3646 = vmatpush1.msra.mxu0 %v5392_v1  ;;  %v5405_v18 = vld [vmem:[#allocation4 + $0x3c8] sm:$0xff]  ;;  %v4077_v1 = vld [vmem:[%s7904_s5 + $0x58] sm:$0xff] }
 0x27d   :  { %3947 = vmatpush1.msra.mxu1 %v7149_v3  ;;  %3647 = vmatprep.subr.mxu0 %v5393_v24  ;;  %v5406_v3 = vld [vmem:[#allocation4 + $0x3c0] sm:$0xff] }
 0x27e   :  { %3948 = vmatprep.subr.mxu1 %v7153_v58  ;;  %3648 = vmatpush1.msra.mxu0 %v5394_v30  ;;  %v5407_v58 = vld [vmem:[#allocation4 + $0x3b8] sm:$0xff]  ;;  %v4900_v24 = vld [vmem:[%s7904_s5 + $0xe0] sm:$0xff] }
 0x27f   :  { %3949 = vmatpush1.msra.mxu1 %v7157_v7  ;;  %3649 = vmatprep.subr.mxu0 %v5395_v45  ;;  %v5409_v7 = vld [vmem:[#allocation4 + $0x3a8] sm:$0xff]  ;;  %v4076_v45 = vld [vmem:[%s7904_s5 + $0x50] sm:$0xff] }
 0x280   :  { %3950 = vmatprep.subr.mxu1 %v7161_v27  ;;  %3650 = vmatpush1.msra.mxu0 %v5396_v19  ;;  %v5410_v27 = vld [vmem:[#allocation4 + $0x3a0] sm:$0xff]  ;;  %v4899_v19 = vld [vmem:[%s7904_s5 + $0xd8] sm:$0xff] }
 0x281   :  { %3951 = vmatpush1.msra.mxu1 %v7165_v40  ;;  %3651 = vmatprep.subr.mxu0 %v5397_v55  ;;  %v5411_v40 = vld [vmem:[#allocation4 + $0x398] sm:$0xff]  ;;  %v4075_v55 = vld [vmem:[%s7904_s5 + $0x48] sm:$0xff] }
 0x282   :  { %3952 = vmatprep.subr.mxu1 %v7169_v13  ;;  %3652 = vmatpush1.msra.mxu0 %v5398_v53  ;;  %v5413_v13 = vld [vmem:[#allocation4 + $0x388] sm:$0xff] }
 0x283   :  { %3685 = vmatprep.mubr.f32.mxu0 %v7988_v6  ;;  %3953 = vmatpush1.msra.mxu1 %v7173_v2  ;;  %v5414_v2 = vld [vmem:[#allocation4 + $0x380] sm:$0xff] }
 0x284   :  { %3686 = vmatmul.mubr.f32.vlgmr.msra.gmra.mxu0 %v6898_v42  ;;  %3821 = vmatprep.subr.mxu0 %v5399_v43  ;;  %v5403_v42 = vld [vmem:[#allocation4 + $0x3d8] sm:$0xff] }
 0x285   :  { %3954 = vmatprep.subr.mxu1 %v7177_v11  ;;  %3822 = vmatpush1.msra.mxu0 %v5400_v57  ;;  %v5415_v11 = vld [vmem:[#allocation4 + $0x378] sm:$0xff] }
 0x286   :  { %3955 = vmatpush1.msra.mxu1 %v7181_v41  ;;  %3823 = vmatprep.subr.mxu0 %v5401_v28  ;;  %v5417_v41 = vld [vmem:[#allocation4 + $0x368] sm:$0xff]  ;;  %v4898_v28 = vld [vmem:[%s7904_s5 + $0xd0] sm:$0xff] }
 0x287   :  { %3956 = vmatprep.subr.mxu1 %v7185_v20  ;;  %3691 = vmatprep.mubr.f32.mxu0 %v7988_v6  ;;  %v5418_v20 = vld [vmem:[#allocation4 + $0x360] sm:$0xff] }
 0x288   :  { %3824 = vmatpush1.msra.mxu0 %v5402_v36  ;;  %3957 = vmatpush1.msra.mxu1 %v7189_v17  ;;  %v5419_v17 = vld [vmem:[#allocation4 + $0x358] sm:$0xff]  ;;  %v4074_v36 = vld [vmem:[%s7904_s5 + $0x40] sm:$0xff] }
 0x289   :  { %3990 = vmatprep.mubr.f32.mxu1 %v7988_v6  ;;  %3692 = vmatmul.mubr.f32.gmra.mxu0 %v6918_v46  ;;  %v5408_v46 = vld [vmem:[#allocation4 + $0x3b0] sm:$0xff] }
 0x28a   :  { %3825 = vmatprep.subr.mxu0 %v5403_v42  ;;  %3991 = vmatmul.mubr.f32.vlgmr.msra.gmra.mxu1 %v6937_v50  ;;  %v4897_v42 = vld [vmem:[%s7904_s5 + $0xc8] sm:$0xff] }
 0x28b   :  { %3826 = vmatpush1.msra.mxu0 %v5404_v60  ;;  %3697 = vmatprep.mubr.f32.mxu0 %v7988_v6  ;;  %v4073_v60 = vld [vmem:[%s7904_s5 + $0x38] sm:$0xff] }
 0x28c   :  { %3827 = vmatprep.subr.mxu0 %v5405_v18  ;;  %3996 = vmatprep.mubr.f32.mxu1 %v7988_v6 }
 0x28d   :  { %3828 = vmatpush1.msra.mxu0 %v5406_v3  ;;  %5109 = vmatprep.subr.mxu1 %v7988_v6  ;;  %v4896_v3 = vld [vmem:[%s7904_s5 + $0xc0] sm:$0xff] }
 0x28e   :  { %3698 = vmatmul.mubr.f32.gmra.mxu0 %v6937_v50  ;;  %3829 = vmatprep.subr.mxu0 %v5407_v58  ;;  %v5412_v50 = vld [vmem:[#allocation4 + $0x390] sm:$0xff] }
 0x28f   :  { %3997 = vmatmul.mubr.f32.gmra.mxu1 %v6960_v59  ;;  %3830 = vmatpush1.msra.mxu0 %v5408_v46  ;;  %v4072_v58 = vld [vmem:[%s7904_s5 + $0x30] sm:$0xff] }
 0x290   :  { %3831 = vmatprep.subr.mxu0 %v5409_v7  ;;  %3703 = vmatprep.mubr.f32.mxu0 %v7988_v6  ;;  %v4895_v7 = vld [vmem:[%s7904_s5 + $0xb8] sm:$0xff] }
 0x291   :  { %3832 = vmatpush1.msra.mxu0 %v5410_v27  ;;  %4002 = vmatprep.mubr.f32.mxu1 %v7988_v6  ;;  %v4071_v27 = vld [vmem:[%s7904_s5 + $0x28] sm:$0xff] }
 0x292   :  { %3704 = vmatmul.mubr.f32.gmra.mxu0 %v6960_v59  ;;  %3833 = vmatprep.subr.mxu0 %v5411_v40  ;;  %v5416_v59 = vld [vmem:[#allocation4 + $0x370] sm:$0xff] }
 0x293   :  { %4003 = vmatmul.mubr.f32.gmra.mxu1 %v6983_v8  ;;  %3834 = vmatpush1.msra.mxu0 %v5412_v50  ;;  %v4894_v40 = vld [vmem:[%s7904_s5 + $0xb0] sm:$0xff]  ;;  %v4070_v50 = vld [vmem:[%s7904_s5 + $0x20] sm:$0xff] }
 0x294   :  { %3835 = vmatprep.subr.mxu0 %v5413_v13  ;;  %3709 = vmatprep.mubr.f32.mxu0 %v7988_v6 }
 0x295   :  { %3836 = vmatpush1.msra.mxu0 %v5414_v2  ;;  %4008 = vmatprep.mubr.f32.mxu1 %v7988_v6  ;;  %v4893_v2 = vld [vmem:[%s7904_s5 + $0xa8] sm:$0xff] }
 0x296   :  { %3710 = vmatmul.mubr.f32.gmra.mxu0 %v6983_v8  ;;  %3837 = vmatprep.subr.mxu0 %v5415_v11  ;;  %v5420_v8 = vld [vmem:[#allocation4 + $0x350] sm:$0xff]  ;;  %v4069_v11 = vld [vmem:[%s7904_s5 + $0x18] sm:$0xff] }
 0x297   :  { %4009 = vmatmul.mubr.f32.gmra.mxu1 %v7008_v15  ;;  %3838 = vmatpush1.msra.mxu0 %v5416_v59  ;;  %v5422_v15 = vld [vmem:[#allocation4 + $0x340] sm:$0xff] }
 0x298   :  { %3839 = vmatprep.subr.mxu0 %v5417_v41  ;;  %4014 = vmatprep.mubr.f32.mxu1 %v7988_v6  ;;  %v4892_v59 = vld [vmem:[%s7904_s5 + $0xa0] sm:$0xff]  ;;  %v4068_v41 = vld [vmem:[%s7904_s5 + $0x10] sm:$0xff] }
 0x299   :  { %3840 = vmatpush1.msra.mxu0 %v5418_v20  ;;  %3885 = vmatprep.mubr.f32.mxu0 %v7988_v6 }
 0x29a   :  { %3841 = vmatprep.subr.mxu0 %v5419_v17  ;;  %5110 = vmatpush3.msra.mxu1 %v4081_v34 }
 0x29b   :  { %4015 = vmatmul.mubr.f32.gmra.mxu1 %v2825_v44  ;;  %3842 = vmatpush1.msra.mxu0 %v5420_v8  ;;  %v7288_v44 = vpop.f32.mrf.mxu1  ;;  %v4891_v8 = vld [vmem:[%s7904_s5 + $0x98] sm:$0xff] }
 0x29c   :  { %3843 = vmatprep.subr.mxu0 %v5421_v21  ;;  %5111 = vmatprep.subr.mxu1 %v7988_v6  ;;  %v4067_v21 = vld [vmem:[%s7904_s5 + $0x8] sm:$0xff] }
 0x29d   :  { %3844 = vmatpush1.msra.mxu0 %v5422_v15  ;;  %5141 = vmatprep.mubr.msk.f32.mxu1 %vm5503_vm1, %v7988_v6 }
 0x29e   :  { %3845 = vmatprep.subr.mxu0 %v5423_v48  ;;  %v4890_v48 = vld [vmem:[%s7904_s5 + $0x90] sm:$0xff] }
 0x29f   :  { %3846 = vmatpush1.msra.mxu0 %v5424_v16  ;;  %v4066_v16 = vld [vmem:[%s7904_s5] sm:$0xff] }
 0x2a0   :  { %3847 = vmatprep.subr.mxu0 %v5425_v26 }
 0x2a1   :  { %3848 = vmatpush1.msra.mxu0 %v5426_v38 }
 0x2a2   :  { %3849 = vmatprep.subr.mxu0 %v5427_v62  ;;  %v4889_v62 = vld [vmem:[%s7904_s5 + $0x88] sm:$0xff] }
 0x2a3   :  { %3850 = vmatpush1.msra.mxu0 %v5428_v61 }
 0x2a4   :  { %3851 = vmatprep.subr.mxu0 %v5429_v5  ;;  %v4888_v5 = vld [vmem:[%s7904_s5 + $0x80] sm:$0xff] }
 0x2a5   :  { %3852 = vmatpush1.msra.mxu0 %v5430_v39 }
 0x2a6   :  { %3886 = vmatmul.mubr.f32.vlgmr.msra.gmra.mxu0 %v8032_v52  ;;  %5074 = vmatprep.subr.mxu0 %v7988_v6  ;;  %v7290_v52 = vpop.f32.mrf.mxu1 }
 0x2a7   :  { %3891 = vmatprep.mubr.f32.mxu0 %v7988_v6  ;;  %5075 = vmatpush3.msra.mxu0 %v4903_v9 }
 0x2a8   :  { %v7292_v29 = vpop.f32.mrf.mxu1  ;;  %5076 = vmatprep.subr.mxu0 %v7988_v6 }
 0x2a9   :  { %5077 = vmatpush3.msra.mxu0 %v4902_v49 }
 0x2aa   :  { %3892 = vmatmul.mubr.f32.gmra.mxu0 %v8034_v14  ;;  %v7294_v47 = vpop.f32.mrf.mxu1  ;;  %5078 = vmatprep.subr.mxu0 %v7988_v6 }
 0x2ab   :  { %3897 = vmatprep.mubr.f32.mxu0 %v7988_v6  ;;  %5079 = vmatpush3.msra.mxu0 %v4901_v32 }
 0x2ac   :  { %5080 = vmatprep.subr.mxu0 %v7988_v6 }
 0x2ad   :  { %5081 = vmatpush3.msra.mxu0 %v4900_v24 }
 0x2ae   :  { %3898 = vmatmul.mubr.f32.gmra.mxu0 %v8035_v4  ;;  %v7300_v4 = vpop.f32.mrf.mxu1  ;;  %5082 = vmatprep.subr.mxu0 %v7988_v6 }
 0x2af   :  { %3903 = vmatprep.mubr.f32.mxu0 %v7988_v6  ;;  %5083 = vmatpush3.msra.mxu0 %v4899_v19 }
 0x2b0   :  { %v7306_v10 = vpop.f32.mrf.mxu1  ;;  %5084 = vmatprep.subr.mxu0 %v7988_v6 }
 0x2b1   :  { %5085 = vmatpush3.msra.mxu0 %v4898_v28 }
 0x2b2   :  { %3904 = vmatmul.mubr.f32.gmra.mxu0 %v8036_v37  ;;  %v7310_v23 = vpop.f32.mrf.mxu1  ;;  %5086 = vmatprep.subr.mxu0 %v7988_v6 }
 0x2b3   :  { %3909 = vmatprep.mubr.f32.mxu0 %v7988_v6  ;;  %5087 = vmatpush3.msra.mxu0 %v4897_v42 }
 0x2b4   :  { %v7321_v56 = vpop.f32.mrf.mxu1  ;;  %5088 = vmatprep.subr.mxu0 %v7988_v6 }
 0x2b5   :  { %5089 = vmatpush3.msra.mxu0 %v4896_v3 }
 0x2b6   :  { %3910 = vmatmul.mubr.f32.gmra.mxu0 %v8037_v25  ;;  %v4080_v25 = vld [vmem:[%s7904_s5 + $0x70] sm:$0xff]  ;;  %v7342_v12 = vpop.f32.mrf.mxu1  ;;  %5090 = vmatprep.subr.mxu0 %v7988_v6 }
 0x2b7   :  { %5112 = vmatpush3.msra.mxu1 %v4080_v25  ;;  %5091 = vmatpush3.msra.mxu0 %v4895_v7 }
 0x2b8   :  { %5113 = vmatprep.subr.mxu1 %v7988_v6  ;;  %v3078_v53 = vpop.f32.mrf.mxu1  ;;  %5092 = vmatprep.subr.mxu0 %v7988_v6 }
 0x2b9   :  { %5114 = vmatpush3.msra.mxu1 %v4079_v33  ;;  %5093 = vmatpush3.msra.mxu0 %v4894_v40 }
 0x2ba   :  { %5115 = vmatprep.subr.mxu1 %v7988_v6  ;;  %5094 = vmatprep.subr.mxu0 %v7988_v6 }
 0x2bb   :  { %5116 = vmatpush3.msra.mxu1 %v4078_v0  ;;  %5095 = vmatpush3.msra.mxu0 %v4893_v2 }
 0x2bc   :  { %5117 = vmatprep.subr.mxu1 %v7988_v6  ;;  %5096 = vmatprep.subr.mxu0 %v7988_v6 }
 0x2bd   :  { %5118 = vmatpush3.msra.mxu1 %v4077_v1  ;;  %5097 = vmatpush3.msra.mxu0 %v4892_v59 }
 0x2be   :  { %5119 = vmatprep.subr.mxu1 %v7988_v6  ;;  %5098 = vmatprep.subr.mxu0 %v7988_v6 }
 0x2bf   :  { %5120 = vmatpush3.msra.mxu1 %v4076_v45  ;;  %5099 = vmatpush3.msra.mxu0 %v4891_v8 }
 0x2c0   :  { %5121 = vmatprep.subr.mxu1 %v7988_v6  ;;  %5100 = vmatprep.subr.mxu0 %v7988_v6 }
 0x2c1   :  { %5122 = vmatpush3.msra.mxu1 %v4075_v55  ;;  %5101 = vmatpush3.msra.mxu0 %v4890_v48 }
 0x2c2   :  { %5123 = vmatprep.subr.mxu1 %v7988_v6  ;;  %5102 = vmatprep.subr.mxu0 %v7988_v6 }
 0x2c3   :  { %5124 = vmatpush3.msra.mxu1 %v4074_v36  ;;  %5103 = vmatpush3.msra.mxu0 %v4889_v62 }
 0x2c4   :  { %5125 = vmatprep.subr.mxu1 %v7988_v6  ;;  %5104 = vmatprep.subr.mxu0 %v7988_v6 }
 0x2c5   :  { %5126 = vmatpush3.msra.mxu1 %v4073_v60  ;;  %5106 = vmatprep.mubr.msk.f32.mxu0 %vm5503_vm1, %v7988_v6 }
 0x2c6   :  { %5127 = vmatprep.subr.mxu1 %v7988_v6  ;;  %5105 = vmatpush3.msra.mxu0 %v4888_v5 }
 0x2c7   :  { %5128 = vmatpush3.msra.mxu1 %v4072_v58  ;;  %5144 = vmatprep.subr.mxu0 %v7988_v6 }
 0x2c8   :  { %v7296_v14 = vpop.f32.mrf.mxu0  ;;  %5129 = vmatprep.subr.mxu1 %v7988_v6 }
 0x2c9   :  { %5130 = vmatpush3.msra.mxu1 %v4071_v27 }
 0x2ca   :  { %v7298_v22 = vpop.f32.mrf.mxu0  ;;  %5131 = vmatprep.subr.mxu1 %v7988_v6 }
 0x2cb   :  { %5132 = vmatpush3.msra.mxu1 %v4070_v50 }
 0x2cc   :  { %v7302_v63 = vpop.f32.mrf.mxu0  ;;  %5133 = vmatprep.subr.mxu1 %v7988_v6 }
 0x2cd   :  { %v7386_v18 = vpop.f32.mrf.mxu1  ;;  %5134 = vmatpush3.msra.mxu1 %v4069_v11  ;;  %v3059_v11 = vadd.f32 %v7292_v29, %v7302_v63 }
 0x2ce   :  { %v7304_v37 = vpop.f32.mrf.mxu0  ;;  %5135 = vmatprep.subr.mxu1 %v7988_v6 }
 0x2cf   :  { %v7398_v46 = vpop.f32.mrf.mxu1  ;;  %5136 = vmatpush3.msra.mxu1 %v4068_v41  ;;  %v8038_v41 = vld [vmem:[#allocation11_spill] sm:$0xff] }
 0x2d0   :  { %5137 = vmatprep.subr.mxu1 %v7988_v6  ;;  %v8039_v8 = vsub.s32 0, %v8038_v41 }
 0x2d1   :  { %5138 = vmatpush3.msra.mxu1 %v4067_v21 }
 0x2d2   :  { %v7308_v51 = vpop.f32.mrf.mxu0  ;;  %5139 = vmatprep.subr.mxu1 %v7988_v6 }
 0x2d3   :  { %v7416_v13 = vpop.f32.mrf.mxu1  ;;  %5140 = vmatpush3.msra.mxu1 %v4066_v16  ;;  %v3065_v34 = vadd.f32 %v7300_v4, %v7308_v51 }
 0x2d4   :  { %v7312_v54 = vpop.f32.mrf.mxu0  ;;  %5179 = vmatprep.subr.mxu1 %v7988_v6 }
 0x2d5   :  { %v7434_v20 = vpop.f32.mrf.mxu1  ;;  %v3067_v9 = vadd.f32 %v7306_v10, %v7312_v54 }
 0x2d8   :  { %v7323_v35 = vpop.f32.mrf.mxu0 }
 0x2d9   :  { %v3330_v26 = vpop.f32.mrf.mxu1  ;;  %v3071_v24 = vadd.f32 %v7310_v23, %v7323_v35 }
 0x2da   :  { %v7332_v31 = vpop.f32.mrf.mxu0 }
 0x2db   :  { %v3332_v39 = vpop.f32.mrf.mxu1 }
 0x2de   :  { %v7355_v30 = vpop.f32.mrf.mxu0 }
 0x2df   :  { %v3336_v33 = vpop.f32.mrf.mxu1  ;;  %v3077_v10 = vadd.f32 %v7342_v12, %v7355_v30  ;;  %v3053_v12 = vadd.f32 %v7288_v44, %v7296_v14  ;;  %v3055_v30 = vadd.f32 %v7290_v52, %v7298_v22  ;;  %v3061_v52 = vadd.f32 %v7294_v47, %v7304_v37 }
 0x2e0   :  { %v2983_v43 = vpop.f32.mrf.mxu0 }
 0x2e1   :  { %v7368_v57 = vadd.f32 %v3078_v53, %v2983_v43  ;;  %v3338_v45 = vpop.f32.mrf.mxu1  ;;  %v3073_v53 = vadd.f32 %v7321_v56, %v7332_v31 }
 0x2e4   :  { %v3342_v51 = vpop.f32.mrf.mxu1 }
 0x2e6   :  { %v3344_v60 = vpop.f32.mrf.mxu1 }
 0x2f0   :  { %v7436_v17 = vpop.f32.mrf.mxu0 }
 0x2f1   :  { %v3209_v40 = vadd.f32 %v7436_v17, %v3053_v12 }
 0x2f2   :  { %v3182_v15 = vpop.f32.mrf.mxu0 }
 0x2f3   :  { %v3210_v2 = vadd.f32 %v3182_v15, %v3055_v30  ;;  %v3347_v59 = vadd.f32 %v7386_v18, %v3209_v40  ;;  %v8040_v15 = vsub.s32 1, %v8038_v41 }
 0x2f5   :  { %v3186_v38 = vpop.f32.mrf.mxu0  ;;  %v3348_v48 = vadd.f32 %v7398_v46, %v3210_v2 }
 0x2f6   :  { %v7480_v35 = vpop.f32.mrf.mxu1  ;;  %v3211_v14 = vadd.f32 %v3186_v38, %v3059_v11 }
 0x2f7   :  { %v3188_v61 = vpop.f32.mrf.mxu0 }
 0x2f8   :  { %v7487_v31 = vpop.f32.mrf.mxu1  ;;  %v3212_v29 = vadd.f32 %v3188_v61, %v3061_v52  ;;  %v3349_v47 = vadd.f32 %v7416_v13, %v3211_v14 }
 0x2fb   :  { %v3192_v25 = vpop.f32.mrf.mxu0 }
 0x2fc   :  { %v3213_v49 = vadd.f32 %v3192_v25, %v3065_v34  ;;  %v7489_v27 = vpop.f32.mrf.mxu1 }
 0x2fd   :  { %v3194_v0 = vpop.f32.mrf.mxu0 }
 0x2fe   :  { %v3214_v32 = vadd.f32 %v3194_v0, %v3067_v9  ;;  %v3351_v1 = vadd.f32 %v3330_v26, %v3213_v49  ;;  %v7496_v50 = vpop.f32.mrf.mxu1 }
 0x300   :  { %v3352_v19 = vadd.f32 %v3332_v39, %v3214_v32  ;;  %v3350_v39 = vadd.f32 %v7434_v20, %v3212_v29 }
 0x301   :  { %v3198_v55 = vpop.f32.mrf.mxu0 }
 0x302   :  { %v3215_v43 = vadd.f32 %v3198_v55, %v3071_v24  ;;  %v7510_v22 = vpop.f32.mrf.mxu1 }
 0x303   :  { %v3200_v4 = vpop.f32.mrf.mxu0 }
 0x304   :  { %v3216_v28 = vadd.f32 %v3200_v4, %v3073_v53  ;;  %v3353_v36 = vadd.f32 %v3336_v33, %v3215_v43  ;;  %v7518_v62 = vpop.f32.mrf.mxu1 }
 0x306   :  { %v7478_v54 = vadd.f32 %v3338_v45, %v3216_v28 }
 0x307   :  { %v3204_v42 = vpop.f32.mrf.mxu0 }
 0x308   :  { %v3217_v3 = vadd.f32 %v3204_v42, %v3077_v10  ;;  %v7523_v9 = vpop.f32.mrf.mxu1 }
 0x309   :  { %v3206_v23 = vpop.f32.mrf.mxu0 }
 0x30a   :  { %v3218_v58 = vadd.f32 %v3206_v23, %v7368_v57  ;;  %v7483_v7 = vadd.f32 %v3342_v51, %v3217_v3  ;;  %v80_v57 = vld [vmem:[%s7903_s4] sm:$0x3]  ;;  %v7529_v13 = vpop.f32.mrf.mxu1 }
 0x30b   :  { %v7506_v44 = vrot.slane %v80_v57, %v8039_v8  ;;  %v7515_v16 = vrot.slane %v80_v57, %v8040_v15 }
 0x30c   :  { %v7485_v56 = vadd.f32 %v3344_v60, %v3218_v58 }
 0x30d   :  { %v3616_v51 = vpop.f32.mrf.mxu1 }
 0x30f   :  { %v3618_v58 = vpop.f32.mrf.mxu1 }
 0x31a   :  { %v3456_v17 = vpop.f32.mrf.mxu0 }
 0x31b   :  { %v3485_v21 = vadd.f32 %v3456_v17, %v3347_v59 }
 0x31c   :  { %v3458_v63 = vpop.f32.mrf.mxu0 }
 0x31d   :  { %v3506_v18 = vadd.f32 %v7506_v44, %v3485_v21  ;;  %v3486_v26 = vadd.f32 %v3458_v63, %v3348_v48 }
 0x31f   :  { %v3507_v37 = vadd.f32 %v7515_v16, %v3486_v26  ;;  %v3462_v38 = vpop.f32.mrf.mxu0  ;;  %v3516_v46 = vmax.f32 %v3506_v18, 0.0 }
 0x320   :  { %v3487_v5 = vadd.f32 %v3462_v38, %v3349_v47  ;;  %v3782_v40 = vpop.f32.mrf.mxu1 }
 0x321   :  { %v3517_v34 = vmax.f32 %v3507_v37, 0.0  ;;  %v3464_v25 = vpop.f32.mrf.mxu0 }
 0x322   :  { %v3508_v61 = vadd.f32 %v7506_v44, %v3487_v5  ;;  %v3488_v33 = vadd.f32 %v3464_v25, %v3350_v39  ;;  %v3784_v8 = vpop.f32.mrf.mxu1 }
 0x323   :  { %v7526_v49 = vmax.f32 %v3516_v46, %v3517_v34 }
 0x324   :  { %v3509_v0 = vadd.f32 %v7515_v16, %v3488_v33  ;;  %v3518_v24 = vmax.f32 %v3508_v61, 0.0 }
 0x325   :  { %v3468_v32 = vpop.f32.mrf.mxu0 }
 0x326   :  { %v3519_v45 = vmax.f32 %v3509_v0, 0.0  ;;  %v3489_v55 = vadd.f32 %v3468_v32, %v3351_v1  ;;  %v3788_v21 = vpop.f32.mrf.mxu1 }
 0x327   :  { %v3470_v53 = vpop.f32.mrf.mxu0 }
 0x328   :  { %v7531_v20 = vmax.f32 %v3518_v24, %v3519_v45  ;;  %v3510_v43 = vadd.f32 %v7506_v44, %v3489_v55  ;;  %v3490_v4 = vadd.f32 %v3470_v53, %v3352_v19  ;;  %v3790_v29 = vpop.f32.mrf.mxu1 }
 0x32a   :  { %v3511_v28 = vadd.f32 %v7515_v16, %v3490_v4  ;;  %v3520_v42 = vmax.f32 %v3510_v43, 0.0 }
 0x32b   :  { %v3474_v10 = vpop.f32.mrf.mxu0 }
 0x32c   :  { %v3521_v60 = vmax.f32 %v3511_v28, 0.0  ;;  %v3491_v3 = vadd.f32 %v3474_v10, %v3353_v36  ;;  %v3794_v63 = vpop.f32.mrf.mxu1 }
 0x32d   :  { %v3476_v23 = vpop.f32.mrf.mxu0 }
 0x32e   :  { %v7535_v12 = vmax.f32 %v3520_v42, %v3521_v60  ;;  %v3512_v30 = vadd.f32 %v7506_v44, %v3491_v3  ;;  %v3492_v1 = vadd.f32 %v3476_v23, %v7478_v54  ;;  %v3796_v18 = vpop.f32.mrf.mxu1 }
 0x330   :  { %v3513_v57 = vadd.f32 %v7515_v16, %v3492_v1  ;;  %v3522_v19 = vmax.f32 %v3512_v30, 0.0 }
 0x331   :  { %v3480_v2 = vpop.f32.mrf.mxu0 }
 0x332   :  { %v3523_v11 = vmax.f32 %v3513_v57, 0.0  ;;  %v3493_v59 = vadd.f32 %v3480_v2, %v7483_v7  ;;  %v7548_v47 = vpop.f32.mrf.mxu1 }
 0x333   :  { %v3482_v41 = vpop.f32.mrf.mxu0 }
 0x334   :  { %v7541_v52 = vmax.f32 %v3522_v19, %v3523_v11  ;;  %v3514_v36 = vadd.f32 %v7506_v44, %v3493_v59  ;;  %v3494_v14 = vadd.f32 %v3482_v41, %v7485_v56  ;;  %v7550_v5 = vpop.f32.mrf.mxu1 }
 0x336   :  { %v3515_v17 = vadd.f32 %v7515_v16, %v3494_v14  ;;  %v3524_v54 = vmax.f32 %v3514_v36, 0.0 }
 0x337   :  { %v3806_v56 = vpop.f32.mrf.mxu1 }
 0x338   :  { %v3525_v48 = vmax.f32 %v3515_v17, 0.0 }
 0x339   :  { %v3808_v25 = vpop.f32.mrf.mxu1 }
 0x33a   :  { %v7546_v15 = vmax.f32 %v3524_v54, %v3525_v48 }
 0x344   :  { %v3687_v26 = vpop.f32.mrf.mxu0 }
 0x345   :  { %v3688_v28 = vadd.f32 %v3687_v26, %v7480_v35 }
 0x346   :  { %v3689_v7 = vpop.f32.mrf.mxu0 }
 0x347   :  { %v3690_v42 = vadd.f32 %v3689_v7, %v7487_v31  ;;  %v3811_v3 = vadd.f32 %v3782_v40, %v3688_v28 }
 0x349   :  { %v3693_v37 = vpop.f32.mrf.mxu0  ;;  %v3812_v57 = vadd.f32 %v3784_v8, %v3690_v42  ;;  %v4934_v42 = vld [vmem:[%s7904_s5 + $0x1f0] sm:$0xff] }
 0x34a   :  { %v3992_v33 = vpop.f32.mrf.mxu1  ;;  %v3694_v60 = vadd.f32 %v3693_v37, %v7489_v27 }
 0x34b   :  { %v3695_v38 = vpop.f32.mrf.mxu0 }
 0x34c   :  { %v3994_v53 = vpop.f32.mrf.mxu1  ;;  %v3696_v1 = vadd.f32 %v3695_v38, %v7496_v50  ;;  %v3813_v59 = vadd.f32 %v3788_v21, %v3694_v60 }
 0x34e   :  { %v3699_v39 = vpop.f32.mrf.mxu0  ;;  %v3814_v27 = vadd.f32 %v3790_v29, %v3696_v1  ;;  %v4919_v1 = vld [vmem:[%s7904_s5 + $0x178] sm:$0xff] }
 0x34f   :  { %v3998_v4 = vpop.f32.mrf.mxu1  ;;  %v3700_v2 = vadd.f32 %v3699_v39, %v7510_v22 }
 0x350   :  { %v3701_v46 = vpop.f32.mrf.mxu0 }
 0x351   :  { %v4000_v10 = vpop.f32.mrf.mxu1  ;;  %v3702_v40 = vadd.f32 %v3701_v46, %v7518_v62  ;;  %v3815_v48 = vadd.f32 %v3794_v63, %v3700_v2 }
 0x352   :  { %v7552_v34 = vpop.f32.mrf.mxu0 }
 0x353   :  { %v4004_v23 = vpop.f32.mrf.mxu1 }
 0x354   :  { %v7554_v61 = vpop.f32.mrf.mxu0 }
 0x355   :  { %v4006_v41 = vpop.f32.mrf.mxu1 }
 0x356   :  { %v3711_v0 = vpop.f32.mrf.mxu0 }
 0x357   :  { %v3712_v32 = vadd.f32 %v3711_v0, %v3616_v51  ;;  %v7566_v26 = vpop.f32.mrf.mxu1 }
 0x358   :  { %v3713_v24 = vpop.f32.mrf.mxu0 }
 0x359   :  { %v3714_v45 = vadd.f32 %v3713_v24, %v3618_v58  ;;  %v3819_v55 = vadd.f32 %v3806_v56, %v3712_v32  ;;  %v3816_v56 = vadd.f32 %v3796_v18, %v3702_v40  ;;  %v4930_v40 = vld [vmem:[%s7904_s5 + $0x1d0] sm:$0xff] }
 0x35b   :  { %v7556_v43 = vadd.f32 %v3808_v25, %v3714_v45 }
 0x366   :  { %v3887_v30 = vpop.f32.mrf.mxu0 }
 0x367   :  { %v3916_v51 = vadd.f32 %v3887_v30, %v3811_v3 }
 0x368   :  { %v3889_v58 = vpop.f32.mrf.mxu0 }
 0x369   :  { %v4021_v19 = vadd.f32 %v3992_v33, %v3916_v51  ;;  %v3917_v11 = vadd.f32 %v3889_v58, %v3812_v57  ;;  %v7570_v33 = vpop.f32.mrf.mxu1  ;;  %v4933_v51 = vld [vmem:[%s7904_s5 + $0x1e8] sm:$0xff] }
 0x36a   :  { %v3893_v35 = vpop.f32.mrf.mxu0 }
 0x36b   :  { %v4031_v36 = vadd.f32 %v4021_v19, %v7506_v44  ;;  %v4022_v31 = vadd.f32 %v3994_v53, %v3917_v11  ;;  %v3918_v14 = vadd.f32 %v3893_v35, %v3813_v59  ;;  %v4935_v53 = vld [vmem:[%s7904_s5 + $0x1f8] sm:$0xff]  ;;  %v4016_v60 = vpop.f32.mrf.mxu1  ;;  %v3708_v19 = vadd.f32 %v7554_v61, %v7529_v13  ;;  %v4932_v59 = vld [vmem:[%s7904_s5 + $0x1e0] sm:$0xff] }
 0x36c   :  { %v3895_v17 = vpop.f32.mrf.mxu0  ;;  %v3706_v13 = vadd.f32 %v7552_v34, %v7523_v9 }
 0x36d   :  { %v4032_v50 = vadd.f32 %v4022_v31, %v7515_v16  ;;  %v4023_v54 = vadd.f32 %v3998_v4, %v3918_v14  ;;  %v3919_v8 = vadd.f32 %v3895_v17, %v3814_v27  ;;  %v4041_v22 = vmax.f32 %v4031_v36, 0.0  ;;  %v4917_v36 = vld [vmem:[%s7904_s5 + $0x168] sm:$0xff]  ;;  %v4931_v31 = vld [vmem:[%s7904_s5 + $0x1d8] sm:$0xff]  ;;  %v4916_v27 = vld [vmem:[%s7904_s5 + $0x160] sm:$0xff] }
 0x36e   :  { %v3899_v7 = vpop.f32.mrf.mxu0  ;;  %v3818_v9 = vadd.f32 %v7550_v5, %v3708_v19  ;;  %v3817_v17 = vadd.f32 %v7548_v47, %v3706_v13  ;;  %v4943_v19 = vld [vmem:[%s7904_s5 + $0x238] sm:$0xff]  ;;  %v4936_v13 = vld [vmem:[%s7904_s5 + $0x200] sm:$0xff] }
 0x36f   :  { %v4042_v21 = vmax.f32 %v4032_v50, 0.0  ;;  %v4033_v37 = vadd.f32 %v4023_v54, %v7506_v44  ;;  %v4024_v38 = vadd.f32 %v4000_v10, %v3919_v8  ;;  %v3920_v39 = vadd.f32 %v3899_v7, %v3815_v48  ;;  %v4915_v8 = vld [vmem:[%s7904_s5 + $0x158] sm:$0xff]  ;;  %v4929_v48 = vld [vmem:[%s7904_s5 + $0x1c8] sm:$0xff]  ;;  %v4914_v7 = vld [vmem:[%s7904_s5 + $0x150] sm:$0xff] }
 0x370   :  { %v3901_v25 = vpop.f32.mrf.mxu0 }
 0x371   :  { %v4056_v29 = vmax.f32 %v4041_v22, %v4042_v21  ;;  %v4034_v62 = vadd.f32 %v4024_v38, %v7515_v16  ;;  %v4025_v46 = vadd.f32 %v4004_v23, %v3920_v39  ;;  %v3921_v0 = vadd.f32 %v3901_v25, %v3816_v56  ;;  %v4928_v21 = vld [vmem:[%s7904_s5 + $0x1c0] sm:$0xff]  ;;  %v4913_v39 = vld [vmem:[%s7904_s5 + $0x148] sm:$0xff]  ;;  %v4927_v56 = vld [vmem:[%s7904_s5 + $0x1b8] sm:$0xff] }
 0x372   :  { %v7572_v32 = vpop.f32.mrf.mxu0  ;;  %v4043_v24 = vmax.f32 %v4033_v37, 0.0 }
 0x373   :  { %v4061_v63 = vmax.f32 %v7526_v49, %v4056_v29  ;;  %v4044_v45 = vmax.f32 %v4034_v62, 0.0  ;;  %v4035_v18 = vadd.f32 %v4025_v46, %v7506_v44  ;;  %v4026_v4 = vadd.f32 %v4006_v41, %v3921_v0  ;;  %v4018_v41 = vpop.f32.mrf.mxu1  ;;  %v4912_v29 = vld [vmem:[%s7904_s5 + $0x140] sm:$0xff]  ;;  %v4926_v62 = vld [vmem:[%s7904_s5 + $0x1b0] sm:$0xff] }
 0x374   :  { %v3907_v28 = vpop.f32.mrf.mxu0  ;;  %v3922_v22 = vadd.f32 %v7572_v32, %v3817_v17  ;;  %v4924_v32 = vld [vmem:[%s7904_s5 + $0x1a0] sm:$0xff]  ;;  %v4517_v17 = vld [vmem:[%s7906_s7 + $0x28] sm:$0xff] }
 0x375   :  { %v4057_v10 = vmax.f32 %v4043_v24, %v4044_v45  ;;  %5142 = vmatmul.mubr.f32.vlgmr.msra.gmra.mxu1 %v4061_v63  ;;  %v4036_v3 = vadd.f32 %v4026_v4, %v7515_v16  ;;  %v4045_v57 = vmax.f32 %v4035_v18, 0.0  ;;  %v3923_v50 = vadd.f32 %v3907_v28, %v3818_v9  ;;  %v4923_v24 = vld [vmem:[%s7904_s5 + $0x198] sm:$0xff]  ;;  %v4922_v18 = vld [vmem:[%s7904_s5 + $0x190] sm:$0xff]  ;;  %v4521_v9 = vld [vmem:[%s7906_s7 + $0x48] sm:$0xff] }
 0x376   :  { %5180 = vmatpush3.msra.mxu1 %v4935_v53  ;;  %v3911_v49 = vpop.f32.mrf.mxu0  ;;  %5211 = vmatprep.mubr.msk.f32.mxu1 %vm5503_vm1, %v7988_v6  ;;  %v4027_v25 = vadd.f32 %v7566_v26, %v3922_v22  ;;  %v4911_v26 = vld [vmem:[%s7904_s5 + $0x138] sm:$0xff]  ;;  %v4908_v53 = vld [vmem:[%s7904_s5 + $0x120] sm:$0xff] }
 0x377   :  { %v4062_v23 = vmax.f32 %v7531_v20, %v4057_v10  ;;  %v3924_v30 = vadd.f32 %v3911_v49, %v3819_v55  ;;  %5181 = vmatprep.subr.mxu1 %v7988_v6  ;;  %v4046_v58 = vmax.f32 %v4036_v3, 0.0  ;;  %v4918_v55 = vld [vmem:[%s7904_s5 + $0x170] sm:$0xff]  ;;  %v4028_v37 = vadd.f32 %v7570_v33, %v3923_v50  ;;  %v4925_v33 = vld [vmem:[%s7904_s5 + $0x1a8] sm:$0xff]  ;;  %v4907_v28 = vld [vmem:[%s7904_s5 + $0x118] sm:$0xff] }
 0x378   :  { %5182 = vmatpush3.msra.mxu1 %v4934_v42  ;;  %v3913_v2 = vpop.f32.mrf.mxu0  ;;  %v4037_v0 = vadd.f32 %v4027_v25, %v7506_v44  ;;  %v4921_v10 = vld [vmem:[%s7904_s5 + $0x188] sm:$0xff]  ;;  %v4906_v42 = vld [vmem:[%s7904_s5 + $0x110] sm:$0xff]  ;;  %v4516_v50 = vld [vmem:[%s7906_s7 + $0x20] sm:$0xff] }
 0x379   :  { %v4029_v11 = vadd.f32 %v4016_v60, %v3924_v30  ;;  %v3925_v20 = vadd.f32 %v3913_v2, %v7556_v43  ;;  %5183 = vmatprep.subr.mxu1 %v7988_v6  ;;  %5107 = vmatmul.mubr.f32.vlgmr.msra.gmra.mxu0 %v4062_v23  ;;  %v7603_v35 = vmax.f32 %v4045_v57, %v4046_v58  ;;  %v4920_v60 = vld [vmem:[%s7904_s5 + $0x180] sm:$0xff]  ;;  %v4905_v49 = vld [vmem:[%s7904_s5 + $0x108] sm:$0xff]  ;;  %v4950_v30 = vld [vmem:[%s7904_s5 + $0x270] sm:$0xff] }
 0x37a   :  { %5145 = vmatpush3.msra.mxu0 %v4919_v1  ;;  %5184 = vmatpush3.msra.mxu1 %v4933_v51  ;;  %v4038_v46 = vadd.f32 %v4028_v37, %v7515_v16  ;;  %v4047_v45 = vmax.f32 %v4037_v0, 0.0  ;;  %v4904_v23 = vld [vmem:[%s7904_s5 + $0x100] sm:$0xff]  ;;  %v4949_v1 = vld [vmem:[%s7904_s5 + $0x268] sm:$0xff]  ;;  %v4947_v51 = vld [vmem:[%s7904_s5 + $0x258] sm:$0xff] }
 0x37b   :  { %v4039_v61 = vadd.f32 %v4029_v11, %v7506_v44  ;;  %v4030_v43 = vadd.f32 %v4018_v41, %v3925_v20  ;;  %5146 = vmatprep.subr.mxu0 %v7988_v6  ;;  %5185 = vmatprep.subr.mxu1 %v7988_v6  ;;  %v4063_v14 = vmax.f32 %v7535_v12, %v7603_v35  ;;  %v4909_v44 = vld [vmem:[%s7904_s5 + $0x128] sm:$0xff]  ;;  %v4948_v12 = vld [vmem:[%s7904_s5 + $0x260] sm:$0xff]  ;;  %v4946_v57 = vld [vmem:[%s7904_s5 + $0x250] sm:$0xff] }
 0x37c   :  { %5147 = vmatpush3.msra.mxu0 %v4918_v55  ;;  %5186 = vmatpush3.msra.mxu1 %v4932_v59  ;;  %v4048_v63 = vmax.f32 %v4038_v46, 0.0  ;;  %v4945_v58 = vld [vmem:[%s7904_s5 + $0x248] sm:$0xff]  ;;  %v4944_v2 = vld [vmem:[%s7904_s5 + $0x240] sm:$0xff]  ;;  %v4942_v11 = vld [vmem:[%s7904_s5 + $0x230] sm:$0xff] }
 0x37d   :  { %v4040_v34 = vadd.f32 %v4030_v43, %v7515_v16  ;;  %5148 = vmatprep.subr.mxu0 %v7988_v6  ;;  %5187 = vmatprep.subr.mxu1 %v7988_v6  ;;  %v4049_v5 = vmax.f32 %v4039_v61, 0.0  ;;  %v4910_v16 = vld [vmem:[%s7904_s5 + $0x130] sm:$0xff]  ;;  %v4941_v20 = vld [vmem:[%s7904_s5 + $0x228] sm:$0xff]  ;;  %v4940_v55 = vld [vmem:[%s7904_s5 + $0x220] sm:$0xff] }
 0x37e   :  { %5149 = vmatpush3.msra.mxu0 %v4917_v36  ;;  %5188 = vmatpush3.msra.mxu1 %v4931_v31  ;;  %v4059_v4 = vmax.f32 %v4047_v45, %v4048_v63  ;;  %v4939_v59 = vld [vmem:[%s7904_s5 + $0x218] sm:$0xff]  ;;  %v4938_v41 = vld [vmem:[%s7904_s5 + $0x210] sm:$0xff]  ;;  %v4937_v35 = vld [vmem:[%s7904_s5 + $0x208] sm:$0xff] }
 0x37f   :  { %v4050_v54 = vmax.f32 %v4040_v34, 0.0  ;;  %5150 = vmatprep.subr.mxu0 %v7988_v6  ;;  %5189 = vmatprep.subr.mxu1 %v7988_v6  ;;  %v4527_v61 = vld [vmem:[%s7906_s7 + $0x78] sm:$0xff]  ;;  %v4526_v43 = vld [vmem:[%s7906_s7 + $0x70] sm:$0xff]  ;;  %v4524_v36 = vld [vmem:[%s7906_s7 + $0x60] sm:$0xff] }
 0x380   :  { %5151 = vmatpush3.msra.mxu0 %v4916_v27  ;;  %5190 = vmatpush3.msra.mxu1 %v4930_v40  ;;  %v4064_v3 = vmax.f32 %v7541_v52, %v4059_v4  ;;  %v4951_v52 = vld [vmem:[%s7904_s5 + $0x278] sm:$0xff]  ;;  %v4520_v34 = vld [vmem:[%s7906_s7 + $0x40] sm:$0xff]  ;;  %v4518_v40 = vld [vmem:[%s7906_s7 + $0x30] sm:$0xff] }
 0x381   :  { %v7638_v47 = vmax.f32 %v4049_v5, %v4050_v54  ;;  %5152 = vmatprep.subr.mxu0 %v7988_v6  ;;  %5191 = vmatprep.subr.mxu1 %v7988_v6  ;;  %v4523_v31 = vld [vmem:[%s7906_s7 + $0x58] sm:$0xff]  ;;  %v4514_v54 = vld [vmem:[%s7906_s7 + $0x10] sm:$0xff]  ;;  %v4610_v46 = vld [vmem:[#allocation6 + $0x20] sm:$0xff] }
 0x382   :  { %5153 = vmatpush3.msra.mxu0 %v4915_v8  ;;  %5192 = vmatpush3.msra.mxu1 %v4929_v48  ;;  %v4519_v27 = vld [vmem:[%s7906_s7 + $0x38] sm:$0xff]  ;;  %v4513_v8 = vld [vmem:[%s7906_s7 + $0x8] sm:$0xff]  ;;  %v4512_v48 = vld [vmem:[%s7906_s7] sm:$0xff] }
 0x383   :  { %v4065_v38 = vmax.f32 %v7546_v15, %v7638_v47  ;;  %5154 = vmatprep.subr.mxu0 %v7988_v6  ;;  %5193 = vmatprep.subr.mxu1 %v7988_v6  ;;  %v4525_v15 = vld [vmem:[%s7906_s7 + $0x68] sm:$0xff]  ;;  %v4515_v5 = vld [vmem:[%s7906_s7 + $0x18] sm:$0xff]  ;;  %v4620_v47 = vld [vmem:[#allocation6 + $0x70] sm:$0xff] }
 0x384   :  { %5155 = vmatpush3.msra.mxu0 %v4914_v7  ;;  %5194 = vmatpush3.msra.mxu1 %v4928_v21  ;;  %v4621_v22 = vld [vmem:[#allocation6 + $0x78] sm:$0xff]  ;;  %v4619_v7 = vld [vmem:[#allocation6 + $0x68] sm:$0xff]  ;;  %v4618_v21 = vld [vmem:[#allocation6 + $0x60] sm:$0xff] }
 0x385   :  { %5156 = vmatprep.subr.mxu0 %v7988_v6  ;;  %5195 = vmatprep.subr.mxu1 %v7988_v6  ;;  %v4617_v37 = vld [vmem:[#allocation6 + $0x58] sm:$0xff] }
 0x386   :  { %5157 = vmatpush3.msra.mxu0 %v4913_v39  ;;  %5196 = vmatpush3.msra.mxu1 %v4927_v56  ;;  %v4615_v39 = vld [vmem:[#allocation6 + $0x48] sm:$0xff]  ;;  %v4614_v56 = vld [vmem:[#allocation6 + $0x40] sm:$0xff]  ;;  %v4613_v25 = vld [vmem:[#allocation6 + $0x38] sm:$0xff] }
 0x387   :  { %5158 = vmatprep.subr.mxu0 %v7988_v6  ;;  %5197 = vmatprep.subr.mxu1 %v7988_v6 }
 0x388   :  { %5159 = vmatpush3.msra.mxu0 %v4912_v29  ;;  %5198 = vmatpush3.msra.mxu1 %v4926_v62  ;;  %v4612_v29 = vld [vmem:[#allocation6 + $0x30] sm:$0xff]  ;;  %v4611_v62 = vld [vmem:[#allocation6 + $0x28] sm:$0xff] }
 0x389   :  { %5160 = vmatprep.subr.mxu0 %v7988_v6  ;;  %5199 = vmatprep.subr.mxu1 %v7988_v6 }
 0x38a   :  { %5161 = vmatpush3.msra.mxu0 %v4911_v26  ;;  %5200 = vmatpush3.msra.mxu1 %v4925_v33  ;;  %v4609_v26 = vld [vmem:[#allocation6 + $0x18] sm:$0xff] }
 0x38b   :  { %5162 = vmatprep.subr.mxu0 %v7988_v6  ;;  %5201 = vmatprep.subr.mxu1 %v7988_v6 }
 0x38c   :  { %5163 = vmatpush3.msra.mxu0 %v4910_v16  ;;  %5202 = vmatpush3.msra.mxu1 %v4924_v32 }
 0x38d   :  { %5164 = vmatprep.subr.mxu0 %v7988_v6  ;;  %5203 = vmatprep.subr.mxu1 %v7988_v6 }
 0x38e   :  { %5165 = vmatpush3.msra.mxu0 %v4909_v44  ;;  %5204 = vmatpush3.msra.mxu1 %v4923_v24 }
 0x38f   :  { %5166 = vmatprep.subr.mxu0 %v7988_v6  ;;  %5205 = vmatprep.subr.mxu1 %v7988_v6 }
 0x390   :  { %5167 = vmatpush3.msra.mxu0 %v4908_v53  ;;  %5206 = vmatpush3.msra.mxu1 %v4922_v18 }
 0x391   :  { %5168 = vmatprep.subr.mxu0 %v7988_v6  ;;  %5207 = vmatprep.subr.mxu1 %v7988_v6 }
 0x392   :  { %5169 = vmatpush3.msra.mxu0 %v4907_v28  ;;  %5208 = vmatpush3.msra.mxu1 %v4921_v10  ;;  %v4952_v10 = vld [vmem:[%s7905_s6] ss:$0 sm:$0xff] }
 0x393   :  { %5170 = vmatprep.subr.mxu0 %v7988_v6  ;;  %5209 = vmatprep.subr.mxu1 %v7988_v6 }
 0x394   :  { %5171 = vmatpush3.msra.mxu0 %v4906_v42  ;;  %5210 = vmatpush3.msra.mxu1 %v4920_v60 }
 0x395   :  { %5172 = vmatprep.subr.mxu0 %v7988_v6  ;;  %5212 = vmatmul.mubr.f32.vlgmr.msra.gmra.mxu1 %v4064_v3 }
 0x396   :  { %5173 = vmatpush3.msra.mxu0 %v4905_v49  ;;  %5176 = vmatprep.mubr.msk.f32.mxu0 %vm5503_vm1, %v7988_v6 }
 0x397   :  { %5174 = vmatprep.subr.mxu0 %v7988_v6  ;;  %5249 = vmatprep.subr.mxu1 %v7988_v6 }
 0x398   :  { %5175 = vmatpush3.msra.mxu0 %v4904_v23  ;;  %5281 = vmatprep.mubr.msk.f32.mxu1 %vm5503_vm1, %v7988_v6  ;;  %v4608_v23 = vld [vmem:[#allocation6 + $0x10] sm:$0xff] }
 0x399   :  { %5177 = vmatmul.mubr.f32.vlgmr.msra.gmra.mxu0 %v4063_v14  ;;  %5214 = vmatprep.subr.mxu0 %v7988_v6  ;;  %v4522_v14 = vld [vmem:[%s7906_s7 + $0x50] sm:$0xff] }
 0x39a   :  { %5215 = vmatpush3.msra.mxu0 %v4951_v52  ;;  %5246 = vmatprep.mubr.msk.f32.mxu0 %vm5503_vm1, %v7988_v6  ;;  %v4607_v52 = vld [vmem:[#allocation6 + $0x8] sm:$0xff] }
 0x39b   :  { %5216 = vmatprep.subr.mxu0 %v7988_v6  ;;  %5250 = vmatpush3.msra.mxu1 %v4527_v61 }
 0x39c   :  { %5217 = vmatpush3.msra.mxu0 %v4950_v30  ;;  %5251 = vmatprep.subr.mxu1 %v7988_v6  ;;  %v4606_v30 = vld [vmem:[#allocation6] sm:$0xff] }
 0x39d   :  { %5218 = vmatprep.subr.mxu0 %v7988_v6  ;;  %5252 = vmatpush3.msra.mxu1 %v4526_v43 }
 0x39e   :  { %5219 = vmatpush3.msra.mxu0 %v4949_v1  ;;  %5253 = vmatprep.subr.mxu1 %v7988_v6  ;;  %v4953_v1 = vld [vmem:[%s7907_s8] ss:$0 sm:$0xff] }
 0x39f   :  { %5220 = vmatprep.subr.mxu0 %v7988_v6  ;;  %5254 = vmatpush3.msra.mxu1 %v4525_v15 }
 0x3a0   :  { %5221 = vmatpush3.msra.mxu0 %v4948_v12  ;;  %5255 = vmatprep.subr.mxu1 %v7988_v6 }
 0x3a1   :  { %5222 = vmatprep.subr.mxu0 %v7988_v6  ;;  %5256 = vmatpush3.msra.mxu1 %v4524_v36 }
 0x3a2   :  { %5223 = vmatpush3.msra.mxu0 %v4947_v51  ;;  %5257 = vmatprep.subr.mxu1 %v7988_v6 }
 0x3a3   :  { %5224 = vmatprep.subr.mxu0 %v7988_v6  ;;  %5258 = vmatpush3.msra.mxu1 %v4523_v31 }
 0x3a4   :  { %5225 = vmatpush3.msra.mxu0 %v4946_v57  ;;  %5259 = vmatprep.subr.mxu1 %v7988_v6 }
 0x3a5   :  { %5226 = vmatprep.subr.mxu0 %v7988_v6  ;;  %5260 = vmatpush3.msra.mxu1 %v4522_v14 }
 0x3a6   :  { %5227 = vmatpush3.msra.mxu0 %v4945_v58  ;;  %5261 = vmatprep.subr.mxu1 %v7988_v6 }
 0x3a7   :  { %5228 = vmatprep.subr.mxu0 %v7988_v6  ;;  %5262 = vmatpush3.msra.mxu1 %v4521_v9 }
 0x3a8   :  { %5229 = vmatpush3.msra.mxu0 %v4944_v2  ;;  %5263 = vmatprep.subr.mxu1 %v7988_v6  ;;  %v4954_v2 = vld [vmem:[%s7909_s10] ss:$0 sm:$0xff] }
 0x3a9   :  { %5230 = vmatprep.subr.mxu0 %v7988_v6  ;;  %5264 = vmatpush3.msra.mxu1 %v4520_v34 }
 0x3aa   :  { %5231 = vmatpush3.msra.mxu0 %v4943_v19  ;;  %5265 = vmatprep.subr.mxu1 %v7988_v6 }
 0x3ab   :  { %5232 = vmatprep.subr.mxu0 %v7988_v6  ;;  %5266 = vmatpush3.msra.mxu1 %v4519_v27 }
 0x3ac   :  { %5233 = vmatpush3.msra.mxu0 %v4942_v11  ;;  %5267 = vmatprep.subr.mxu1 %v7988_v6 }
 0x3ad   :  { %5234 = vmatprep.subr.mxu0 %v7988_v6  ;;  %5268 = vmatpush3.msra.mxu1 %v4518_v40 }
 0x3ae   :  { %5235 = vmatpush3.msra.mxu0 %v4941_v20  ;;  %5269 = vmatprep.subr.mxu1 %v7988_v6 }
 0x3af   :  { %5236 = vmatprep.subr.mxu0 %v7988_v6  ;;  %5270 = vmatpush3.msra.mxu1 %v4517_v17 }
 0x3b0   :  { %5237 = vmatpush3.msra.mxu0 %v4940_v55  ;;  %5271 = vmatprep.subr.mxu1 %v7988_v6 }
 0x3b1   :  { %5238 = vmatprep.subr.mxu0 %v7988_v6  ;;  %5272 = vmatpush3.msra.mxu1 %v4516_v50 }
 0x3b2   :  { %5239 = vmatpush3.msra.mxu0 %v4939_v59  ;;  %5273 = vmatprep.subr.mxu1 %v7988_v6 }
 0x3b3   :  { %5240 = vmatprep.subr.mxu0 %v7988_v6  ;;  %5274 = vmatpush3.msra.mxu1 %v4515_v5 }
 0x3b4   :  { %5241 = vmatpush3.msra.mxu0 %v4938_v41  ;;  %5275 = vmatprep.subr.mxu1 %v7988_v6 }
 0x3b5   :  { %5242 = vmatprep.subr.mxu0 %v7988_v6  ;;  %5276 = vmatpush3.msra.mxu1 %v4514_v54 }
 0x3b6   :  { %5243 = vmatpush3.msra.mxu0 %v4937_v35  ;;  %5277 = vmatprep.subr.mxu1 %v7988_v6 }
 0x3b7   :  { %5244 = vmatprep.subr.mxu0 %v7988_v6  ;;  %5278 = vmatpush3.msra.mxu1 %v4513_v8 }
 0x3b8   :  { %5245 = vmatpush3.msra.mxu0 %v4936_v13  ;;  %5279 = vmatprep.subr.mxu1 %v7988_v6 }
 0x3b9   :  { %5247 = vmatmul.mubr.f32.vlgmr.msra.gmra.mxu0 %v4065_v38  ;;  %5284 = vmatprep.subr.mxu0 %v7988_v6  ;;  %v4616_v38 = vld [vmem:[#allocation6 + $0x50] sm:$0xff] }
 0x3ba   :  { %5316 = vmatprep.mubr.msk.f32.mxu0 %vm5503_vm1, %v7988_v6  ;;  %5280 = vmatpush3.msra.mxu1 %v4512_v48 }
 0x3bb   :  { %5285 = vmatpush3.msra.mxu0 %v4621_v22 }
 0x3bc   :  { %5286 = vmatprep.subr.mxu0 %v7988_v6 }
 0x3bd   :  { %5287 = vmatpush3.msra.mxu0 %v4620_v47 }
 0x3be   :  { %5288 = vmatprep.subr.mxu0 %v7988_v6 }
 0x3bf   :  { %5289 = vmatpush3.msra.mxu0 %v4619_v7 }
 0x3c0   :  { %5290 = vmatprep.subr.mxu0 %v7988_v6 }
 0x3c1   :  { %5291 = vmatpush3.msra.mxu0 %v4618_v21 }
 0x3c2   :  { %5292 = vmatprep.subr.mxu0 %v7988_v6 }
 0x3c3   :  { %5293 = vmatpush3.msra.mxu0 %v4617_v37 }
 0x3c4   :  { %5294 = vmatprep.subr.mxu0 %v7988_v6 }
 0x3c5   :  { %5295 = vmatpush3.msra.mxu0 %v4616_v38 }
 0x3c6   :  { %5296 = vmatprep.subr.mxu0 %v7988_v6 }
 0x3c7   :  { %5297 = vmatpush3.msra.mxu0 %v4615_v39 }
 0x3c8   :  { %5298 = vmatprep.subr.mxu0 %v7988_v6 }
 0x3c9   :  { %5299 = vmatpush3.msra.mxu0 %v4614_v56 }
 0x3ca   :  { %5300 = vmatprep.subr.mxu0 %v7988_v6 }
 0x3cb   :  { %5301 = vmatpush3.msra.mxu0 %v4613_v25 }
 0x3cc   :  { %5302 = vmatprep.subr.mxu0 %v7988_v6 }
 0x3cd   :  { %5303 = vmatpush3.msra.mxu0 %v4612_v29 }
 0x3ce   :  { %5304 = vmatprep.subr.mxu0 %v7988_v6 }
 0x3cf   :  { %5305 = vmatpush3.msra.mxu0 %v4611_v62 }
 0x3d0   :  { %5306 = vmatprep.subr.mxu0 %v7988_v6 }
 0x3d1   :  { %5307 = vmatpush3.msra.mxu0 %v4610_v46 }
 0x3d2   :  { %5308 = vmatprep.subr.mxu0 %v7988_v6 }
 0x3d3   :  { %5309 = vmatpush3.msra.mxu0 %v4609_v26 }
 0x3d4   :  { %5310 = vmatprep.subr.mxu0 %v7988_v6 }
 0x3d5   :  { %5311 = vmatpush3.msra.mxu0 %v4608_v23 }
 0x3d6   :  { %5312 = vmatprep.subr.mxu0 %v7988_v6 }
 0x3d7   :  { %5313 = vmatpush3.msra.mxu0 %v4607_v52 }
 0x3d8   :  { %5314 = vmatprep.subr.mxu0 %v7988_v6 }
 0x3d9   :  { %5315 = vmatpush3.msra.mxu0 %v4606_v30 }
 0x435   :  { %v4235_v33 = vpop.f32.mrf.mxu1 }
 0x437   :  { %v5143_v0 = vpop.f32.mrf.mxu1 }
 0x439   :  { %v4165_v16 = vpop.f32.mrf.mxu0 }
 0x43a   :  { %v4236_v53 = vadd.f32 %v4235_v33, %v4165_v16 }
 0x43b   :  { %v5108_v32 = vpop.f32.mrf.mxu0 }
 0x455   :  { %v4410_v63 = vpop.f32.mrf.mxu1 }
 0x457   :  { %v5213_v44 = vpop.f32.mrf.mxu1 }
 0x459   :  { %v4322_v24 = vpop.f32.mrf.mxu0 }
 0x45a   :  { %v4326_v18 = vadd.f32 %v4322_v24, %v4236_v53 }
 0x45b   :  { %v5178_v45 = vpop.f32.mrf.mxu0 }
 0x45c   :  { %v4414_v4 = vadd.f32 %v4410_v63, %v4326_v18 }
 0x479   :  { %v4498_v28 = vpop.f32.mrf.mxu0 }
 0x47a   :  { %v4502_v42 = vadd.f32 %v4498_v28, %v4414_v4 }
 0x47b   :  { %v5248_v60 = vpop.f32.mrf.mxu0 }
 0x47c   :  { %v4510_v3 = vadd.f32 %v4952_v10, %v4502_v42 }
 0x47e   :  { %v4511_v49 = vmax.f32 %v4510_v3, 0.0 }
 0x480   :  { %5282 = vmatmul.mubr.f32.vlgmr.msra.gmra.mxu1 %v4511_v49 }
 0x540   :  { %v4601_v12 = vpop.f32.mrf.mxu1 }
 0x541   :  { %v4602_v51 = vadd.f32 %v4953_v1, %v4601_v12 }
 0x542   :  { %v5283_v57 = vpop.f32.mrf.mxu1 }
 0x543   :  { %v4605_v58 = vmax.f32 %v4602_v51, 0.0 }
 0x545   :  { %5317 = vmatmul.mubr.f32.vlgmr.msra.gmra.mxu0 %v4605_v58 }
 0x605   :  { %v4695_v19 = vpop.f32.mrf.mxu0 }
 0x606   :  { %v4696_v11 = vadd.f32 %v4954_v2, %v4695_v19 }
 0x607   :  { %v5318_v20 = vpop.f32.mrf.mxu0 }
 0x608   :  { %4699 = vst [vmem:[%s7910_s11] sm:$0xff] %v4696_v11 }
 0x609   :  { %4704 = vsyncpa [#allocation3], 1 }
 0x60a   :  { %4705 = vsyncpa [#allocation5], 1 }

</bundles_post_ra>
